<compile_context>
chip_gen: v7x
topology: tpu7x:2x2x1
jax: 0.10.0
libtpu: 0.0.40
codegen_flags: <defaults>
</compile_context>

<pallas_src>
import jax
import jax.numpy as jnp
from jax.experimental import pallas as pl
from jax.experimental.pallas import tpu as pltpu

D_IN = 3072
D_HID = 512


def _round_up(n, m):
    return ((n + m - 1) // m) * m


def _classifier_kernel(x_ref, aw_ref, ab_ref, w1_ref, b1_ref, w2_ref, b2_ref,
                       out_ref):
    x = x_ref[...]                                               # (TB, 3072) f32

    # attention: Linear(3072, 1) + sigmoid — VPU mul + XLU lane reduce
    # (avoids an MXU matmul with only 1 useful output column).
    att = jnp.sum(x * aw_ref[...], axis=-1, keepdims=True) + ab_ref[0]
    weights = jax.nn.sigmoid(att)                                # (TB, 1)

    # weighted features: broadcast multiply over the feature dim
    weighted = weights * x                                       # (TB, 3072)

    # fc1: Linear(3072, 512) in bf16 with f32 accumulation, then ReLU
    h = jnp.dot(weighted.astype(jnp.bfloat16), w1_ref[...],
                preferred_element_type=jnp.float32)              # (TB, 512)
    h = jnp.maximum(h + b1_ref[...], 0.0)

    # fc2: Linear(512, 1) + sigmoid — again VPU mul + lane reduce
    o = jnp.sum(h * w2_ref[...], axis=-1, keepdims=True) + b2_ref[0]
    out_ref[...] = jax.nn.sigmoid(o).astype(out_ref.dtype)       # (TB, 1)


def simple_attention_classifier(x, params, *, block_b=256):
    """x: (B, 3072) float32. Returns (B, 1) float32."""
    B = x.shape[0]
    # Batch tile: multiple of 8 (sublane), capped at block_b (fills MXU M dim).
    tb = min(block_b, _round_up(B, 8))
    b_pad = _round_up(B, tb)
    if b_pad != B:
        x = jnp.pad(x, ((0, b_pad - B), (0, 0)))

    out = pl.pallas_call(
        _classifier_kernel,
        out_shape=jax.ShapeDtypeStruct((b_pad, 1), jnp.float32),
        grid=(b_pad // tb,),
        in_specs=[
            pl.BlockSpec((tb, D_IN), lambda i: (i, 0)),           # x (tiled)
            pl.BlockSpec((1, D_IN), lambda i: (0, 0)),            # attn_w (resident)
            pl.BlockSpec(memory_space=pltpu.MemorySpace.SMEM),    # attn_b scalar
            pl.BlockSpec((D_IN, D_HID), lambda i: (0, 0)),        # fc1_w bf16 (resident)
            pl.BlockSpec((1, D_HID), lambda i: (0, 0)),           # fc1_b
            pl.BlockSpec((1, D_HID), lambda i: (0, 0)),           # fc2_w (row vector)
            pl.BlockSpec(memory_space=pltpu.MemorySpace.SMEM),    # fc2_b scalar
        ],
        out_specs=pl.BlockSpec((tb, 1), lambda i: (i, 0)),
        compiler_params=pltpu.CompilerParams(
            dimension_semantics=("parallel",),
            vmem_limit_bytes=40 << 20,   # ~weights (3 MiB bf16) + 2x batch tiles + temps
        ),
    )(x, params["attn_w"], params["attn_b"], params["fc1_w"],
      params["fc1_b"], params["fc2_w"], params["fc2_b"])
    return out[:B]


def init_params(key):
    """nn.Linear-style init, stored in kernel-friendly layouts.

    attn_w / fc2_w are lane-dense row vectors (1, in); fc1_w is (in, out) bf16.
    """
    k = jax.random.split(key, 6)
    sa = 1.0 / jnp.sqrt(D_IN)
    s2 = 1.0 / jnp.sqrt(D_HID)
    return {
        "attn_w": jax.random.uniform(k[0], (1, D_IN), jnp.float32, -sa, sa),
        "attn_b": jax.random.uniform(k[1], (1,), jnp.float32, -sa, sa),
        "fc1_w": jax.random.uniform(k[2], (D_IN, D_HID), jnp.float32,
                                    -sa, sa).astype(jnp.bfloat16),
        "fc1_b": jax.random.uniform(k[3], (1, D_HID), jnp.float32, -sa, sa),
        "fc2_w": jax.random.uniform(k[4], (1, D_HID), jnp.float32, -s2, s2),
        "fc2_b": jax.random.uniform(k[5], (1,), jnp.float32, -s2, s2),
    }


def _reference(x, p):
    """Pure-JAX reference (same bf16 fc1 weights / activations as the kernel)."""
    w = jax.nn.sigmoid(jnp.sum(x * p["attn_w"], axis=-1, keepdims=True)
                       + p["attn_b"][0])
    xw = w * x
    h = jnp.dot(xw.astype(jnp.bfloat16), p["fc1_w"],
                preferred_element_type=jnp.float32)
    h = jnp.maximum(h + p["fc1_b"], 0.0)
    o = jnp.sum(h * p["fc2_w"], axis=-1, keepdims=True) + p["fc2_b"][0]
    return jax.nn.sigmoid(o)


if __name__ == "__main__":
    key = jax.random.PRNGKey(0)
    kx, kp = jax.random.split(key)

    B = 8
    x = jax.random.normal(kx, (B, D_IN), jnp.float32)
    params = init_params(kp)

    out = jax.block_until_ready(simple_attention_classifier(x, params))

    ref = _reference(x, params)
    assert out.shape == (B, 1)
    assert jnp.allclose(out, ref, atol=1e-4, rtol=1e-4), (
        f"mismatch: max abs err {jnp.max(jnp.abs(out - ref))}")

    print("KERNEL_OK")
</pallas_src>

<mosaic_0001>
module attributes {stable_mosaic.version = 11 : i64} {
  func.func @_classifier_kernel(%arg0: i32, %arg1: memref<8x3072xf32, #tpu.memory_space<vmem>>, %arg2: memref<1x3072xf32, #tpu.memory_space<vmem>>, %arg3: memref<1xf32, #tpu.memory_space<smem>>, %arg4: memref<3072x512xbf16, #tpu.memory_space<vmem>>, %arg5: memref<1x512xf32, #tpu.memory_space<vmem>>, %arg6: memref<1x512xf32, #tpu.memory_space<vmem>>, %arg7: memref<1xf32, #tpu.memory_space<smem>>, %arg8: memref<8x1xf32, #tpu.memory_space<vmem>>) attributes {dimension_semantics = [#tpu.dimension_semantics<parallel>], iteration_bounds = array<i64: 1>, scalar_prefetch = 0 : i64, scratch_operands = 0 : i64, tpu.core_type = #tpu.core_type<tc>, window_params = [{transform_indices = @transform_0, window_bounds = array<i64: 8, 3072>}, {pipeline_mode = #tpu.pipeline_mode<synchronous>, transform_indices = @transform_1, window_bounds = array<i64: 1, 3072>}, {transform_indices = @transform_2, window_bounds = array<i64: 1>}, {pipeline_mode = #tpu.pipeline_mode<synchronous>, transform_indices = @transform_3, window_bounds = array<i64: 3072, 512>}, {pipeline_mode = #tpu.pipeline_mode<synchronous>, transform_indices = @transform_4, window_bounds = array<i64: 1, 512>}, {pipeline_mode = #tpu.pipeline_mode<synchronous>, transform_indices = @transform_5, window_bounds = array<i64: 1, 512>}, {transform_indices = @transform_6, window_bounds = array<i64: 1>}, {transform_indices = @transform_7, window_bounds = array<i64: 8, 1>}]} {
    %c0 = arith.constant 0 : index
    %c0_0 = arith.constant 0 : index
    %0 = vector.load %arg1[%c0, %c0_0] : memref<8x3072xf32, #tpu.memory_space<vmem>>, vector<8x3072xf32>
    %c0_1 = arith.constant 0 : index
    %c0_2 = arith.constant 0 : index
    %1 = vector.load %arg2[%c0_1, %c0_2] : memref<1x3072xf32, #tpu.memory_space<vmem>>, vector<1x3072xf32>
    %2 = vector.broadcast %1 : vector<1x3072xf32> to vector<8x3072xf32>
    %3 = arith.mulf %0, %2 : vector<8x3072xf32>
    %cst = arith.constant dense<0.000000e+00> : vector<8xf32>
    %4 = vector.multi_reduction <add>, %3, %cst [1] : vector<8x3072xf32> to vector<8xf32>
    %5 = vector.shape_cast %4 : vector<8xf32> to vector<8x1xf32>
    %c0_3 = arith.constant 0 : index
    %6 = memref.load %arg3[%c0_3] : memref<1xf32, #tpu.memory_space<smem>>
    %7 = vector.broadcast %6 : f32 to vector<8x1xf32>
    %8 = arith.addf %5, %7 : vector<8x1xf32>
    %9 = arith.negf %8 : vector<8x1xf32>
    %10 = math.exp %9 : vector<8x1xf32>
    %cst_4 = arith.constant 1.000000e+00 : f32
    %11 = vector.broadcast %cst_4 : f32 to vector<8x1xf32>
    %12 = arith.addf %11, %10 : vector<8x1xf32>
    %13 = arith.divf %11, %12 : vector<8x1xf32>
    %14 = vector.broadcast %13 : vector<8x1xf32> to vector<8x3072xf32>
    %15 = arith.mulf %14, %0 : vector<8x3072xf32>
    %16 = arith.truncf %15 : vector<8x3072xf32> to vector<8x3072xbf16>
    %c0_5 = arith.constant 0 : index
    %c0_6 = arith.constant 0 : index
    %17 = vector.load %arg4[%c0_5, %c0_6] : memref<3072x512xbf16, #tpu.memory_space<vmem>>, vector<3072x512xbf16>
    %cst_7 = arith.constant dense<0.000000e+00> : vector<8x512xf32>
    %18 = tpu.matmul %16, %17, %cst_7 {dimension_numbers = #tpu.dot_dimension_numbers<[1], [0], [0], [1], [0, 0, 1, 1], [], []>} : vector<8x3072xbf16>, vector<3072x512xbf16>, vector<8x512xf32> -> vector<8x512xf32>
    %c0_8 = arith.constant 0 : index
    %c0_9 = arith.constant 0 : index
    %19 = vector.load %arg5[%c0_8, %c0_9] : memref<1x512xf32, #tpu.memory_space<vmem>>, vector<1x512xf32>
    %20 = vector.broadcast %19 : vector<1x512xf32> to vector<8x512xf32>
    %21 = arith.addf %18, %20 : vector<8x512xf32>
    %cst_10 = arith.constant 0.000000e+00 : f32
    %22 = vector.broadcast %cst_10 : f32 to vector<8x512xf32>
    %23 = arith.maximumf %21, %22 : vector<8x512xf32>
    %c0_11 = arith.constant 0 : index
    %c0_12 = arith.constant 0 : index
    %24 = vector.load %arg6[%c0_11, %c0_12] : memref<1x512xf32, #tpu.memory_space<vmem>>, vector<1x512xf32>
    %25 = vector.broadcast %24 : vector<1x512xf32> to vector<8x512xf32>
    %26 = arith.mulf %23, %25 : vector<8x512xf32>
    %cst_13 = arith.constant dense<0.000000e+00> : vector<8xf32>
    %27 = vector.multi_reduction <add>, %26, %cst_13 [1] : vector<8x512xf32> to vector<8xf32>
    %28 = vector.shape_cast %27 : vector<8xf32> to vector<8x1xf32>
    %c0_14 = arith.constant 0 : index
    %29 = memref.load %arg7[%c0_14] : memref<1xf32, #tpu.memory_space<smem>>
    %30 = vector.broadcast %29 : f32 to vector<8x1xf32>
    %31 = arith.addf %28, %30 : vector<8x1xf32>
    %32 = arith.negf %31 : vector<8x1xf32>
    %33 = math.exp %32 : vector<8x1xf32>
    %cst_15 = arith.constant 1.000000e+00 : f32
    %34 = vector.broadcast %cst_15 : f32 to vector<8x1xf32>
    %35 = arith.addf %34, %33 : vector<8x1xf32>
    %36 = arith.divf %34, %35 : vector<8x1xf32>
    %c0_16 = arith.constant 0 : index
    %c0_17 = arith.constant 0 : index
    %37 = vector.load %arg8[%c0_16, %c0_17] : memref<8x1xf32, #tpu.memory_space<vmem>>, vector<8x1xf32>
    tpu.vector_store %arg8[%c0_16, %c0_17], %36 {strides = array<i32>} : memref<8x1xf32, #tpu.memory_space<vmem>>, vector<8x1xf32>,
    return
  }
  func.func @transform_0(%arg0: i32) -> (i32, i32) {
    %c0_i32 = arith.constant 0 : i32
    %c0_i32_0 = arith.constant 0 : i32
    return %arg0, %c0_i32 : i32, i32
  }
  func.func @transform_1(%arg0: i32) -> (i32, i32) {
    %c0_i32 = arith.constant 0 : i32
    %c0_i32_0 = arith.constant 0 : i32
    %c0_i32_1 = arith.constant 0 : i32
    return %c0_i32, %c0_i32_0 : i32, i32
  }
  func.func @transform_2(%arg0: i32) -> i32 {
    %c0_i32 = arith.constant 0 : i32
    %c0_i32_0 = arith.constant 0 : i32
    return %c0_i32 : i32
  }
  func.func @transform_3(%arg0: i32) -> (i32, i32) {
    %c0_i32 = arith.constant 0 : i32
    %c0_i32_0 = arith.constant 0 : i32
    %c0_i32_1 = arith.constant 0 : i32
    return %c0_i32, %c0_i32_0 : i32, i32
  }
  func.func @transform_4(%arg0: i32) -> (i32, i32) {
    %c0_i32 = arith.constant 0 : i32
    %c0_i32_0 = arith.constant 0 : i32
    %c0_i32_1 = arith.constant 0 : i32
    return %c0_i32, %c0_i32_0 : i32, i32
  }
  func.func @transform_5(%arg0: i32) -> (i32, i32) {
    %c0_i32 = arith.constant 0 : i32
    %c0_i32_0 = arith.constant 0 : i32
    %c0_i32_1 = arith.constant 0 : i32
    return %c0_i32, %c0_i32_0 : i32, i32
  }
  func.func @transform_6(%arg0: i32) -> i32 {
    %c0_i32 = arith.constant 0 : i32
    %c0_i32_0 = arith.constant 0 : i32
    return %c0_i32 : i32
  }
  func.func @transform_7(%arg0: i32) -> (i32, i32) {
    %c0_i32 = arith.constant 0 : i32
    %c0_i32_0 = arith.constant 0 : i32
    return %arg0, %c0_i32 : i32, i32
  }
}

</mosaic_0001>

<bundles_post_ra>
// kernel: tpu_custom_call.1
= control target key start
LH: loop header
LB: loop body
LE: loop exit
PB: predicated region body
PF: predicated region fallthrough
CT: control target
= control target key end

     0   :  { %14 = vsyncpa [#allocation5], 0  ;;  %s8397_s0 = inlined_call_operand.hbm [shape: f32[8,3072], index: 0, kind: input, shape index: {}]   ;;  %s8398_s1 = inlined_call_operand.hbm [shape: f32[1,3072], index: 1, kind: input, shape index: {}]   ;;  %s8399_s2 = inlined_call_operand.<no memory space> [shape: f32[1], index: 2, kind: input, shape index: {}]   ;;  %s8400_s3 = inlined_call_operand.hbm [shape: bf16[3072,512], index: 3, kind: input, shape index: {}]   ;;  %s8401_s4 = inlined_call_operand.hbm [shape: f32[1,512], index: 4, kind: input, shape index: {}]   ;;  %s8402_s5 = inlined_call_operand.hbm [shape: f32[1,512], index: 5, kind: input, shape index: {}]   ;;  %s8403_s6 = inlined_call_operand.<no memory space> [shape: f32[1], index: 6, kind: input, shape index: {}]   ;;  %s8404_s7 = inlined_call_operand.vmem [shape: f32[8,1], index: 7, kind: output, shape index: {}]  }
   0x1   :  { %15 = vsyncpa [#allocation7], 0 }
   0x2   :  { %16 = vsyncpa [#allocation10], 0  ;;  %s8180_s24 = smov [#allocation6]   ;;  %s8181_s26 = smov [#allocation9]  }
   0x3   :  { %s33_s25 = sshll.u32 %s8180_s24, 4  ;;  %s57_s27 = sshll.u32 %s8181_s26, 4  ;;  %s34_s25 = int_to_ptr.vmem [resolvable:$true] %s33_s25  ;;  %s58_s27 = int_to_ptr.vmem [resolvable:$true] %s57_s27 }
   0x4   :  { %s8064_s30 = scalar_lea.hbm %s8398_s1, 384 }
   0x5   :  { %p8065_p0 = scmp.ne.s32.totalorder %s8398_s1, %s8064_s30  ;;  %p8068_p1 = scmp.lt.u32.totalorder %s8064_s30, %s8398_s1 }
   0x7   :  { %p8070_p2 = pnand %p8068_p1, %p8065_p0 }
   0x9   :  { %8073 = shalt.err (!%p8070_p2)
}
   0xa   :  { %s8074_s12 = scalar_lea.vmem %s34_s25, 384  ;;  %p8079_p4 = scmp.lt.s32.totalorder %s34_s25, %s34_s25 }
   0xb   :  { %p8075_p3 = scmp.ne.s32.totalorder %s34_s25, %s8074_s12  ;;  %p8080_p5 = scmp.lt.s32.totalorder %s8074_s12, %s8074_s12 }
   0xd   :  { %p8081_p6 = por %p8080_p5, %p8079_p4 }
   0xf   :  { %p8082_p7 = pnand %p8081_p6, %p8075_p3 }
  0x11   :  { %8085 = shalt.err (!%p8082_p7)
}
  0x12   :  { %36 = dma.hbm_to_vmem [thread:$0]  %s8398_s1, 384, %s34_s25, [#allocation7]  }
  0x13   :  { %s8086_s17 = scalar_lea.hbm %s8401_s4, 64 }
  0x14   :  { %p8087_p8 = scmp.ne.s32.totalorder %s8401_s4, %s8086_s17  ;;  %p8090_p9 = scmp.lt.u32.totalorder %s8086_s17, %s8401_s4 }
  0x16   :  { %p8092_p10 = pnand %p8090_p9, %p8087_p8 }
  0x18   :  { %8095 = shalt.err (!%p8092_p10)
}
  0x19   :  { %s8096_s22 = scalar_lea.vmem %s58_s27, 64  ;;  %p8101_p12 = scmp.lt.s32.totalorder %s58_s27, %s58_s27 }
  0x1a   :  { %p8097_p11 = scmp.ne.s32.totalorder %s58_s27, %s8096_s22  ;;  %p8102_p13 = scmp.lt.s32.totalorder %s8096_s22, %s8096_s22 }
  0x1c   :  { %p8103_p0 = por %p8102_p13, %p8101_p12 }
  0x1e   :  { %p8104_p1 = pnand %p8103_p0, %p8097_p11 }
  0x20   :  { %8107 = shalt.err (!%p8104_p1)
}
  0x21   :  { %60 = dma.hbm_to_vmem [thread:$0]  %s8401_s4, 64, %s58_s27, [#allocation10]  }
  0x22   :  { %s8182_s24 = smov [#allocation4]   ;;  %s8183_s26 = smov [#allocation8]  }
  0x23   :  { %s23_s25 = sshll.u32 %s8182_s24, 4  ;;  %s44_s28 = sshll.u32 %s8183_s26, 4  ;;  %s24_s25 = int_to_ptr.vmem [resolvable:$true] %s23_s25  ;;  %s8251_s28 = int_to_ptr.vmem [resolvable:$true] %s44_s28 }
  0x24   :  { %s8108_s8 = scalar_lea.hbm %s8397_s0, 3072 }
  0x25   :  { %p8109_p2 = scmp.ne.s32.totalorder %s8397_s0, %s8108_s8  ;;  %p8112_p3 = scmp.lt.u32.totalorder %s8108_s8, %s8397_s0 }
  0x27   :  { %p8114_p4 = pnand %p8112_p3, %p8109_p2 }
  0x29   :  { %8117 = shalt.err (!%p8114_p4)
}
  0x2a   :  { %s8118_s4 = scalar_lea.vmem %s24_s25, 3072  ;;  %p8123_p6 = scmp.lt.s32.totalorder %s24_s25, %s24_s25 }
  0x2b   :  { %p8119_p5 = scmp.ne.s32.totalorder %s24_s25, %s8118_s4  ;;  %p8124_p7 = scmp.lt.s32.totalorder %s8118_s4, %s8118_s4 }
  0x2d   :  { %p8125_p8 = por %p8124_p7, %p8123_p6 }
  0x2f   :  { %p8126_p9 = pnand %p8125_p8, %p8119_p5 }
  0x31   :  { %8129 = shalt.err (!%p8126_p9)
}
  0x32   :  { %26 = dma.hbm_to_vmem [thread:$0]  %s8397_s0, 3072, %s24_s25, [#allocation5]  }
  0x33   :  { %s8130_s16 = scalar_lea.hbm %s8400_s3, 98304 }
  0x34   :  { %p8131_p10 = scmp.ne.s32.totalorder %s8400_s3, %s8130_s16  ;;  %p8134_p11 = scmp.lt.u32.totalorder %s8130_s16, %s8400_s3 }
  0x36   :  { %p8136_p12 = pnand %p8134_p11, %p8131_p10 }
  0x38   :  { %8139 = shalt.err (!%p8136_p12)
}
  0x39   :  { %s8140_s21 = scalar_lea.vmem %s8251_s28, 98304  ;;  %p8145_p0 = scmp.lt.s32.totalorder %s8251_s28, %s8251_s28 }
  0x3a   :  { %p8141_p13 = scmp.ne.s32.totalorder %s8251_s28, %s8140_s21  ;;  %p8146_p1 = scmp.lt.s32.totalorder %s8140_s21, %s8140_s21 }
  0x3c   :  { %p8147_p2 = por %p8146_p1, %p8145_p0 }
  0x3e   :  { %p8148_p3 = pnand %p8147_p2, %p8141_p13 }
  0x40   :  { %8151 = shalt.err (!%p8148_p3)
}
  0x41   :  { %s8184_s0 = smov 256   ;;  %s8185_s22 = smov 16  }
  0x42   :  { %50 = dma.hbm_to_vmem [thread:$0]  %s8400_s3, 98304, %s8251_s28, [#allocation7], %s8184_s0, %s8184_s0, %s8185_s22  }
  0x43   :  { %s8186_s24 = smov [#allocation11]   ;;  %s8152_s30 = scalar_lea.hbm %s8402_s5, 64 }
  0x44   :  { %s67_s25 = sshll.u32 %s8186_s24, 4  ;;  %p8153_p4 = scmp.ne.s32.totalorder %s8402_s5, %s8152_s30  ;;  %s68_s25 = int_to_ptr.vmem [resolvable:$true] %s67_s25 }
  0x45   :  { %p8156_p5 = scmp.lt.u32.totalorder %s8152_s30, %s8402_s5 }
  0x47   :  { %p8158_p6 = pnand %p8156_p5, %p8153_p4 }
  0x49   :  { %8161 = shalt.err (!%p8158_p6)
}
  0x4a   :  { %s8162_s12 = scalar_lea.vmem %s68_s25, 64  ;;  %p8167_p8 = scmp.lt.s32.totalorder %s68_s25, %s68_s25 }
  0x4b   :  { %p8163_p7 = scmp.ne.s32.totalorder %s68_s25, %s8162_s12  ;;  %p8168_p9 = scmp.lt.s32.totalorder %s8162_s12, %s8162_s12 }
  0x4d   :  { %p8169_p10 = por %p8168_p9, %p8167_p8 }
  0x4f   :  { %p8170_p11 = pnand %p8169_p10, %p8163_p7 }
  0x51   :  { %8173 = shalt.err (!%p8170_p11)
}
  0x52   :  { %70 = dma.hbm_to_vmem [thread:$0]  %s8402_s5, 64, %s68_s25, [#allocation10]  }
  0x53   :  { %8174 = dma.done.wait [#allocation5], 3072  }
  0x54   :  { %8175 = vsyncadd [#allocation5], 4294964224 }
  0x55   :  { %8176 = dma.done.wait [#allocation7], 98688  }
  0x56   :  { %8177 = vsyncadd [#allocation7], 4294868608 }
  0x57   :  { %8178 = dma.done.wait [#allocation10], 128  }
  0x58   :  { %8179 = vsyncadd [#allocation10], 4294967168  ;;  %v118_v0 = vlaneseq  ;;  %v8294_v2 = vld [vmem:[#allocation6] sm:$0xff]  ;;  %v6880_v5 = vld [vmem:[#allocation8 + $0x4] ss:$16 sps:$4 sm:$0xff]   ;;  %vm6002_vm0 = vcmask 7168  }
  0x59   :  { %v6882_v6 = vld [vmem:[#allocation8 + $0xc] ss:$16 sps:$4 sm:$0xff]   ;;  %4974 = vmatprep.subr.bf16.mxu0 %v6880_v5  ;;  %v6884_v8 = vld [vmem:[#allocation8] ss:$16 sps:$4 sm:$0xff]   ;;  %v6885_v9 = vld [vmem:[#allocation8 + $0x8] ss:$16 sps:$4 sm:$0xff]  }
  0x5a   :  { %v119_v1 = vshrl.u32 %v118_v0, 7  ;;  %v88_v10 = vld [vmem:[#allocation4] sm:$0xff]  ;;  %v89_v11 = vld [vmem:[#allocation4 + $0x8] sm:$0xff]  ;;  %5466 = vmatprep.subr.bf16.mxu1 %v6882_v6  ;;  %4975 = vmatpush1.bf16.msra.mxu0 %v6884_v8  ;;  %v90_v18 = vld [vmem:[#allocation4 + $0x10] sm:$0xff] }
  0x5b   :  { %v6886_v12 = vld [vmem:[#allocation8 + $0x24] ss:$16 sps:$4 sm:$0xff]   ;;  %v6888_v16 = vld [vmem:[#allocation8 + $0x2c] ss:$16 sps:$4 sm:$0xff]   ;;  %v6890_v17 = vld [vmem:[#allocation8 + $0x20] ss:$16 sps:$4 sm:$0xff]   ;;  %5467 = vmatpush1.bf16.msra.mxu1 %v6885_v9 }
  0x5c   :  { %v8296_v3 = vsub.s32 0, %v119_v1  ;;  %v8298_v4 = vsub.s32 1, %v119_v1  ;;  %v8300_v7 = vsub.s32 2, %v119_v1  ;;  %v8306_v15 = vsub.s32 3, %v119_v1  ;;  %v6891_v19 = vld [vmem:[#allocation8 + $0x28] ss:$16 sps:$4 sm:$0xff]   ;;  %4976 = vmatprep.subr.bf16.mxu0 %v6886_v12  ;;  %5468 = vmatprep.subr.bf16.mxu1 %v6888_v16 }
  0x5d   :  { %v8310_v21 = vsub.s32 4, %v119_v1  ;;  %v6892_v22 = vld [vmem:[#allocation8 + $0x44] ss:$16 sps:$4 sm:$0xff]   ;;  %v6894_v24 = vld [vmem:[#allocation8 + $0x4c] ss:$16 sps:$4 sm:$0xff]   ;;  %v8314_v27 = vsub.s32 5, %v119_v1 }
  0x5e   :  { %v121_v13 = vrot.slane %v8294_v2, %v8296_v3  ;;  %v125_v14 = vrot.slane %v8294_v2, %v8298_v4  ;;  %v129_v20 = vrot.slane %v8294_v2, %v8300_v7  ;;  %v91_v23 = vld [vmem:[#allocation4 + $0x18] sm:$0xff]  ;;  %v133_v26 = vrot.slane %v8294_v2, %v8306_v15  ;;  %4977 = vmatpush1.bf16.msra.mxu0 %v6890_v17  ;;  %v6897_v30 = vld [vmem:[#allocation8 + $0x48] ss:$16 sps:$4 sm:$0xff]   ;;  %v6900_v36 = vld [vmem:[#allocation8 + $0x6c] ss:$16 sps:$4 sm:$0xff]  }
  0x5f   :  { %v6896_v25 = vld [vmem:[#allocation8 + $0x40] ss:$16 sps:$4 sm:$0xff]   ;;  %5469 = vmatpush1.bf16.msra.mxu1 %v6891_v19  ;;  %v6898_v31 = vld [vmem:[#allocation8 + $0x64] ss:$16 sps:$4 sm:$0xff]   ;;  %v92_v32 = vld [vmem:[#allocation4 + $0x20] sm:$0xff]  ;;  %v137_v33 = vrot.slane %v8294_v2, %v8310_v21  ;;  %v8318_v34 = vsub.s32 6, %v119_v1  ;;  %4978 = vmatprep.subr.bf16.mxu0 %v6892_v22  ;;  %v141_v38 = vrot.slane %v8294_v2, %v8314_v27 }
  0x60   :  { %v238_v28 = vmul.f32 %v121_v13, %v88_v10  ;;  %v239_v29 = vmul.f32 %v125_v14, %v89_v11  ;;  %v240_v35 = vmul.f32 %v129_v20, %v90_v18  ;;  %v93_v37 = vld [vmem:[#allocation4 + $0x28] sm:$0xff]  ;;  %5470 = vmatprep.subr.bf16.mxu1 %v6894_v24  ;;  %v8322_v39 = vsub.s32 7, %v119_v1  ;;  %v6903_v43 = vld [vmem:[#allocation8 + $0x68] ss:$16 sps:$4 sm:$0xff]   ;;  %v6906_v49 = vld [vmem:[#allocation8 + $0x8c] ss:$16 sps:$4 sm:$0xff]  }
  0x61   :  { %v241_v40 = vmul.f32 %v133_v26, %v91_v23  ;;  %v6902_v42 = vld [vmem:[#allocation8 + $0x60] ss:$16 sps:$4 sm:$0xff]   ;;  %v94_v44 = vld [vmem:[#allocation4 + $0x30] sm:$0xff]  ;;  %v6904_v45 = vld [vmem:[#allocation8 + $0x84] ss:$16 sps:$4 sm:$0xff]   ;;  %v145_v46 = vrot.slane %v8294_v2, %v8318_v34  ;;  %v242_v47 = vmul.f32 %v137_v33, %v92_v32  ;;  %v243_v54 = vmul.f32 %v141_v38, %v93_v37 }
  0x62   :  { %v262_v41 = vadd.f32 %v239_v29, %v238_v28  ;;  %4979 = vmatpush1.bf16.msra.mxu0 %v6896_v25  ;;  %v95_v50 = vld [vmem:[#allocation4 + $0x38] sm:$0xff]  ;;  %v8326_v51 = vld [vmem:[#allocation6 + $0x8] sm:$0xff]  ;;  %v149_v53 = vrot.slane %v8294_v2, %v8322_v39  ;;  %v6909_v56 = vld [vmem:[#allocation8 + $0x88] ss:$16 sps:$4 sm:$0xff]  }
  0x63   :  { %5471 = vmatpush1.bf16.msra.mxu1 %v6897_v30  ;;  %4980 = vmatprep.subr.bf16.mxu0 %v6898_v31  ;;  %v6908_v52 = vld [vmem:[#allocation8 + $0x80] ss:$16 sps:$4 sm:$0xff]   ;;  %v6910_v57 = vld [vmem:[#allocation8 + $0xa4] ss:$16 sps:$4 sm:$0xff]   ;;  %v96_v58 = vld [vmem:[#allocation4 + $0x40] sm:$0xff]  ;;  %v153_v59 = vrot.slane %v8326_v51, %v8296_v3  ;;  %v244_v60 = vmul.f32 %v145_v46, %v94_v44  ;;  %v157_v1 = vrot.slane %v8326_v51, %v8298_v4 }
  0x64   :  { %v263_v48 = vadd.f32 %v262_v41, %v240_v35  ;;  %5472 = vmatprep.subr.bf16.mxu1 %v6900_v36  ;;  %v6912_v62 = vld [vmem:[#allocation8 + $0xac] ss:$16 sps:$4 sm:$0xff]   ;;  %v97_v63 = vld [vmem:[#allocation4 + $0x48] sm:$0xff]  ;;  %v245_v2 = vmul.f32 %v149_v53, %v95_v50  ;;  %v6915_v6 = vld [vmem:[#allocation8 + $0xa8] ss:$16 sps:$4 sm:$0xff]   ;;  %v161_v11 = vrot.slane %v8326_v51, %v8300_v7  ;;  %v165_v19 = vrot.slane %v8326_v51, %v8306_v15 }
  0x65   :  { %v6914_v0 = vld [vmem:[#allocation8 + $0xa0] ss:$16 sps:$4 sm:$0xff]   ;;  %v6916_v8 = vld [vmem:[#allocation8 + $0xc4] ss:$16 sps:$4 sm:$0xff]   ;;  %v98_v9 = vld [vmem:[#allocation4 + $0x50] sm:$0xff]  ;;  %v246_v12 = vmul.f32 %v153_v59, %v96_v58  ;;  %v247_v20 = vmul.f32 %v157_v1, %v97_v63  ;;  %v169_v25 = vrot.slane %v8326_v51, %v8310_v21  ;;  %v173_v32 = vrot.slane %v8326_v51, %v8314_v27 }
  0x66   :  { %v264_v55 = vadd.f32 %v263_v48, %v241_v40  ;;  %4981 = vmatpush1.bf16.msra.mxu0 %v6902_v42  ;;  %v6918_v10 = vld [vmem:[#allocation8 + $0xcc] ss:$16 sps:$4 sm:$0xff]   ;;  %v6920_v14 = vld [vmem:[#allocation8 + $0xc0] ss:$16 sps:$4 sm:$0xff]   ;;  %v6921_v17 = vld [vmem:[#allocation8 + $0xc8] ss:$16 sps:$4 sm:$0xff]   ;;  %v248_v26 = vmul.f32 %v161_v11, %v98_v9  ;;  %v177_v38 = vrot.slane %v8326_v51, %v8318_v34 }
  0x67   :  { %5473 = vmatpush1.bf16.msra.mxu1 %v6903_v43  ;;  %4982 = vmatprep.subr.bf16.mxu0 %v6904_v45  ;;  %v99_v16 = vld [vmem:[#allocation4 + $0x58] sm:$0xff]  ;;  %v6924_v23 = vld [vmem:[#allocation8 + $0xec] ss:$16 sps:$4 sm:$0xff]   ;;  %v101_v30 = vld [vmem:[#allocation4 + $0x68] sm:$0xff]  ;;  %v181_v43 = vrot.slane %v8326_v51, %v8322_v39 }
  0x68   :  { %v265_v61 = vadd.f32 %v264_v55, %v242_v47  ;;  %5474 = vmatprep.subr.bf16.mxu1 %v6906_v49  ;;  %v6922_v18 = vld [vmem:[#allocation8 + $0xe4] ss:$16 sps:$4 sm:$0xff]   ;;  %v100_v24 = vld [vmem:[#allocation4 + $0x60] sm:$0xff]  ;;  %v6926_v29 = vld [vmem:[#allocation8 + $0xe0] ss:$16 sps:$4 sm:$0xff]   ;;  %v249_v33 = vmul.f32 %v165_v19, %v99_v16  ;;  %v251_v44 = vmul.f32 %v173_v32, %v101_v30 }
  0x69   :  { %v6927_v31 = vld [vmem:[#allocation8 + $0xe8] ss:$16 sps:$4 sm:$0xff]   ;;  %v250_v40 = vmul.f32 %v169_v25, %v100_v24  ;;  %v103_v42 = vld [vmem:[#allocation4 + $0x78] sm:$0xff]  ;;  %v105_v50 = vld [vmem:[#allocation4 + $0x88] sm:$0xff] }
  0x6a   :  { %v266_v5 = vadd.f32 %v265_v61, %v243_v54  ;;  %4983 = vmatpush1.bf16.msra.mxu0 %v6908_v52  ;;  %v102_v36 = vld [vmem:[#allocation4 + $0x70] sm:$0xff]  ;;  %v104_v46 = vld [vmem:[#allocation4 + $0x80] sm:$0xff]  ;;  %v253_v53 = vmul.f32 %v181_v43, %v103_v42  ;;  %v107_v51 = vld [vmem:[#allocation4 + $0x98] sm:$0xff] }
  0x6b   :  { %5475 = vmatpush1.bf16.msra.mxu1 %v6909_v56  ;;  %4984 = vmatprep.subr.bf16.mxu0 %v6910_v57  ;;  %v114_v37 = vld [vmem:[#allocation6 + $0x10] sm:$0xff]  ;;  %v252_v48 = vmul.f32 %v177_v38, %v102_v36  ;;  %v6932_v25 = vld [vmem:[#allocation8 + $0x100] ss:$16 sps:$4 sm:$0xff]   ;;  %v6940_v30 = vld [vmem:[#allocation8 + $0x144] ss:$16 sps:$4 sm:$0xff]  }
  0x6c   :  { %v267_v13 = vadd.f32 %v266_v5, %v244_v60  ;;  %5476 = vmatprep.subr.bf16.mxu1 %v6912_v62  ;;  %v185_v47 = vrot.slane %v114_v37, %v8296_v3  ;;  %v189_v52 = vrot.slane %v114_v37, %v8298_v4  ;;  %v106_v55 = vld [vmem:[#allocation4 + $0x90] sm:$0xff]  ;;  %v193_v56 = vrot.slane %v114_v37, %v8300_v7  ;;  %v108_v62 = vld [vmem:[#allocation4 + $0xa0] sm:$0xff]  ;;  %v6944_v32 = vld [vmem:[#allocation8 + $0x140] ss:$16 sps:$4 sm:$0xff]  }
  0x6d   :  { %v197_v59 = vrot.slane %v114_v37, %v8306_v15  ;;  %v201_v63 = vrot.slane %v114_v37, %v8310_v21  ;;  %v205_v5 = vrot.slane %v114_v37, %v8314_v27  ;;  %v110_v9 = vld [vmem:[#allocation4 + $0xb0] sm:$0xff]  ;;  %v6928_v27 = vld [vmem:[#allocation8 + $0x104] ss:$16 sps:$4 sm:$0xff]   ;;  %v6956_v42 = vld [vmem:[#allocation8 + $0x180] ss:$16 sps:$4 sm:$0xff]  }
  0x6e   :  { %v268_v22 = vadd.f32 %v267_v13, %v245_v2  ;;  %4985 = vmatpush1.bf16.msra.mxu0 %v6914_v0  ;;  %v254_v57 = vmul.f32 %v185_v47, %v104_v46  ;;  %v255_v60 = vmul.f32 %v189_v52, %v105_v50  ;;  %v256_v0 = vmul.f32 %v193_v56, %v106_v55  ;;  %v109_v2 = vld [vmem:[#allocation4 + $0xa8] sm:$0xff]  ;;  %v111_v13 = vld [vmem:[#allocation4 + $0xb8] sm:$0xff]  ;;  %v6930_v24 = vld [vmem:[#allocation8 + $0x10c] ss:$16 sps:$4 sm:$0xff]  }
  0x6f   :  { %5477 = vmatpush1.bf16.msra.mxu1 %v6915_v6  ;;  %4986 = vmatprep.subr.bf16.mxu0 %v6916_v8  ;;  %v257_v6 = vmul.f32 %v197_v59, %v107_v51  ;;  %v258_v11 = vmul.f32 %v201_v63, %v108_v62  ;;  %v259_v16 = vmul.f32 %v205_v5, %v109_v2  ;;  %v6948_v36 = vld [vmem:[#allocation8 + $0x16c] ss:$16 sps:$4 sm:$0xff]   ;;  %v6951_v38 = vld [vmem:[#allocation8 + $0x168] ss:$16 sps:$4 sm:$0xff]   ;;  %v6962_v46 = vld [vmem:[#allocation8 + $0x1a0] ss:$16 sps:$4 sm:$0xff]   ;;  %v288_v51 = vstv %s8399_s2 }
  0x70   :  { %v269_v28 = vadd.f32 %v268_v22, %v246_v12  ;;  %5478 = vmatprep.subr.bf16.mxu1 %v6918_v10  ;;  %v209_v10 = vrot.slane %v114_v37, %v8318_v34  ;;  %v6934_v34 = vld [vmem:[#allocation8 + $0x124] ss:$16 sps:$4 sm:$0xff]   ;;  %v6957_v43 = vld [vmem:[#allocation8 + $0x188] ss:$16 sps:$4 sm:$0xff]   ;;  %v6968_v50 = vld [vmem:[#allocation8 + $0x1c0] ss:$16 sps:$4 sm:$0xff]  }
  0x71   :  { %v6963_v47 = vld [vmem:[#allocation8 + $0x1a8] ss:$16 sps:$4 sm:$0xff]   ;;  %v6974_v55 = vld [vmem:[#allocation8 + $0x1e0] ss:$16 sps:$4 sm:$0xff]  }
  0x72   :  { %v270_v35 = vadd.f32 %v269_v28, %v247_v20  ;;  %4987 = vmatpush1.bf16.msra.mxu0 %v6920_v14  ;;  %v213_v14 = vrot.slane %v114_v37, %v8322_v39  ;;  %v6936_v28 = vld [vmem:[#allocation8 + $0x12c] ss:$16 sps:$4 sm:$0xff]   ;;  %v6938_v39 = vld [vmem:[#allocation8 + $0x120] ss:$16 sps:$4 sm:$0xff]   ;;  %v6969_v52 = vld [vmem:[#allocation8 + $0x1c8] ss:$16 sps:$4 sm:$0xff]  }
  0x73   :  { %5479 = vmatpush1.bf16.msra.mxu1 %v6921_v17  ;;  %4988 = vmatprep.subr.bf16.mxu0 %v6922_v18  ;;  %v260_v18 = vmul.f32 %v209_v10, %v110_v9  ;;  %v6950_v37 = vld [vmem:[#allocation8 + $0x160] ss:$16 sps:$4 sm:$0xff]   ;;  %v6975_v56 = vld [vmem:[#allocation8 + $0x1e8] ss:$16 sps:$4 sm:$0xff]  }
  0x74   :  { %v271_v41 = vadd.f32 %v270_v35, %v248_v26  ;;  %5480 = vmatprep.subr.bf16.mxu1 %v6924_v23  ;;  %v261_v21 = vmul.f32 %v213_v14, %v111_v13  ;;  %v6933_v26 = vld [vmem:[#allocation8 + $0x108] ss:$16 sps:$4 sm:$0xff]   ;;  %v6946_v35 = vld [vmem:[#allocation8 + $0x164] ss:$16 sps:$4 sm:$0xff]   ;;  %v6976_v5 = vld [vmem:[#allocation8 + $0x200] ss:$16 sps:$4 sm:$0xff]  }
  0x75   :  { %v8042_v10 = vld [vmem:[#allocation4 + $0x18] sm:$0xff] }
  0x76   :  { %v272_v45 = vadd.f32 %v271_v41, %v249_v33  ;;  %4989 = vmatpush1.bf16.msra.mxu0 %v6926_v29  ;;  %v6939_v29 = vld [vmem:[#allocation8 + $0x128] ss:$16 sps:$4 sm:$0xff]   ;;  %v6954_v41 = vld [vmem:[#allocation8 + $0x18c] ss:$16 sps:$4 sm:$0xff]   ;;  %v6984_v14 = vld [vmem:[#allocation8 + $0x224] ss:$16 sps:$4 sm:$0xff]  }
  0x77   :  { %5481 = vmatpush1.bf16.msra.mxu1 %v6927_v31  ;;  %4990 = vmatprep.subr.bf16.mxu0 %v6928_v27  ;;  %v6942_v31 = vld [vmem:[#allocation8 + $0x14c] ss:$16 sps:$4 sm:$0xff]   ;;  %v6945_v33 = vld [vmem:[#allocation8 + $0x148] ss:$16 sps:$4 sm:$0xff]   ;;  %v6996_v27 = vld [vmem:[#allocation8 + $0x264] ss:$16 sps:$4 sm:$0xff]  }
  0x78   :  { %v273_v49 = vadd.f32 %v272_v45, %v250_v40  ;;  %5482 = vmatprep.subr.bf16.mxu1 %v6930_v24  ;;  %v6952_v40 = vld [vmem:[#allocation8 + $0x184] ss:$16 sps:$4 sm:$0xff]   ;;  %v6960_v45 = vld [vmem:[#allocation8 + $0x1ac] ss:$16 sps:$4 sm:$0xff]  }
  0x79   :  { %v6999_v24 = vld [vmem:[#allocation8 + $0x26c] ss:$16 sps:$4 sm:$0xff]  }
  0x7a   :  { %v274_v54 = vadd.f32 %v273_v49, %v251_v44  ;;  %4991 = vmatpush1.bf16.msra.mxu0 %v6932_v25  ;;  %v6958_v44 = vld [vmem:[#allocation8 + $0x1a4] ss:$16 sps:$4 sm:$0xff]   ;;  %v6966_v49 = vld [vmem:[#allocation8 + $0x1cc] ss:$16 sps:$4 sm:$0xff]   ;;  %v6994_v25 = vld [vmem:[#allocation8 + $0x260] ss:$16 sps:$4 sm:$0xff]  }
  0x7b   :  { %5483 = vmatpush1.bf16.msra.mxu1 %v6933_v26  ;;  %4992 = vmatprep.subr.bf16.mxu0 %v6934_v34  ;;  %v6997_v26 = vld [vmem:[#allocation8 + $0x268] ss:$16 sps:$4 sm:$0xff]   ;;  %v7002_v34 = vld [vmem:[#allocation8 + $0x284] ss:$16 sps:$4 sm:$0xff]  }
  0x7c   :  { %v275_v58 = vadd.f32 %v274_v54, %v252_v48  ;;  %5484 = vmatprep.subr.bf16.mxu1 %v6936_v28  ;;  %v6964_v48 = vld [vmem:[#allocation8 + $0x1c4] ss:$16 sps:$4 sm:$0xff]   ;;  %v6972_v54 = vld [vmem:[#allocation8 + $0x1ec] ss:$16 sps:$4 sm:$0xff]  }
  0x7d   :  { %v7005_v28 = vld [vmem:[#allocation8 + $0x28c] ss:$16 sps:$4 sm:$0xff]  }
  0x7e   :  { %v276_v61 = vadd.f32 %v275_v58, %v253_v53  ;;  %4993 = vmatpush1.bf16.msra.mxu0 %v6938_v39  ;;  %v6970_v53 = vld [vmem:[#allocation8 + $0x1e4] ss:$16 sps:$4 sm:$0xff]   ;;  %v6981_v58 = vld [vmem:[#allocation8 + $0x20c] ss:$16 sps:$4 sm:$0xff]   ;;  %v7000_v39 = vld [vmem:[#allocation8 + $0x280] ss:$16 sps:$4 sm:$0xff]  }
  0x7f   :  { %5485 = vmatpush1.bf16.msra.mxu1 %v6939_v29  ;;  %4994 = vmatprep.subr.bf16.mxu0 %v6940_v30  ;;  %v7003_v29 = vld [vmem:[#allocation8 + $0x288] ss:$16 sps:$4 sm:$0xff]   ;;  %v7008_v30 = vld [vmem:[#allocation8 + $0x2a4] ss:$16 sps:$4 sm:$0xff]  }
  0x80   :  { %v277_v1 = vadd.f32 %v276_v61, %v254_v57  ;;  %5486 = vmatprep.subr.bf16.mxu1 %v6942_v31  ;;  %v6978_v57 = vld [vmem:[#allocation8 + $0x204] ss:$16 sps:$4 sm:$0xff]   ;;  %v7011_v31 = vld [vmem:[#allocation8 + $0x2ac] ss:$16 sps:$4 sm:$0xff]  }
  0x82   :  { %v278_v8 = vadd.f32 %v277_v1, %v255_v60  ;;  %4995 = vmatpush1.bf16.msra.mxu0 %v6944_v32  ;;  %v8040_v1 = vld [vmem:[#allocation4 + $0x8] sm:$0xff] }
  0x83   :  { %5487 = vmatpush1.bf16.msra.mxu1 %v6945_v33  ;;  %4996 = vmatprep.subr.bf16.mxu0 %v6946_v35  ;;  %v7006_v32 = vld [vmem:[#allocation8 + $0x2a0] ss:$16 sps:$4 sm:$0xff]   ;;  %v7009_v33 = vld [vmem:[#allocation8 + $0x2a8] ss:$16 sps:$4 sm:$0xff]   ;;  %v7014_v35 = vld [vmem:[#allocation8 + $0x2c4] ss:$16 sps:$4 sm:$0xff]  }
  0x84   :  { %v279_v12 = vadd.f32 %v278_v8, %v256_v0  ;;  %5488 = vmatprep.subr.bf16.mxu1 %v6948_v36  ;;  %v8041_v8 = vld [vmem:[#allocation4] sm:$0xff] }
  0x85   :  { %v7017_v36 = vld [vmem:[#allocation8 + $0x2cc] ss:$16 sps:$4 sm:$0xff]  }
  0x86   :  { %v280_v17 = vadd.f32 %v279_v12, %v257_v6  ;;  %4997 = vmatpush1.bf16.msra.mxu0 %v6950_v37  ;;  %v6979_v6 = vld [vmem:[#allocation8 + $0x208] ss:$16 sps:$4 sm:$0xff]   ;;  %v7012_v37 = vld [vmem:[#allocation8 + $0x2c0] ss:$16 sps:$4 sm:$0xff]  }
  0x87   :  { %5489 = vmatpush1.bf16.msra.mxu1 %v6951_v38  ;;  %4998 = vmatprep.subr.bf16.mxu0 %v6952_v40  ;;  %v7015_v38 = vld [vmem:[#allocation8 + $0x2c8] ss:$16 sps:$4 sm:$0xff]   ;;  %v7020_v40 = vld [vmem:[#allocation8 + $0x2e4] ss:$16 sps:$4 sm:$0xff]  }
  0x88   :  { %v281_v19 = vadd.f32 %v280_v17, %v258_v11  ;;  %5490 = vmatprep.subr.bf16.mxu1 %v6954_v41  ;;  %v6985_v17 = vld [vmem:[#allocation8 + $0x228] ss:$16 sps:$4 sm:$0xff]   ;;  %v7023_v41 = vld [vmem:[#allocation8 + $0x2ec] ss:$16 sps:$4 sm:$0xff]  }
  0x8a   :  { %v282_v20 = vadd.f32 %v281_v19, %v259_v16  ;;  %4999 = vmatpush1.bf16.msra.mxu0 %v6956_v42  ;;  %v6982_v16 = vld [vmem:[#allocation8 + $0x220] ss:$16 sps:$4 sm:$0xff]  }
  0x8b   :  { %5491 = vmatpush1.bf16.msra.mxu1 %v6957_v43  ;;  %5000 = vmatprep.subr.bf16.mxu0 %v6958_v44  ;;  %v7018_v42 = vld [vmem:[#allocation8 + $0x2e0] ss:$16 sps:$4 sm:$0xff]   ;;  %v7021_v43 = vld [vmem:[#allocation8 + $0x2e8] ss:$16 sps:$4 sm:$0xff]   ;;  %v7026_v44 = vld [vmem:[#allocation8 + $0x304] ss:$16 sps:$4 sm:$0xff]  }
  0x8c   :  { %v283_v22 = vadd.f32 %v282_v20, %v260_v18  ;;  %5492 = vmatprep.subr.bf16.mxu1 %v6960_v45  ;;  %v6987_v18 = vld [vmem:[#allocation8 + $0x22c] ss:$16 sps:$4 sm:$0xff]  }
  0x8d   :  { %v6993_v20 = vld [vmem:[#allocation8 + $0x24c] ss:$16 sps:$4 sm:$0xff]  }
  0x8e   :  { %v284_v23 = vadd.f32 %v283_v22, %v261_v21  ;;  %5001 = vmatpush1.bf16.msra.mxu0 %v6962_v46  ;;  %v6990_v21 = vld [vmem:[#allocation8 + $0x244] ss:$16 sps:$4 sm:$0xff]   ;;  %v6988_v22 = vld [vmem:[#allocation8 + $0x240] ss:$16 sps:$4 sm:$0xff]   ;;  %v7029_v45 = vld [vmem:[#allocation8 + $0x30c] ss:$16 sps:$4 sm:$0xff]  }
  0x8f   :  { %5493 = vmatpush1.bf16.msra.mxu1 %v6963_v47  ;;  %5002 = vmatprep.subr.bf16.mxu0 %v6964_v48  ;;  %v7024_v46 = vld [vmem:[#allocation8 + $0x300] ss:$16 sps:$4 sm:$0xff]   ;;  %v7027_v47 = vld [vmem:[#allocation8 + $0x308] ss:$16 sps:$4 sm:$0xff]   ;;  %v7032_v48 = vld [vmem:[#allocation8 + $0x324] ss:$16 sps:$4 sm:$0xff]  }
  0x90   :  { %285 = vadd.xlane.f32.xlu0 %v284_v23  ;;  %5494 = vmatprep.subr.bf16.mxu1 %v6966_v49  ;;  %v6991_v23 = vld [vmem:[#allocation8 + $0x248] ss:$16 sps:$4 sm:$0xff]   ;;  %v7035_v49 = vld [vmem:[#allocation8 + $0x32c] ss:$16 sps:$4 sm:$0xff]  }
  0x92   :  { %5003 = vmatpush1.bf16.msra.mxu0 %v6968_v50  ;;  %v7030_v50 = vld [vmem:[#allocation8 + $0x320] ss:$16 sps:$4 sm:$0xff]  }
  0x93   :  { %5495 = vmatpush1.bf16.msra.mxu1 %v6969_v52  ;;  %5004 = vmatprep.subr.bf16.mxu0 %v6970_v53  ;;  %v7033_v52 = vld [vmem:[#allocation8 + $0x328] ss:$16 sps:$4 sm:$0xff]   ;;  %v7038_v53 = vld [vmem:[#allocation8 + $0x344] ss:$16 sps:$4 sm:$0xff]  }
  0x94   :  { %5496 = vmatprep.subr.bf16.mxu1 %v6972_v54  ;;  %v7041_v54 = vld [vmem:[#allocation8 + $0x34c] ss:$16 sps:$4 sm:$0xff]  }
  0x96   :  { %5005 = vmatpush1.bf16.msra.mxu0 %v6974_v55  ;;  %v7036_v55 = vld [vmem:[#allocation8 + $0x340] ss:$16 sps:$4 sm:$0xff]  }
  0x97   :  { %5497 = vmatpush1.bf16.msra.mxu1 %v6975_v56  ;;  %5015 = vmatprep.subr.bf16.mxu0 %v6978_v57  ;;  %v7039_v56 = vld [vmem:[#allocation8 + $0x348] ss:$16 sps:$4 sm:$0xff]   ;;  %v7044_v57 = vld [vmem:[#allocation8 + $0x364] ss:$16 sps:$4 sm:$0xff]  }
  0x98   :  { %5507 = vmatprep.subr.bf16.mxu1 %v6981_v58  ;;  %v7047_v58 = vld [vmem:[#allocation8 + $0x36c] ss:$16 sps:$4 sm:$0xff]  }
 0x11d   :  { %v286_v59 = vpop.xlane.xlu0 %285 }
 0x11e   :  { %v289_v60 = vadd.f32 %v288_v51, %v286_v59  ;;  %v7042_v51 = vld [vmem:[#allocation8 + $0x360] ss:$16 sps:$4 sm:$0xff]   ;;  %v7045_v59 = vld [vmem:[#allocation8 + $0x368] ss:$16 sps:$4 sm:$0xff]  }
 0x120   :  { %v6011_v61 = vmul.f32 -1.442695, %v289_v60  ;;  %v7050_v60 = vld [vmem:[#allocation8 + $0x384] ss:$16 sps:$4 sm:$0xff]  }
 0x122   :  { %8032 = vpow2.f32 %v6011_v61  ;;  %v7053_v61 = vld [vmem:[#allocation8 + $0x38c] ss:$16 sps:$4 sm:$0xff]  }
 0x12c   :  { %v8033_v62 = vpop.eup %8032 }
 0x12d   :  { %v293_v63 = vadd.f32 1.0, %v8033_v62  ;;  %v7048_v62 = vld [vmem:[#allocation8 + $0x380] ss:$16 sps:$4 sm:$0xff]  }
 0x12f   :  { %8034 = vrcp.f32 %v293_v63  ;;  %v7051_v63 = vld [vmem:[#allocation8 + $0x388] ss:$16 sps:$4 sm:$0xff]  }
 0x139   :  { %v8357_v0 = vpop.eup %8034 }
 0x13a   :  { %v297_v2 = vmul.f32 %v8040_v1, %v8357_v0  ;;  %v296_v9 = vmul.f32 %v8041_v8, %v8357_v0  ;;  %v299_v11 = vmul.f32 %v8042_v10, %v8357_v0  ;;  %v7056_v1 = vld [vmem:[#allocation8 + $0x3a4] ss:$16 sps:$4 sm:$0xff]   ;;  %v7060_v10 = vld [vmem:[#allocation8 + $0x3c0] ss:$16 sps:$4 sm:$0xff]  }
 0x13b   :  { %v7062_v8 = vld [vmem:[#allocation8 + $0x3c4] ss:$16 sps:$4 sm:$0xff]  }
 0x13c   :  { %v321_v12 = vpack.c.bf16 %v297_v2, %v297_v2  ;;  %v320_v13 = vpack.c.bf16 %v296_v9, %v296_v9  ;;  %v323_v19 = vpack.c.bf16 %v299_v11, %v299_v11  ;;  %v7059_v2 = vld [vmem:[#allocation8 + $0x3ac] ss:$16 sps:$4 sm:$0xff]   ;;  %v7063_v11 = vld [vmem:[#allocation8 + $0x3c8] ss:$16 sps:$4 sm:$0xff]  }
 0x13d   :  { %v7065_v9 = vld [vmem:[#allocation8 + $0x3cc] ss:$16 sps:$4 sm:$0xff]  }
 0x13e   :  { %5006 = vmatprep.mubr.bf16.mxu0 %v321_v12  ;;  %5498 = vmatprep.mubr.bf16.mxu1 %v321_v12  ;;  %v7068_v12 = vld [vmem:[#allocation8 + $0x3e4] ss:$16 sps:$4 sm:$0xff]  }
 0x13f   :  { %5007 = vmatmul.mubr.bf16.vlgmr.msra.gmra.mrb[0].mxu0 %v320_v13  ;;  %5499 = vmatmul.mubr.bf16.vlgmr.msra.gmra.mrb[0].mxu1 %v320_v13  ;;  %v7071_v13 = vld [vmem:[#allocation8 + $0x3ec] ss:$16 sps:$4 sm:$0xff]  }
 0x140   :  { %5016 = vmatpush1.bf16.msra.mxu0 %v6976_v5  ;;  %5508 = vmatpush1.bf16.msra.mxu1 %v6979_v6  ;;  %v7054_v5 = vld [vmem:[#allocation8 + $0x3a0] ss:$16 sps:$4 sm:$0xff]   ;;  %v7057_v6 = vld [vmem:[#allocation8 + $0x3a8] ss:$16 sps:$4 sm:$0xff]  }
 0x141   :  { %5047 = vmatprep.mubr.bf16.mxu0 %v323_v19  ;;  %5539 = vmatprep.mubr.bf16.mxu1 %v323_v19  ;;  %v7074_v19 = vld [vmem:[#allocation8 + $0x404] ss:$16 sps:$4 sm:$0xff]  }
 0x142   :  { %5017 = vmatprep.subr.bf16.mxu0 %v6984_v14  ;;  %5509 = vmatprep.subr.bf16.mxu1 %v6987_v18  ;;  %v7066_v14 = vld [vmem:[#allocation8 + $0x3e0] ss:$16 sps:$4 sm:$0xff]  }
 0x144   :  { %5018 = vmatpush1.bf16.msra.mxu0 %v6982_v16  ;;  %5510 = vmatpush1.bf16.msra.mxu1 %v6985_v17  ;;  %v7069_v16 = vld [vmem:[#allocation8 + $0x3e8] ss:$16 sps:$4 sm:$0xff]  }
 0x145   :  { %5019 = vmatprep.subr.bf16.mxu0 %v6990_v21  ;;  %5511 = vmatprep.subr.bf16.mxu1 %v6993_v20  ;;  %v8043_v17 = vld [vmem:[#allocation4 + $0x10] sm:$0xff]  ;;  %v7072_v20 = vld [vmem:[#allocation8 + $0x400] ss:$16 sps:$4 sm:$0xff]  }
 0x146   :  { %v298_v18 = vmul.f32 %v8043_v17, %v8357_v0  ;;  %v7077_v21 = vld [vmem:[#allocation8 + $0x40c] ss:$16 sps:$4 sm:$0xff]   ;;  %v7150_v17 = vld [vmem:[#allocation8 + $0x5a0] ss:$16 sps:$4 sm:$0xff]  }
 0x148   :  { %5020 = vmatpush1.bf16.msra.mxu0 %v6988_v22  ;;  %5512 = vmatpush1.bf16.msra.mxu1 %v6991_v23  ;;  %v8044_v22 = vld [vmem:[#allocation4 + $0x28] sm:$0xff] }
 0x149   :  { %5021 = vmatprep.subr.bf16.mxu0 %v6996_v27  ;;  %5513 = vmatprep.subr.bf16.mxu1 %v6999_v24  ;;  %v301_v23 = vmul.f32 %v8044_v22, %v8357_v0  ;;  %v7075_v27 = vld [vmem:[#allocation8 + $0x408] ss:$16 sps:$4 sm:$0xff]   ;;  %v7080_v24 = vld [vmem:[#allocation8 + $0x424] ss:$16 sps:$4 sm:$0xff]   ;;  %v7161_v22 = vld [vmem:[#allocation8 + $0x5cc] ss:$16 sps:$4 sm:$0xff]  }
 0x14c   :  { %5022 = vmatpush1.bf16.msra.mxu0 %v6994_v25  ;;  %5514 = vmatpush1.bf16.msra.mxu1 %v6997_v26  ;;  %v7083_v25 = vld [vmem:[#allocation8 + $0x42c] ss:$16 sps:$4 sm:$0xff]   ;;  %v322_v26 = vpack.c.bf16 %v298_v18, %v298_v18 }
 0x14d   :  { %5023 = vmatprep.subr.bf16.mxu0 %v7002_v34  ;;  %5515 = vmatprep.subr.bf16.mxu1 %v7005_v28  ;;  %v325_v34 = vpack.c.bf16 %v301_v23, %v301_v23  ;;  %v7078_v28 = vld [vmem:[#allocation8 + $0x420] ss:$16 sps:$4 sm:$0xff]   ;;  %v7155_v18 = vld [vmem:[#allocation8 + $0x5ac] ss:$16 sps:$4 sm:$0xff]   ;;  %v7159_v23 = vld [vmem:[#allocation8 + $0x5c8] ss:$16 sps:$4 sm:$0xff]  }
 0x150   :  { %5024 = vmatpush1.bf16.msra.mxu0 %v7000_v39  ;;  %5516 = vmatpush1.bf16.msra.mxu1 %v7003_v29  ;;  %v7081_v39 = vld [vmem:[#allocation8 + $0x428] ss:$16 sps:$4 sm:$0xff]   ;;  %v7086_v29 = vld [vmem:[#allocation8 + $0x444] ss:$16 sps:$4 sm:$0xff]  }
 0x151   :  { %5025 = vmatprep.subr.bf16.mxu0 %v7008_v30  ;;  %5517 = vmatprep.subr.bf16.mxu1 %v7011_v31  ;;  %v7089_v30 = vld [vmem:[#allocation8 + $0x44c] ss:$16 sps:$4 sm:$0xff]   ;;  %v7084_v31 = vld [vmem:[#allocation8 + $0x440] ss:$16 sps:$4 sm:$0xff]  }
 0x154   :  { %5026 = vmatpush1.bf16.msra.mxu0 %v7006_v32  ;;  %5518 = vmatpush1.bf16.msra.mxu1 %v7009_v33  ;;  %v7087_v32 = vld [vmem:[#allocation8 + $0x448] ss:$16 sps:$4 sm:$0xff]   ;;  %v7092_v33 = vld [vmem:[#allocation8 + $0x464] ss:$16 sps:$4 sm:$0xff]  }
 0x155   :  { %5027 = vmatprep.subr.bf16.mxu0 %v7014_v35  ;;  %5519 = vmatprep.subr.bf16.mxu1 %v7017_v36  ;;  %v7090_v35 = vld [vmem:[#allocation8 + $0x460] ss:$16 sps:$4 sm:$0xff]   ;;  %v7095_v36 = vld [vmem:[#allocation8 + $0x46c] ss:$16 sps:$4 sm:$0xff]  }
 0x158   :  { %5028 = vmatpush1.bf16.msra.mxu0 %v7012_v37  ;;  %5520 = vmatpush1.bf16.msra.mxu1 %v7015_v38  ;;  %v7093_v37 = vld [vmem:[#allocation8 + $0x468] ss:$16 sps:$4 sm:$0xff]   ;;  %v7098_v38 = vld [vmem:[#allocation8 + $0x484] ss:$16 sps:$4 sm:$0xff]  }
 0x159   :  { %5029 = vmatprep.subr.bf16.mxu0 %v7020_v40  ;;  %5521 = vmatprep.subr.bf16.mxu1 %v7023_v41  ;;  %v7096_v40 = vld [vmem:[#allocation8 + $0x480] ss:$16 sps:$4 sm:$0xff]   ;;  %v7101_v41 = vld [vmem:[#allocation8 + $0x48c] ss:$16 sps:$4 sm:$0xff]  }
 0x15c   :  { %5030 = vmatpush1.bf16.msra.mxu0 %v7018_v42  ;;  %5522 = vmatpush1.bf16.msra.mxu1 %v7021_v43  ;;  %v7099_v42 = vld [vmem:[#allocation8 + $0x488] ss:$16 sps:$4 sm:$0xff]   ;;  %v7104_v43 = vld [vmem:[#allocation8 + $0x4a4] ss:$16 sps:$4 sm:$0xff]  }
 0x15d   :  { %5031 = vmatprep.subr.bf16.mxu0 %v7026_v44  ;;  %5523 = vmatprep.subr.bf16.mxu1 %v7029_v45  ;;  %v7102_v44 = vld [vmem:[#allocation8 + $0x4a0] ss:$16 sps:$4 sm:$0xff]   ;;  %v7107_v45 = vld [vmem:[#allocation8 + $0x4ac] ss:$16 sps:$4 sm:$0xff]  }
 0x160   :  { %5032 = vmatpush1.bf16.msra.mxu0 %v7024_v46  ;;  %5524 = vmatpush1.bf16.msra.mxu1 %v7027_v47  ;;  %v7105_v46 = vld [vmem:[#allocation8 + $0x4a8] ss:$16 sps:$4 sm:$0xff]   ;;  %v7110_v47 = vld [vmem:[#allocation8 + $0x4c4] ss:$16 sps:$4 sm:$0xff]  }
 0x161   :  { %5033 = vmatprep.subr.bf16.mxu0 %v7032_v48  ;;  %5525 = vmatprep.subr.bf16.mxu1 %v7035_v49  ;;  %v7108_v48 = vld [vmem:[#allocation8 + $0x4c0] ss:$16 sps:$4 sm:$0xff]   ;;  %v7113_v49 = vld [vmem:[#allocation8 + $0x4cc] ss:$16 sps:$4 sm:$0xff]  }
 0x164   :  { %5034 = vmatpush1.bf16.msra.mxu0 %v7030_v50  ;;  %5526 = vmatpush1.bf16.msra.mxu1 %v7033_v52  ;;  %v7111_v50 = vld [vmem:[#allocation8 + $0x4c8] ss:$16 sps:$4 sm:$0xff]   ;;  %v7116_v52 = vld [vmem:[#allocation8 + $0x4e4] ss:$16 sps:$4 sm:$0xff]  }
 0x165   :  { %5035 = vmatprep.subr.bf16.mxu0 %v7038_v53  ;;  %5527 = vmatprep.subr.bf16.mxu1 %v7041_v54  ;;  %v7114_v53 = vld [vmem:[#allocation8 + $0x4e0] ss:$16 sps:$4 sm:$0xff]   ;;  %v7119_v54 = vld [vmem:[#allocation8 + $0x4ec] ss:$16 sps:$4 sm:$0xff]  }
 0x168   :  { %5036 = vmatpush1.bf16.msra.mxu0 %v7036_v55  ;;  %5528 = vmatpush1.bf16.msra.mxu1 %v7039_v56  ;;  %v7117_v55 = vld [vmem:[#allocation8 + $0x4e8] ss:$16 sps:$4 sm:$0xff]   ;;  %v7122_v56 = vld [vmem:[#allocation8 + $0x504] ss:$16 sps:$4 sm:$0xff]  }
 0x169   :  { %5037 = vmatprep.subr.bf16.mxu0 %v7044_v57  ;;  %5529 = vmatprep.subr.bf16.mxu1 %v7047_v58  ;;  %v7120_v57 = vld [vmem:[#allocation8 + $0x500] ss:$16 sps:$4 sm:$0xff]   ;;  %v7125_v58 = vld [vmem:[#allocation8 + $0x50c] ss:$16 sps:$4 sm:$0xff]  }
 0x16c   :  { %5038 = vmatpush1.bf16.msra.mxu0 %v7042_v51  ;;  %5530 = vmatpush1.bf16.msra.mxu1 %v7045_v59  ;;  %v7123_v51 = vld [vmem:[#allocation8 + $0x508] ss:$16 sps:$4 sm:$0xff]   ;;  %v7128_v59 = vld [vmem:[#allocation8 + $0x524] ss:$16 sps:$4 sm:$0xff]  }
 0x16d   :  { %5039 = vmatprep.subr.bf16.mxu0 %v7050_v60  ;;  %5531 = vmatprep.subr.bf16.mxu1 %v7053_v61  ;;  %v7126_v60 = vld [vmem:[#allocation8 + $0x520] ss:$16 sps:$4 sm:$0xff]   ;;  %v7131_v61 = vld [vmem:[#allocation8 + $0x52c] ss:$16 sps:$4 sm:$0xff]  }
 0x170   :  { %5040 = vmatpush1.bf16.msra.mxu0 %v7048_v62  ;;  %5532 = vmatpush1.bf16.msra.mxu1 %v7051_v63  ;;  %v7129_v62 = vld [vmem:[#allocation8 + $0x528] ss:$16 sps:$4 sm:$0xff]   ;;  %v7134_v63 = vld [vmem:[#allocation8 + $0x544] ss:$16 sps:$4 sm:$0xff]  }
 0x171   :  { %5041 = vmatprep.subr.bf16.mxu0 %v7056_v1  ;;  %5533 = vmatprep.subr.bf16.mxu1 %v7059_v2  ;;  %v7132_v1 = vld [vmem:[#allocation8 + $0x540] ss:$16 sps:$4 sm:$0xff]   ;;  %v7137_v2 = vld [vmem:[#allocation8 + $0x54c] ss:$16 sps:$4 sm:$0xff]  }
 0x174   :  { %5042 = vmatpush1.bf16.msra.mxu0 %v7054_v5  ;;  %5534 = vmatpush1.bf16.msra.mxu1 %v7057_v6  ;;  %v7135_v5 = vld [vmem:[#allocation8 + $0x548] ss:$16 sps:$4 sm:$0xff]   ;;  %v7140_v6 = vld [vmem:[#allocation8 + $0x564] ss:$16 sps:$4 sm:$0xff]  }
 0x175   :  { %5043 = vmatprep.subr.bf16.mxu0 %v7062_v8  ;;  %5535 = vmatprep.subr.bf16.mxu1 %v7065_v9  ;;  %v7138_v8 = vld [vmem:[#allocation8 + $0x560] ss:$16 sps:$4 sm:$0xff]   ;;  %v7143_v9 = vld [vmem:[#allocation8 + $0x56c] ss:$16 sps:$4 sm:$0xff]  }
 0x178   :  { %5044 = vmatpush1.bf16.msra.mxu0 %v7060_v10  ;;  %5536 = vmatpush1.bf16.msra.mxu1 %v7063_v11  ;;  %v7141_v10 = vld [vmem:[#allocation8 + $0x568] ss:$16 sps:$4 sm:$0xff]   ;;  %v7146_v11 = vld [vmem:[#allocation8 + $0x584] ss:$16 sps:$4 sm:$0xff]  }
 0x179   :  { %5045 = vmatprep.subr.bf16.mxu0 %v7068_v12  ;;  %5537 = vmatprep.subr.bf16.mxu1 %v7071_v13  ;;  %v7144_v12 = vld [vmem:[#allocation8 + $0x580] ss:$16 sps:$4 sm:$0xff]   ;;  %v7149_v13 = vld [vmem:[#allocation8 + $0x58c] ss:$16 sps:$4 sm:$0xff]  }
 0x17c   :  { %5046 = vmatpush1.bf16.msra.mxu0 %v7066_v14  ;;  %5538 = vmatpush1.bf16.msra.mxu1 %v7069_v16  ;;  %v7147_v14 = vld [vmem:[#allocation8 + $0x588] ss:$16 sps:$4 sm:$0xff]   ;;  %v7152_v16 = vld [vmem:[#allocation8 + $0x5a4] ss:$16 sps:$4 sm:$0xff]  }
 0x17d   :  { %5056 = vmatprep.subr.bf16.mxu0 %v7074_v19  ;;  %5548 = vmatprep.subr.bf16.mxu1 %v7077_v21  ;;  %v7153_v19 = vld [vmem:[#allocation8 + $0x5a8] ss:$16 sps:$4 sm:$0xff]   ;;  %v7158_v21 = vld [vmem:[#allocation8 + $0x5c4] ss:$16 sps:$4 sm:$0xff]  }
 0x17f   :  { %5048 = vmatmul.mubr.bf16.vlgmr.msra.gmra.mrb[0].mxu0 %v322_v26  ;;  %5540 = vmatmul.mubr.bf16.vlgmr.msra.gmra.mrb[0].mxu1 %v322_v26  ;;  %v7165_v26 = vld [vmem:[#allocation8 + $0x5e8] ss:$16 sps:$4 sm:$0xff]  }
 0x180   :  { %5057 = vmatpush1.bf16.msra.mxu0 %v7072_v20  ;;  %5088 = vmatprep.mubr.bf16.mxu0 %v325_v34  ;;  %v7156_v20 = vld [vmem:[#allocation8 + $0x5c0] ss:$16 sps:$4 sm:$0xff]  }
 0x181   :  { %5549 = vmatpush1.bf16.msra.mxu1 %v7075_v27  ;;  %5580 = vmatprep.mubr.bf16.mxu1 %v325_v34  ;;  %v7164_v27 = vld [vmem:[#allocation8 + $0x5e4] ss:$16 sps:$4 sm:$0xff]   ;;  %v8045_v34 = vld [vmem:[#allocation4 + $0x20] sm:$0xff] }
 0x182   :  { %5058 = vmatprep.subr.bf16.mxu0 %v7080_v24  ;;  %5550 = vmatprep.subr.bf16.mxu1 %v7083_v25  ;;  %v7162_v24 = vld [vmem:[#allocation8 + $0x5e0] ss:$16 sps:$4 sm:$0xff]   ;;  %v7167_v25 = vld [vmem:[#allocation8 + $0x5ec] ss:$16 sps:$4 sm:$0xff]  }
 0x184   :  { %5059 = vmatpush1.bf16.msra.mxu0 %v7078_v28  ;;  %v300_v28 = vmul.f32 %v8045_v34, %v8357_v0  ;;  %v7251_v34 = vld [vmem:[#allocation8 + $0x7ac] ss:$16 sps:$4 sm:$0xff]  }
 0x185   :  { %5551 = vmatpush1.bf16.msra.mxu1 %v7081_v39  ;;  %5060 = vmatprep.subr.bf16.mxu0 %v7086_v29  ;;  %v7170_v39 = vld [vmem:[#allocation8 + $0x604] ss:$16 sps:$4 sm:$0xff]   ;;  %v7173_v29 = vld [vmem:[#allocation8 + $0x60c] ss:$16 sps:$4 sm:$0xff]  }
 0x186   :  { %5552 = vmatprep.subr.bf16.mxu1 %v7089_v30  ;;  %v7168_v30 = vld [vmem:[#allocation8 + $0x600] ss:$16 sps:$4 sm:$0xff]  }
 0x188   :  { %5061 = vmatpush1.bf16.msra.mxu0 %v7084_v31  ;;  %v7171_v31 = vld [vmem:[#allocation8 + $0x608] ss:$16 sps:$4 sm:$0xff]  }
 0x189   :  { %5553 = vmatpush1.bf16.msra.mxu1 %v7087_v32  ;;  %5062 = vmatprep.subr.bf16.mxu0 %v7092_v33  ;;  %v8046_v32 = vld [vmem:[#allocation4 + $0x38] sm:$0xff] }
 0x18a   :  { %5554 = vmatprep.subr.bf16.mxu1 %v7095_v36  ;;  %v303_v33 = vmul.f32 %v8046_v32, %v8357_v0  ;;  %v324_v36 = vpack.c.bf16 %v300_v28, %v300_v28  ;;  %v7246_v28 = vld [vmem:[#allocation8 + $0x7a0] ss:$16 sps:$4 sm:$0xff]   ;;  %v7255_v32 = vld [vmem:[#allocation8 + $0x7c8] ss:$16 sps:$4 sm:$0xff]  }
 0x18c   :  { %5063 = vmatpush1.bf16.msra.mxu0 %v7090_v35  ;;  %v7176_v35 = vld [vmem:[#allocation8 + $0x624] ss:$16 sps:$4 sm:$0xff]  }
 0x18d   :  { %5555 = vmatpush1.bf16.msra.mxu1 %v7093_v37  ;;  %5064 = vmatprep.subr.bf16.mxu0 %v7098_v38  ;;  %v327_v37 = vpack.c.bf16 %v303_v33, %v303_v33  ;;  %v7174_v38 = vld [vmem:[#allocation8 + $0x620] ss:$16 sps:$4 sm:$0xff]   ;;  %v7260_v33 = vld [vmem:[#allocation8 + $0x7e4] ss:$16 sps:$4 sm:$0xff]  }
 0x18e   :  { %5556 = vmatprep.subr.bf16.mxu1 %v7101_v41  ;;  %v7177_v41 = vld [vmem:[#allocation8 + $0x628] ss:$16 sps:$4 sm:$0xff]  }
 0x190   :  { %5065 = vmatpush1.bf16.msra.mxu0 %v7096_v40  ;;  %v7179_v40 = vld [vmem:[#allocation8 + $0x62c] ss:$16 sps:$4 sm:$0xff]  }
 0x191   :  { %5557 = vmatpush1.bf16.msra.mxu1 %v7099_v42  ;;  %5066 = vmatprep.subr.bf16.mxu0 %v7104_v43  ;;  %v7182_v42 = vld [vmem:[#allocation8 + $0x644] ss:$16 sps:$4 sm:$0xff]   ;;  %v7185_v43 = vld [vmem:[#allocation8 + $0x64c] ss:$16 sps:$4 sm:$0xff]  }
 0x192   :  { %5558 = vmatprep.subr.bf16.mxu1 %v7107_v45  ;;  %v7183_v45 = vld [vmem:[#allocation8 + $0x648] ss:$16 sps:$4 sm:$0xff]  }
 0x194   :  { %5067 = vmatpush1.bf16.msra.mxu0 %v7102_v44  ;;  %v7180_v44 = vld [vmem:[#allocation8 + $0x640] ss:$16 sps:$4 sm:$0xff]  }
 0x195   :  { %5559 = vmatpush1.bf16.msra.mxu1 %v7105_v46  ;;  %5068 = vmatprep.subr.bf16.mxu0 %v7110_v47  ;;  %v7188_v46 = vld [vmem:[#allocation8 + $0x664] ss:$16 sps:$4 sm:$0xff]   ;;  %v7191_v47 = vld [vmem:[#allocation8 + $0x66c] ss:$16 sps:$4 sm:$0xff]  }
 0x196   :  { %5560 = vmatprep.subr.bf16.mxu1 %v7113_v49  ;;  %v7189_v49 = vld [vmem:[#allocation8 + $0x668] ss:$16 sps:$4 sm:$0xff]  }
 0x198   :  { %5069 = vmatpush1.bf16.msra.mxu0 %v7108_v48  ;;  %v7186_v48 = vld [vmem:[#allocation8 + $0x660] ss:$16 sps:$4 sm:$0xff]  }
 0x199   :  { %5561 = vmatpush1.bf16.msra.mxu1 %v7111_v50  ;;  %5070 = vmatprep.subr.bf16.mxu0 %v7116_v52  ;;  %v7194_v50 = vld [vmem:[#allocation8 + $0x684] ss:$16 sps:$4 sm:$0xff]   ;;  %v7197_v52 = vld [vmem:[#allocation8 + $0x68c] ss:$16 sps:$4 sm:$0xff]  }
 0x19a   :  { %5562 = vmatprep.subr.bf16.mxu1 %v7119_v54  ;;  %v7195_v54 = vld [vmem:[#allocation8 + $0x688] ss:$16 sps:$4 sm:$0xff]  }
 0x19c   :  { %5071 = vmatpush1.bf16.msra.mxu0 %v7114_v53  ;;  %v7192_v53 = vld [vmem:[#allocation8 + $0x680] ss:$16 sps:$4 sm:$0xff]  }
 0x19d   :  { %5563 = vmatpush1.bf16.msra.mxu1 %v7117_v55  ;;  %5072 = vmatprep.subr.bf16.mxu0 %v7122_v56  ;;  %v7200_v55 = vld [vmem:[#allocation8 + $0x6a4] ss:$16 sps:$4 sm:$0xff]   ;;  %v7203_v56 = vld [vmem:[#allocation8 + $0x6ac] ss:$16 sps:$4 sm:$0xff]  }
 0x19e   :  { %5564 = vmatprep.subr.bf16.mxu1 %v7125_v58  ;;  %v7201_v58 = vld [vmem:[#allocation8 + $0x6a8] ss:$16 sps:$4 sm:$0xff]  }
 0x1a0   :  { %5073 = vmatpush1.bf16.msra.mxu0 %v7120_v57  ;;  %v7198_v57 = vld [vmem:[#allocation8 + $0x6a0] ss:$16 sps:$4 sm:$0xff]  }
 0x1a1   :  { %5565 = vmatpush1.bf16.msra.mxu1 %v7123_v51  ;;  %5074 = vmatprep.subr.bf16.mxu0 %v7128_v59  ;;  %v7206_v51 = vld [vmem:[#allocation8 + $0x6c4] ss:$16 sps:$4 sm:$0xff]   ;;  %v7209_v59 = vld [vmem:[#allocation8 + $0x6cc] ss:$16 sps:$4 sm:$0xff]  }
 0x1a2   :  { %5566 = vmatprep.subr.bf16.mxu1 %v7131_v61  ;;  %v7207_v61 = vld [vmem:[#allocation8 + $0x6c8] ss:$16 sps:$4 sm:$0xff]  }
 0x1a4   :  { %5075 = vmatpush1.bf16.msra.mxu0 %v7126_v60  ;;  %v7204_v60 = vld [vmem:[#allocation8 + $0x6c0] ss:$16 sps:$4 sm:$0xff]  }
 0x1a5   :  { %5567 = vmatpush1.bf16.msra.mxu1 %v7129_v62  ;;  %5076 = vmatprep.subr.bf16.mxu0 %v7134_v63  ;;  %v7212_v62 = vld [vmem:[#allocation8 + $0x6e4] ss:$16 sps:$4 sm:$0xff]   ;;  %v7215_v63 = vld [vmem:[#allocation8 + $0x6ec] ss:$16 sps:$4 sm:$0xff]  }
 0x1a6   :  { %5568 = vmatprep.subr.bf16.mxu1 %v7137_v2  ;;  %v7213_v2 = vld [vmem:[#allocation8 + $0x6e8] ss:$16 sps:$4 sm:$0xff]  }
 0x1a8   :  { %5077 = vmatpush1.bf16.msra.mxu0 %v7132_v1  ;;  %v7210_v1 = vld [vmem:[#allocation8 + $0x6e0] ss:$16 sps:$4 sm:$0xff]  }
 0x1a9   :  { %5569 = vmatpush1.bf16.msra.mxu1 %v7135_v5  ;;  %5078 = vmatprep.subr.bf16.mxu0 %v7140_v6  ;;  %v7218_v5 = vld [vmem:[#allocation8 + $0x704] ss:$16 sps:$4 sm:$0xff]   ;;  %v7221_v6 = vld [vmem:[#allocation8 + $0x70c] ss:$16 sps:$4 sm:$0xff]  }
 0x1aa   :  { %5570 = vmatprep.subr.bf16.mxu1 %v7143_v9  ;;  %v7219_v9 = vld [vmem:[#allocation8 + $0x708] ss:$16 sps:$4 sm:$0xff]  }
 0x1ac   :  { %5079 = vmatpush1.bf16.msra.mxu0 %v7138_v8  ;;  %v7216_v8 = vld [vmem:[#allocation8 + $0x700] ss:$16 sps:$4 sm:$0xff]  }
 0x1ad   :  { %5571 = vmatpush1.bf16.msra.mxu1 %v7141_v10  ;;  %5080 = vmatprep.subr.bf16.mxu0 %v7146_v11  ;;  %v7224_v10 = vld [vmem:[#allocation8 + $0x724] ss:$16 sps:$4 sm:$0xff]   ;;  %v7227_v11 = vld [vmem:[#allocation8 + $0x72c] ss:$16 sps:$4 sm:$0xff]  }
 0x1ae   :  { %5572 = vmatprep.subr.bf16.mxu1 %v7149_v13  ;;  %v7225_v13 = vld [vmem:[#allocation8 + $0x728] ss:$16 sps:$4 sm:$0xff]  }
 0x1b0   :  { %5081 = vmatpush1.bf16.msra.mxu0 %v7144_v12  ;;  %v7222_v12 = vld [vmem:[#allocation8 + $0x720] ss:$16 sps:$4 sm:$0xff]  }
 0x1b1   :  { %5573 = vmatpush1.bf16.msra.mxu1 %v7147_v14  ;;  %5082 = vmatprep.subr.bf16.mxu0 %v7152_v16  ;;  %v7230_v14 = vld [vmem:[#allocation8 + $0x744] ss:$16 sps:$4 sm:$0xff]   ;;  %v7233_v16 = vld [vmem:[#allocation8 + $0x74c] ss:$16 sps:$4 sm:$0xff]  }
 0x1b2   :  { %5574 = vmatprep.subr.bf16.mxu1 %v7155_v18  ;;  %v7231_v18 = vld [vmem:[#allocation8 + $0x748] ss:$16 sps:$4 sm:$0xff]  }
 0x1b4   :  { %5083 = vmatpush1.bf16.msra.mxu0 %v7150_v17  ;;  %v7228_v17 = vld [vmem:[#allocation8 + $0x740] ss:$16 sps:$4 sm:$0xff]  }
 0x1b5   :  { %5575 = vmatpush1.bf16.msra.mxu1 %v7153_v19  ;;  %5084 = vmatprep.subr.bf16.mxu0 %v7158_v21  ;;  %v7236_v19 = vld [vmem:[#allocation8 + $0x764] ss:$16 sps:$4 sm:$0xff]   ;;  %v7239_v21 = vld [vmem:[#allocation8 + $0x76c] ss:$16 sps:$4 sm:$0xff]  }
 0x1b6   :  { %5576 = vmatprep.subr.bf16.mxu1 %v7161_v22  ;;  %v7237_v22 = vld [vmem:[#allocation8 + $0x768] ss:$16 sps:$4 sm:$0xff]  }
 0x1b8   :  { %5085 = vmatpush1.bf16.msra.mxu0 %v7156_v20  ;;  %v7234_v20 = vld [vmem:[#allocation8 + $0x760] ss:$16 sps:$4 sm:$0xff]  }
 0x1b9   :  { %5577 = vmatpush1.bf16.msra.mxu1 %v7159_v23  ;;  %5086 = vmatprep.subr.bf16.mxu0 %v7164_v27  ;;  %v7242_v23 = vld [vmem:[#allocation8 + $0x784] ss:$16 sps:$4 sm:$0xff]   ;;  %v7245_v27 = vld [vmem:[#allocation8 + $0x78c] ss:$16 sps:$4 sm:$0xff]  }
 0x1ba   :  { %5578 = vmatprep.subr.bf16.mxu1 %v7167_v25  ;;  %v7243_v25 = vld [vmem:[#allocation8 + $0x788] ss:$16 sps:$4 sm:$0xff]  }
 0x1bc   :  { %5087 = vmatpush1.bf16.msra.mxu0 %v7162_v24  ;;  %v7240_v24 = vld [vmem:[#allocation8 + $0x780] ss:$16 sps:$4 sm:$0xff]  }
 0x1bd   :  { %5579 = vmatpush1.bf16.msra.mxu1 %v7165_v26  ;;  %5097 = vmatprep.subr.bf16.mxu0 %v7170_v39  ;;  %v7248_v26 = vld [vmem:[#allocation8 + $0x7a4] ss:$16 sps:$4 sm:$0xff]   ;;  %v7249_v39 = vld [vmem:[#allocation8 + $0x7a8] ss:$16 sps:$4 sm:$0xff]  }
 0x1be   :  { %5589 = vmatprep.subr.bf16.mxu1 %v7173_v29  ;;  %v7254_v29 = vld [vmem:[#allocation8 + $0x7c4] ss:$16 sps:$4 sm:$0xff]  }
 0x1bf   :  { %5089 = vmatmul.mubr.bf16.vlgmr.msra.gmra.mrb[0].mxu0 %v324_v36 }
 0x1c0   :  { %5581 = vmatmul.mubr.bf16.vlgmr.msra.gmra.mrb[0].mxu1 %v324_v36  ;;  %5098 = vmatpush1.bf16.msra.mxu0 %v7168_v30  ;;  %v7257_v30 = vld [vmem:[#allocation8 + $0x7cc] ss:$16 sps:$4 sm:$0xff]   ;;  %v7258_v36 = vld [vmem:[#allocation8 + $0x7e0] ss:$16 sps:$4 sm:$0xff]  }
 0x1c1   :  { %5129 = vmatprep.mubr.bf16.mxu0 %v327_v37  ;;  %5590 = vmatpush1.bf16.msra.mxu1 %v7171_v31  ;;  %v7252_v31 = vld [vmem:[#allocation8 + $0x7c0] ss:$16 sps:$4 sm:$0xff]  }
 0x1c2   :  { %5621 = vmatprep.mubr.bf16.mxu1 %v327_v37  ;;  %5099 = vmatprep.subr.bf16.mxu0 %v7176_v35  ;;  %v7263_v35 = vld [vmem:[#allocation8 + $0x7ec] ss:$16 sps:$4 sm:$0xff]   ;;  %v7261_v37 = vld [vmem:[#allocation8 + $0x7e8] ss:$16 sps:$4 sm:$0xff]  }
 0x1c3   :  { %5591 = vmatprep.subr.bf16.mxu1 %v7179_v40 }
 0x1c4   :  { %5100 = vmatpush1.bf16.msra.mxu0 %v7174_v38  ;;  %v8047_v38 = vld [vmem:[#allocation4 + $0x30] sm:$0xff] }
 0x1c5   :  { %5592 = vmatpush1.bf16.msra.mxu1 %v7177_v41  ;;  %5101 = vmatprep.subr.bf16.mxu0 %v7182_v42  ;;  %v302_v40 = vmul.f32 %v8047_v38, %v8357_v0  ;;  %v7266_v41 = vld [vmem:[#allocation8 + $0x804] ss:$16 sps:$4 sm:$0xff]   ;;  %v7269_v42 = vld [vmem:[#allocation8 + $0x80c] ss:$16 sps:$4 sm:$0xff]  }
 0x1c6   :  { %5593 = vmatprep.subr.bf16.mxu1 %v7185_v43  ;;  %v8048_v43 = vld [vmem:[#allocation4 + $0x48] sm:$0xff]  ;;  %v7347_v38 = vld [vmem:[#allocation8 + $0x9ac] ss:$16 sps:$4 sm:$0xff]  }
 0x1c8   :  { %5102 = vmatpush1.bf16.msra.mxu0 %v7180_v44  ;;  %v305_v44 = vmul.f32 %v8048_v43, %v8357_v0  ;;  %v7353_v43 = vld [vmem:[#allocation8 + $0x9cc] ss:$16 sps:$4 sm:$0xff]  }
 0x1c9   :  { %5594 = vmatpush1.bf16.msra.mxu1 %v7183_v45  ;;  %5103 = vmatprep.subr.bf16.mxu0 %v7188_v46  ;;  %v7264_v45 = vld [vmem:[#allocation8 + $0x800] ss:$16 sps:$4 sm:$0xff]   ;;  %v326_v46 = vpack.c.bf16 %v302_v40, %v302_v40 }
 0x1ca   :  { %5595 = vmatprep.subr.bf16.mxu1 %v7191_v47  ;;  %v7267_v47 = vld [vmem:[#allocation8 + $0x808] ss:$16 sps:$4 sm:$0xff]   ;;  %v7342_v40 = vld [vmem:[#allocation8 + $0x9a0] ss:$16 sps:$4 sm:$0xff]  }
 0x1cc   :  { %5104 = vmatpush1.bf16.msra.mxu0 %v7186_v48  ;;  %v7272_v48 = vld [vmem:[#allocation8 + $0x824] ss:$16 sps:$4 sm:$0xff]  }
 0x1cd   :  { %5596 = vmatpush1.bf16.msra.mxu1 %v7189_v49  ;;  %5105 = vmatprep.subr.bf16.mxu0 %v7194_v50  ;;  %v329_v49 = vpack.c.bf16 %v305_v44, %v305_v44  ;;  %v7275_v50 = vld [vmem:[#allocation8 + $0x82c] ss:$16 sps:$4 sm:$0xff]   ;;  %v7348_v44 = vld [vmem:[#allocation8 + $0x9c0] ss:$16 sps:$4 sm:$0xff]  }
 0x1ce   :  { %5597 = vmatprep.subr.bf16.mxu1 %v7197_v52  ;;  %v7270_v52 = vld [vmem:[#allocation8 + $0x820] ss:$16 sps:$4 sm:$0xff]  }
 0x1d0   :  { %5106 = vmatpush1.bf16.msra.mxu0 %v7192_v53  ;;  %v7273_v53 = vld [vmem:[#allocation8 + $0x828] ss:$16 sps:$4 sm:$0xff]  }
 0x1d1   :  { %5598 = vmatpush1.bf16.msra.mxu1 %v7195_v54  ;;  %5107 = vmatprep.subr.bf16.mxu0 %v7200_v55  ;;  %v7278_v54 = vld [vmem:[#allocation8 + $0x844] ss:$16 sps:$4 sm:$0xff]   ;;  %v7281_v55 = vld [vmem:[#allocation8 + $0x84c] ss:$16 sps:$4 sm:$0xff]  }
 0x1d2   :  { %5599 = vmatprep.subr.bf16.mxu1 %v7203_v56  ;;  %v7276_v56 = vld [vmem:[#allocation8 + $0x840] ss:$16 sps:$4 sm:$0xff]  }
 0x1d4   :  { %5108 = vmatpush1.bf16.msra.mxu0 %v7198_v57  ;;  %v7279_v57 = vld [vmem:[#allocation8 + $0x848] ss:$16 sps:$4 sm:$0xff]  }
 0x1d5   :  { %5600 = vmatpush1.bf16.msra.mxu1 %v7201_v58  ;;  %5109 = vmatprep.subr.bf16.mxu0 %v7206_v51  ;;  %v7284_v58 = vld [vmem:[#allocation8 + $0x864] ss:$16 sps:$4 sm:$0xff]   ;;  %v7287_v51 = vld [vmem:[#allocation8 + $0x86c] ss:$16 sps:$4 sm:$0xff]  }
 0x1d6   :  { %5601 = vmatprep.subr.bf16.mxu1 %v7209_v59  ;;  %v7282_v59 = vld [vmem:[#allocation8 + $0x860] ss:$16 sps:$4 sm:$0xff]  }
 0x1d8   :  { %5110 = vmatpush1.bf16.msra.mxu0 %v7204_v60  ;;  %v7285_v60 = vld [vmem:[#allocation8 + $0x868] ss:$16 sps:$4 sm:$0xff]  }
 0x1d9   :  { %5602 = vmatpush1.bf16.msra.mxu1 %v7207_v61  ;;  %5111 = vmatprep.subr.bf16.mxu0 %v7212_v62  ;;  %v7290_v61 = vld [vmem:[#allocation8 + $0x884] ss:$16 sps:$4 sm:$0xff]   ;;  %v7293_v62 = vld [vmem:[#allocation8 + $0x88c] ss:$16 sps:$4 sm:$0xff]  }
 0x1da   :  { %5603 = vmatprep.subr.bf16.mxu1 %v7215_v63  ;;  %v7288_v63 = vld [vmem:[#allocation8 + $0x880] ss:$16 sps:$4 sm:$0xff]  }
 0x1dc   :  { %5112 = vmatpush1.bf16.msra.mxu0 %v7210_v1  ;;  %v7291_v1 = vld [vmem:[#allocation8 + $0x888] ss:$16 sps:$4 sm:$0xff]  }
 0x1dd   :  { %5604 = vmatpush1.bf16.msra.mxu1 %v7213_v2  ;;  %5113 = vmatprep.subr.bf16.mxu0 %v7218_v5  ;;  %v7296_v2 = vld [vmem:[#allocation8 + $0x8a4] ss:$16 sps:$4 sm:$0xff]   ;;  %v7299_v5 = vld [vmem:[#allocation8 + $0x8ac] ss:$16 sps:$4 sm:$0xff]  }
 0x1de   :  { %5605 = vmatprep.subr.bf16.mxu1 %v7221_v6  ;;  %v7294_v6 = vld [vmem:[#allocation8 + $0x8a0] ss:$16 sps:$4 sm:$0xff]  }
 0x1e0   :  { %5114 = vmatpush1.bf16.msra.mxu0 %v7216_v8  ;;  %v7297_v8 = vld [vmem:[#allocation8 + $0x8a8] ss:$16 sps:$4 sm:$0xff]  }
 0x1e1   :  { %5606 = vmatpush1.bf16.msra.mxu1 %v7219_v9  ;;  %5115 = vmatprep.subr.bf16.mxu0 %v7224_v10  ;;  %v7302_v9 = vld [vmem:[#allocation8 + $0x8c4] ss:$16 sps:$4 sm:$0xff]   ;;  %v7305_v10 = vld [vmem:[#allocation8 + $0x8cc] ss:$16 sps:$4 sm:$0xff]  }
 0x1e2   :  { %5607 = vmatprep.subr.bf16.mxu1 %v7227_v11  ;;  %v7300_v11 = vld [vmem:[#allocation8 + $0x8c0] ss:$16 sps:$4 sm:$0xff]  }
 0x1e4   :  { %5116 = vmatpush1.bf16.msra.mxu0 %v7222_v12  ;;  %v7303_v12 = vld [vmem:[#allocation8 + $0x8c8] ss:$16 sps:$4 sm:$0xff]  }
 0x1e5   :  { %5608 = vmatpush1.bf16.msra.mxu1 %v7225_v13  ;;  %5117 = vmatprep.subr.bf16.mxu0 %v7230_v14  ;;  %v7308_v13 = vld [vmem:[#allocation8 + $0x8e4] ss:$16 sps:$4 sm:$0xff]   ;;  %v7311_v14 = vld [vmem:[#allocation8 + $0x8ec] ss:$16 sps:$4 sm:$0xff]  }
 0x1e6   :  { %5609 = vmatprep.subr.bf16.mxu1 %v7233_v16  ;;  %v7306_v16 = vld [vmem:[#allocation8 + $0x8e0] ss:$16 sps:$4 sm:$0xff]  }
 0x1e8   :  { %5118 = vmatpush1.bf16.msra.mxu0 %v7228_v17  ;;  %v7309_v17 = vld [vmem:[#allocation8 + $0x8e8] ss:$16 sps:$4 sm:$0xff]  }
 0x1e9   :  { %5610 = vmatpush1.bf16.msra.mxu1 %v7231_v18  ;;  %5119 = vmatprep.subr.bf16.mxu0 %v7236_v19  ;;  %v7314_v18 = vld [vmem:[#allocation8 + $0x904] ss:$16 sps:$4 sm:$0xff]   ;;  %v7317_v19 = vld [vmem:[#allocation8 + $0x90c] ss:$16 sps:$4 sm:$0xff]  }
 0x1ea   :  { %5611 = vmatprep.subr.bf16.mxu1 %v7239_v21  ;;  %v7312_v21 = vld [vmem:[#allocation8 + $0x900] ss:$16 sps:$4 sm:$0xff]  }
 0x1ec   :  { %5120 = vmatpush1.bf16.msra.mxu0 %v7234_v20  ;;  %v7315_v20 = vld [vmem:[#allocation8 + $0x908] ss:$16 sps:$4 sm:$0xff]  }
 0x1ed   :  { %5612 = vmatpush1.bf16.msra.mxu1 %v7237_v22  ;;  %5121 = vmatprep.subr.bf16.mxu0 %v7242_v23  ;;  %v7320_v22 = vld [vmem:[#allocation8 + $0x924] ss:$16 sps:$4 sm:$0xff]   ;;  %v7323_v23 = vld [vmem:[#allocation8 + $0x92c] ss:$16 sps:$4 sm:$0xff]  }
 0x1ee   :  { %5613 = vmatprep.subr.bf16.mxu1 %v7245_v27  ;;  %v7318_v27 = vld [vmem:[#allocation8 + $0x920] ss:$16 sps:$4 sm:$0xff]  }
 0x1f0   :  { %5122 = vmatpush1.bf16.msra.mxu0 %v7240_v24  ;;  %v7321_v24 = vld [vmem:[#allocation8 + $0x928] ss:$16 sps:$4 sm:$0xff]  }
 0x1f1   :  { %5614 = vmatpush1.bf16.msra.mxu1 %v7243_v25  ;;  %5123 = vmatprep.subr.bf16.mxu0 %v7248_v26  ;;  %v7326_v25 = vld [vmem:[#allocation8 + $0x944] ss:$16 sps:$4 sm:$0xff]   ;;  %v7329_v26 = vld [vmem:[#allocation8 + $0x94c] ss:$16 sps:$4 sm:$0xff]  }
 0x1f2   :  { %5615 = vmatprep.subr.bf16.mxu1 %v7251_v34  ;;  %v7324_v34 = vld [vmem:[#allocation8 + $0x940] ss:$16 sps:$4 sm:$0xff]  }
 0x1f4   :  { %5124 = vmatpush1.bf16.msra.mxu0 %v7246_v28  ;;  %v7327_v28 = vld [vmem:[#allocation8 + $0x948] ss:$16 sps:$4 sm:$0xff]  }
 0x1f5   :  { %5616 = vmatpush1.bf16.msra.mxu1 %v7249_v39  ;;  %5125 = vmatprep.subr.bf16.mxu0 %v7254_v29  ;;  %v7332_v39 = vld [vmem:[#allocation8 + $0x964] ss:$16 sps:$4 sm:$0xff]   ;;  %v7335_v29 = vld [vmem:[#allocation8 + $0x96c] ss:$16 sps:$4 sm:$0xff]  }
 0x1f6   :  { %5617 = vmatprep.subr.bf16.mxu1 %v7257_v30  ;;  %v7330_v30 = vld [vmem:[#allocation8 + $0x960] ss:$16 sps:$4 sm:$0xff]  }
 0x1f8   :  { %5126 = vmatpush1.bf16.msra.mxu0 %v7252_v31  ;;  %v7333_v31 = vld [vmem:[#allocation8 + $0x968] ss:$16 sps:$4 sm:$0xff]  }
 0x1f9   :  { %5618 = vmatpush1.bf16.msra.mxu1 %v7255_v32  ;;  %5127 = vmatprep.subr.bf16.mxu0 %v7260_v33  ;;  %v7338_v32 = vld [vmem:[#allocation8 + $0x984] ss:$16 sps:$4 sm:$0xff]   ;;  %v7341_v33 = vld [vmem:[#allocation8 + $0x98c] ss:$16 sps:$4 sm:$0xff]  }
 0x1fa   :  { %5619 = vmatprep.subr.bf16.mxu1 %v7263_v35  ;;  %v7336_v35 = vld [vmem:[#allocation8 + $0x980] ss:$16 sps:$4 sm:$0xff]  }
 0x1fc   :  { %5128 = vmatpush1.bf16.msra.mxu0 %v7258_v36  ;;  %v7339_v36 = vld [vmem:[#allocation8 + $0x988] ss:$16 sps:$4 sm:$0xff]  }
 0x1fd   :  { %5620 = vmatpush1.bf16.msra.mxu1 %v7261_v37  ;;  %5138 = vmatprep.subr.bf16.mxu0 %v7266_v41  ;;  %v7344_v37 = vld [vmem:[#allocation8 + $0x9a4] ss:$16 sps:$4 sm:$0xff]   ;;  %v7345_v41 = vld [vmem:[#allocation8 + $0x9a8] ss:$16 sps:$4 sm:$0xff]  }
 0x1fe   :  { %5630 = vmatprep.subr.bf16.mxu1 %v7269_v42  ;;  %v7350_v42 = vld [vmem:[#allocation8 + $0x9c4] ss:$16 sps:$4 sm:$0xff]  }
 0x1ff   :  { %5130 = vmatmul.mubr.bf16.vlgmr.msra.gmra.mrb[0].mxu0 %v326_v46 }
 0x200   :  { %5622 = vmatmul.mubr.bf16.vlgmr.msra.gmra.mrb[0].mxu1 %v326_v46  ;;  %5139 = vmatpush1.bf16.msra.mxu0 %v7264_v45  ;;  %v7351_v45 = vld [vmem:[#allocation8 + $0x9c8] ss:$16 sps:$4 sm:$0xff]   ;;  %v7356_v46 = vld [vmem:[#allocation8 + $0x9e4] ss:$16 sps:$4 sm:$0xff]  }
 0x201   :  { %5170 = vmatprep.mubr.bf16.mxu0 %v329_v49  ;;  %5631 = vmatpush1.bf16.msra.mxu1 %v7267_v47  ;;  %v7359_v47 = vld [vmem:[#allocation8 + $0x9ec] ss:$16 sps:$4 sm:$0xff]  }
 0x202   :  { %5662 = vmatprep.mubr.bf16.mxu1 %v329_v49  ;;  %5140 = vmatprep.subr.bf16.mxu0 %v7272_v48  ;;  %v7354_v48 = vld [vmem:[#allocation8 + $0x9e0] ss:$16 sps:$4 sm:$0xff]   ;;  %v7357_v49 = vld [vmem:[#allocation8 + $0x9e8] ss:$16 sps:$4 sm:$0xff]  }
 0x203   :  { %5632 = vmatprep.subr.bf16.mxu1 %v7275_v50  ;;  %v8049_v50 = vld [vmem:[#allocation4 + $0x40] sm:$0xff] }
 0x204   :  { %5141 = vmatpush1.bf16.msra.mxu0 %v7270_v52  ;;  %v304_v52 = vmul.f32 %v8049_v50, %v8357_v0  ;;  %v7443_v50 = vld [vmem:[#allocation8 + $0xbac] ss:$16 sps:$4 sm:$0xff]  }
 0x205   :  { %5633 = vmatpush1.bf16.msra.mxu1 %v7273_v53  ;;  %5142 = vmatprep.subr.bf16.mxu0 %v7278_v54  ;;  %v7362_v53 = vld [vmem:[#allocation8 + $0xa04] ss:$16 sps:$4 sm:$0xff]   ;;  %v7365_v54 = vld [vmem:[#allocation8 + $0xa0c] ss:$16 sps:$4 sm:$0xff]  }
 0x206   :  { %5634 = vmatprep.subr.bf16.mxu1 %v7281_v55  ;;  %v8050_v55 = vld [vmem:[#allocation4 + $0x58] sm:$0xff] }
 0x208   :  { %5143 = vmatpush1.bf16.msra.mxu0 %v7276_v56  ;;  %v307_v56 = vmul.f32 %v8050_v55, %v8357_v0  ;;  %v7449_v55 = vld [vmem:[#allocation8 + $0xbcc] ss:$16 sps:$4 sm:$0xff]  }
 0x209   :  { %5635 = vmatpush1.bf16.msra.mxu1 %v7279_v57  ;;  %5144 = vmatprep.subr.bf16.mxu0 %v7284_v58  ;;  %v7360_v57 = vld [vmem:[#allocation8 + $0xa00] ss:$16 sps:$4 sm:$0xff]   ;;  %v328_v58 = vpack.c.bf16 %v304_v52, %v304_v52 }
 0x20a   :  { %5636 = vmatprep.subr.bf16.mxu1 %v7287_v51  ;;  %v7363_v51 = vld [vmem:[#allocation8 + $0xa08] ss:$16 sps:$4 sm:$0xff]   ;;  %v7438_v52 = vld [vmem:[#allocation8 + $0xba0] ss:$16 sps:$4 sm:$0xff]  }
 0x20c   :  { %5145 = vmatpush1.bf16.msra.mxu0 %v7282_v59  ;;  %v7368_v59 = vld [vmem:[#allocation8 + $0xa24] ss:$16 sps:$4 sm:$0xff]  }
 0x20d   :  { %5637 = vmatpush1.bf16.msra.mxu1 %v7285_v60  ;;  %5146 = vmatprep.subr.bf16.mxu0 %v7290_v61  ;;  %v331_v60 = vpack.c.bf16 %v307_v56, %v307_v56  ;;  %v7371_v61 = vld [vmem:[#allocation8 + $0xa2c] ss:$16 sps:$4 sm:$0xff]   ;;  %v7444_v56 = vld [vmem:[#allocation8 + $0xbc0] ss:$16 sps:$4 sm:$0xff]  }
 0x20e   :  { %5638 = vmatprep.subr.bf16.mxu1 %v7293_v62  ;;  %v7366_v62 = vld [vmem:[#allocation8 + $0xa20] ss:$16 sps:$4 sm:$0xff]  }
 0x210   :  { %5147 = vmatpush1.bf16.msra.mxu0 %v7288_v63  ;;  %v7369_v63 = vld [vmem:[#allocation8 + $0xa28] ss:$16 sps:$4 sm:$0xff]  }
 0x211   :  { %5639 = vmatpush1.bf16.msra.mxu1 %v7291_v1  ;;  %5148 = vmatprep.subr.bf16.mxu0 %v7296_v2  ;;  %v7374_v1 = vld [vmem:[#allocation8 + $0xa44] ss:$16 sps:$4 sm:$0xff]   ;;  %v7377_v2 = vld [vmem:[#allocation8 + $0xa4c] ss:$16 sps:$4 sm:$0xff]  }
 0x212   :  { %5640 = vmatprep.subr.bf16.mxu1 %v7299_v5  ;;  %v7372_v5 = vld [vmem:[#allocation8 + $0xa40] ss:$16 sps:$4 sm:$0xff]  }
 0x214   :  { %5149 = vmatpush1.bf16.msra.mxu0 %v7294_v6  ;;  %v7375_v6 = vld [vmem:[#allocation8 + $0xa48] ss:$16 sps:$4 sm:$0xff]  }
 0x215   :  { %5641 = vmatpush1.bf16.msra.mxu1 %v7297_v8  ;;  %5150 = vmatprep.subr.bf16.mxu0 %v7302_v9  ;;  %v7380_v8 = vld [vmem:[#allocation8 + $0xa64] ss:$16 sps:$4 sm:$0xff]   ;;  %v7383_v9 = vld [vmem:[#allocation8 + $0xa6c] ss:$16 sps:$4 sm:$0xff]  }
 0x216   :  { %5642 = vmatprep.subr.bf16.mxu1 %v7305_v10  ;;  %v7378_v10 = vld [vmem:[#allocation8 + $0xa60] ss:$16 sps:$4 sm:$0xff]  }
 0x218   :  { %5151 = vmatpush1.bf16.msra.mxu0 %v7300_v11  ;;  %v7381_v11 = vld [vmem:[#allocation8 + $0xa68] ss:$16 sps:$4 sm:$0xff]  }
 0x219   :  { %5643 = vmatpush1.bf16.msra.mxu1 %v7303_v12  ;;  %5152 = vmatprep.subr.bf16.mxu0 %v7308_v13  ;;  %v7386_v12 = vld [vmem:[#allocation8 + $0xa84] ss:$16 sps:$4 sm:$0xff]   ;;  %v7389_v13 = vld [vmem:[#allocation8 + $0xa8c] ss:$16 sps:$4 sm:$0xff]  }
 0x21a   :  { %5644 = vmatprep.subr.bf16.mxu1 %v7311_v14  ;;  %v7384_v14 = vld [vmem:[#allocation8 + $0xa80] ss:$16 sps:$4 sm:$0xff]  }
 0x21c   :  { %5153 = vmatpush1.bf16.msra.mxu0 %v7306_v16  ;;  %v7387_v16 = vld [vmem:[#allocation8 + $0xa88] ss:$16 sps:$4 sm:$0xff]  }
 0x21d   :  { %5645 = vmatpush1.bf16.msra.mxu1 %v7309_v17  ;;  %5154 = vmatprep.subr.bf16.mxu0 %v7314_v18  ;;  %v7392_v17 = vld [vmem:[#allocation8 + $0xaa4] ss:$16 sps:$4 sm:$0xff]   ;;  %v7395_v18 = vld [vmem:[#allocation8 + $0xaac] ss:$16 sps:$4 sm:$0xff]  }
 0x21e   :  { %5646 = vmatprep.subr.bf16.mxu1 %v7317_v19  ;;  %v7390_v19 = vld [vmem:[#allocation8 + $0xaa0] ss:$16 sps:$4 sm:$0xff]  }
 0x220   :  { %5155 = vmatpush1.bf16.msra.mxu0 %v7312_v21  ;;  %v7393_v21 = vld [vmem:[#allocation8 + $0xaa8] ss:$16 sps:$4 sm:$0xff]  }
 0x221   :  { %5647 = vmatpush1.bf16.msra.mxu1 %v7315_v20  ;;  %5156 = vmatprep.subr.bf16.mxu0 %v7320_v22  ;;  %v7398_v20 = vld [vmem:[#allocation8 + $0xac4] ss:$16 sps:$4 sm:$0xff]   ;;  %v7401_v22 = vld [vmem:[#allocation8 + $0xacc] ss:$16 sps:$4 sm:$0xff]  }
 0x222   :  { %5648 = vmatprep.subr.bf16.mxu1 %v7323_v23  ;;  %v7396_v23 = vld [vmem:[#allocation8 + $0xac0] ss:$16 sps:$4 sm:$0xff]  }
 0x224   :  { %5157 = vmatpush1.bf16.msra.mxu0 %v7318_v27  ;;  %v7399_v27 = vld [vmem:[#allocation8 + $0xac8] ss:$16 sps:$4 sm:$0xff]  }
 0x225   :  { %5649 = vmatpush1.bf16.msra.mxu1 %v7321_v24  ;;  %5158 = vmatprep.subr.bf16.mxu0 %v7326_v25  ;;  %v7404_v24 = vld [vmem:[#allocation8 + $0xae4] ss:$16 sps:$4 sm:$0xff]   ;;  %v7407_v25 = vld [vmem:[#allocation8 + $0xaec] ss:$16 sps:$4 sm:$0xff]  }
 0x226   :  { %5650 = vmatprep.subr.bf16.mxu1 %v7329_v26  ;;  %v7402_v26 = vld [vmem:[#allocation8 + $0xae0] ss:$16 sps:$4 sm:$0xff]  }
 0x228   :  { %5159 = vmatpush1.bf16.msra.mxu0 %v7324_v34  ;;  %v7405_v34 = vld [vmem:[#allocation8 + $0xae8] ss:$16 sps:$4 sm:$0xff]  }
 0x229   :  { %5651 = vmatpush1.bf16.msra.mxu1 %v7327_v28  ;;  %5160 = vmatprep.subr.bf16.mxu0 %v7332_v39  ;;  %v7410_v28 = vld [vmem:[#allocation8 + $0xb04] ss:$16 sps:$4 sm:$0xff]   ;;  %v7413_v39 = vld [vmem:[#allocation8 + $0xb0c] ss:$16 sps:$4 sm:$0xff]  }
 0x22a   :  { %5652 = vmatprep.subr.bf16.mxu1 %v7335_v29  ;;  %v7408_v29 = vld [vmem:[#allocation8 + $0xb00] ss:$16 sps:$4 sm:$0xff]  }
 0x22c   :  { %5161 = vmatpush1.bf16.msra.mxu0 %v7330_v30  ;;  %v7411_v30 = vld [vmem:[#allocation8 + $0xb08] ss:$16 sps:$4 sm:$0xff]  }
 0x22d   :  { %5653 = vmatpush1.bf16.msra.mxu1 %v7333_v31  ;;  %5162 = vmatprep.subr.bf16.mxu0 %v7338_v32  ;;  %v7416_v31 = vld [vmem:[#allocation8 + $0xb24] ss:$16 sps:$4 sm:$0xff]   ;;  %v7419_v32 = vld [vmem:[#allocation8 + $0xb2c] ss:$16 sps:$4 sm:$0xff]  }
 0x22e   :  { %5654 = vmatprep.subr.bf16.mxu1 %v7341_v33  ;;  %v7414_v33 = vld [vmem:[#allocation8 + $0xb20] ss:$16 sps:$4 sm:$0xff]  }
 0x230   :  { %5163 = vmatpush1.bf16.msra.mxu0 %v7336_v35  ;;  %v7417_v35 = vld [vmem:[#allocation8 + $0xb28] ss:$16 sps:$4 sm:$0xff]  }
 0x231   :  { %5655 = vmatpush1.bf16.msra.mxu1 %v7339_v36  ;;  %5164 = vmatprep.subr.bf16.mxu0 %v7344_v37  ;;  %v7422_v36 = vld [vmem:[#allocation8 + $0xb44] ss:$16 sps:$4 sm:$0xff]   ;;  %v7425_v37 = vld [vmem:[#allocation8 + $0xb4c] ss:$16 sps:$4 sm:$0xff]  }
 0x232   :  { %5656 = vmatprep.subr.bf16.mxu1 %v7347_v38  ;;  %v7420_v38 = vld [vmem:[#allocation8 + $0xb40] ss:$16 sps:$4 sm:$0xff]  }
 0x234   :  { %5165 = vmatpush1.bf16.msra.mxu0 %v7342_v40  ;;  %v7423_v40 = vld [vmem:[#allocation8 + $0xb48] ss:$16 sps:$4 sm:$0xff]  }
 0x235   :  { %5657 = vmatpush1.bf16.msra.mxu1 %v7345_v41  ;;  %5166 = vmatprep.subr.bf16.mxu0 %v7350_v42  ;;  %v7428_v41 = vld [vmem:[#allocation8 + $0xb64] ss:$16 sps:$4 sm:$0xff]   ;;  %v7431_v42 = vld [vmem:[#allocation8 + $0xb6c] ss:$16 sps:$4 sm:$0xff]  }
 0x236   :  { %5658 = vmatprep.subr.bf16.mxu1 %v7353_v43  ;;  %v7426_v43 = vld [vmem:[#allocation8 + $0xb60] ss:$16 sps:$4 sm:$0xff]  }
 0x238   :  { %5167 = vmatpush1.bf16.msra.mxu0 %v7348_v44  ;;  %v7429_v44 = vld [vmem:[#allocation8 + $0xb68] ss:$16 sps:$4 sm:$0xff]  }
 0x239   :  { %5659 = vmatpush1.bf16.msra.mxu1 %v7351_v45  ;;  %5168 = vmatprep.subr.bf16.mxu0 %v7356_v46  ;;  %v7434_v45 = vld [vmem:[#allocation8 + $0xb84] ss:$16 sps:$4 sm:$0xff]   ;;  %v7437_v46 = vld [vmem:[#allocation8 + $0xb8c] ss:$16 sps:$4 sm:$0xff]  }
 0x23a   :  { %5660 = vmatprep.subr.bf16.mxu1 %v7359_v47  ;;  %v7432_v47 = vld [vmem:[#allocation8 + $0xb80] ss:$16 sps:$4 sm:$0xff]  }
 0x23c   :  { %5169 = vmatpush1.bf16.msra.mxu0 %v7354_v48  ;;  %v7435_v48 = vld [vmem:[#allocation8 + $0xb88] ss:$16 sps:$4 sm:$0xff]  }
 0x23d   :  { %5661 = vmatpush1.bf16.msra.mxu1 %v7357_v49  ;;  %5179 = vmatprep.subr.bf16.mxu0 %v7362_v53  ;;  %v7440_v49 = vld [vmem:[#allocation8 + $0xba4] ss:$16 sps:$4 sm:$0xff]   ;;  %v7441_v53 = vld [vmem:[#allocation8 + $0xba8] ss:$16 sps:$4 sm:$0xff]  }
 0x23e   :  { %5671 = vmatprep.subr.bf16.mxu1 %v7365_v54  ;;  %v7446_v54 = vld [vmem:[#allocation8 + $0xbc4] ss:$16 sps:$4 sm:$0xff]  }
 0x23f   :  { %5171 = vmatmul.mubr.bf16.vlgmr.msra.gmra.mrb[0].mxu0 %v328_v58 }
 0x240   :  { %5663 = vmatmul.mubr.bf16.vlgmr.msra.gmra.mrb[0].mxu1 %v328_v58  ;;  %5180 = vmatpush1.bf16.msra.mxu0 %v7360_v57  ;;  %v7447_v57 = vld [vmem:[#allocation8 + $0xbc8] ss:$16 sps:$4 sm:$0xff]   ;;  %v7452_v58 = vld [vmem:[#allocation8 + $0xbe4] ss:$16 sps:$4 sm:$0xff]  }
 0x241   :  { %5211 = vmatprep.mubr.bf16.mxu0 %v331_v60  ;;  %5672 = vmatpush1.bf16.msra.mxu1 %v7363_v51  ;;  %v7455_v51 = vld [vmem:[#allocation8 + $0xbec] ss:$16 sps:$4 sm:$0xff]  }
 0x242   :  { %5703 = vmatprep.mubr.bf16.mxu1 %v331_v60  ;;  %5181 = vmatprep.subr.bf16.mxu0 %v7368_v59  ;;  %v7450_v59 = vld [vmem:[#allocation8 + $0xbe0] ss:$16 sps:$4 sm:$0xff]   ;;  %v7453_v60 = vld [vmem:[#allocation8 + $0xbe8] ss:$16 sps:$4 sm:$0xff]  }
 0x243   :  { %5673 = vmatprep.subr.bf16.mxu1 %v7371_v61  ;;  %v8051_v61 = vld [vmem:[#allocation4 + $0x50] sm:$0xff] }
 0x244   :  { %5182 = vmatpush1.bf16.msra.mxu0 %v7366_v62  ;;  %v306_v62 = vmul.f32 %v8051_v61, %v8357_v0  ;;  %v7539_v61 = vld [vmem:[#allocation8 + $0xdac] ss:$16 sps:$4 sm:$0xff]  }
 0x245   :  { %5674 = vmatpush1.bf16.msra.mxu1 %v7369_v63  ;;  %5183 = vmatprep.subr.bf16.mxu0 %v7374_v1  ;;  %v7458_v63 = vld [vmem:[#allocation8 + $0xc04] ss:$16 sps:$4 sm:$0xff]   ;;  %v7461_v1 = vld [vmem:[#allocation8 + $0xc0c] ss:$16 sps:$4 sm:$0xff]  }
 0x246   :  { %5675 = vmatprep.subr.bf16.mxu1 %v7377_v2  ;;  %v8052_v2 = vld [vmem:[#allocation4 + $0x68] sm:$0xff] }
 0x248   :  { %5184 = vmatpush1.bf16.msra.mxu0 %v7372_v5  ;;  %v309_v5 = vmul.f32 %v8052_v2, %v8357_v0  ;;  %v7545_v2 = vld [vmem:[#allocation8 + $0xdcc] ss:$16 sps:$4 sm:$0xff]  }
 0x249   :  { %5676 = vmatpush1.bf16.msra.mxu1 %v7375_v6  ;;  %5185 = vmatprep.subr.bf16.mxu0 %v7380_v8  ;;  %v7456_v6 = vld [vmem:[#allocation8 + $0xc00] ss:$16 sps:$4 sm:$0xff]   ;;  %v330_v8 = vpack.c.bf16 %v306_v62, %v306_v62 }
 0x24a   :  { %5677 = vmatprep.subr.bf16.mxu1 %v7383_v9  ;;  %v7459_v9 = vld [vmem:[#allocation8 + $0xc08] ss:$16 sps:$4 sm:$0xff]   ;;  %v7534_v62 = vld [vmem:[#allocation8 + $0xda0] ss:$16 sps:$4 sm:$0xff]  }
 0x24c   :  { %5186 = vmatpush1.bf16.msra.mxu0 %v7378_v10  ;;  %v7464_v10 = vld [vmem:[#allocation8 + $0xc24] ss:$16 sps:$4 sm:$0xff]  }
 0x24d   :  { %5678 = vmatpush1.bf16.msra.mxu1 %v7381_v11  ;;  %5187 = vmatprep.subr.bf16.mxu0 %v7386_v12  ;;  %v333_v11 = vpack.c.bf16 %v309_v5, %v309_v5  ;;  %v7467_v12 = vld [vmem:[#allocation8 + $0xc2c] ss:$16 sps:$4 sm:$0xff]   ;;  %v7540_v5 = vld [vmem:[#allocation8 + $0xdc0] ss:$16 sps:$4 sm:$0xff]  }
 0x24e   :  { %5679 = vmatprep.subr.bf16.mxu1 %v7389_v13  ;;  %v7462_v13 = vld [vmem:[#allocation8 + $0xc20] ss:$16 sps:$4 sm:$0xff]  }
 0x250   :  { %5188 = vmatpush1.bf16.msra.mxu0 %v7384_v14  ;;  %v7465_v14 = vld [vmem:[#allocation8 + $0xc28] ss:$16 sps:$4 sm:$0xff]  }
 0x251   :  { %5680 = vmatpush1.bf16.msra.mxu1 %v7387_v16  ;;  %5189 = vmatprep.subr.bf16.mxu0 %v7392_v17  ;;  %v7470_v16 = vld [vmem:[#allocation8 + $0xc44] ss:$16 sps:$4 sm:$0xff]   ;;  %v7473_v17 = vld [vmem:[#allocation8 + $0xc4c] ss:$16 sps:$4 sm:$0xff]  }
 0x252   :  { %5681 = vmatprep.subr.bf16.mxu1 %v7395_v18  ;;  %v7468_v18 = vld [vmem:[#allocation8 + $0xc40] ss:$16 sps:$4 sm:$0xff]  }
 0x254   :  { %5190 = vmatpush1.bf16.msra.mxu0 %v7390_v19  ;;  %v7471_v19 = vld [vmem:[#allocation8 + $0xc48] ss:$16 sps:$4 sm:$0xff]  }
 0x255   :  { %5682 = vmatpush1.bf16.msra.mxu1 %v7393_v21  ;;  %5191 = vmatprep.subr.bf16.mxu0 %v7398_v20  ;;  %v7476_v21 = vld [vmem:[#allocation8 + $0xc64] ss:$16 sps:$4 sm:$0xff]   ;;  %v7479_v20 = vld [vmem:[#allocation8 + $0xc6c] ss:$16 sps:$4 sm:$0xff]  }
 0x256   :  { %5683 = vmatprep.subr.bf16.mxu1 %v7401_v22  ;;  %v7474_v22 = vld [vmem:[#allocation8 + $0xc60] ss:$16 sps:$4 sm:$0xff]  }
 0x258   :  { %5192 = vmatpush1.bf16.msra.mxu0 %v7396_v23  ;;  %v7477_v23 = vld [vmem:[#allocation8 + $0xc68] ss:$16 sps:$4 sm:$0xff]  }
 0x259   :  { %5684 = vmatpush1.bf16.msra.mxu1 %v7399_v27  ;;  %5193 = vmatprep.subr.bf16.mxu0 %v7404_v24  ;;  %v7482_v27 = vld [vmem:[#allocation8 + $0xc84] ss:$16 sps:$4 sm:$0xff]   ;;  %v7485_v24 = vld [vmem:[#allocation8 + $0xc8c] ss:$16 sps:$4 sm:$0xff]  }
 0x25a   :  { %5685 = vmatprep.subr.bf16.mxu1 %v7407_v25  ;;  %v7480_v25 = vld [vmem:[#allocation8 + $0xc80] ss:$16 sps:$4 sm:$0xff]  }
 0x25c   :  { %5194 = vmatpush1.bf16.msra.mxu0 %v7402_v26  ;;  %v7483_v26 = vld [vmem:[#allocation8 + $0xc88] ss:$16 sps:$4 sm:$0xff]  }
 0x25d   :  { %5686 = vmatpush1.bf16.msra.mxu1 %v7405_v34  ;;  %5195 = vmatprep.subr.bf16.mxu0 %v7410_v28  ;;  %v7488_v34 = vld [vmem:[#allocation8 + $0xca4] ss:$16 sps:$4 sm:$0xff]   ;;  %v7491_v28 = vld [vmem:[#allocation8 + $0xcac] ss:$16 sps:$4 sm:$0xff]  }
 0x25e   :  { %5687 = vmatprep.subr.bf16.mxu1 %v7413_v39  ;;  %v7486_v39 = vld [vmem:[#allocation8 + $0xca0] ss:$16 sps:$4 sm:$0xff]  }
 0x260   :  { %5196 = vmatpush1.bf16.msra.mxu0 %v7408_v29  ;;  %v7489_v29 = vld [vmem:[#allocation8 + $0xca8] ss:$16 sps:$4 sm:$0xff]  }
 0x261   :  { %5688 = vmatpush1.bf16.msra.mxu1 %v7411_v30  ;;  %5197 = vmatprep.subr.bf16.mxu0 %v7416_v31  ;;  %v7494_v30 = vld [vmem:[#allocation8 + $0xcc4] ss:$16 sps:$4 sm:$0xff]   ;;  %v7497_v31 = vld [vmem:[#allocation8 + $0xccc] ss:$16 sps:$4 sm:$0xff]  }
 0x262   :  { %5689 = vmatprep.subr.bf16.mxu1 %v7419_v32  ;;  %v7492_v32 = vld [vmem:[#allocation8 + $0xcc0] ss:$16 sps:$4 sm:$0xff]  }
 0x264   :  { %5198 = vmatpush1.bf16.msra.mxu0 %v7414_v33  ;;  %v7495_v33 = vld [vmem:[#allocation8 + $0xcc8] ss:$16 sps:$4 sm:$0xff]  }
 0x265   :  { %5690 = vmatpush1.bf16.msra.mxu1 %v7417_v35  ;;  %5199 = vmatprep.subr.bf16.mxu0 %v7422_v36  ;;  %v7500_v35 = vld [vmem:[#allocation8 + $0xce4] ss:$16 sps:$4 sm:$0xff]   ;;  %v7503_v36 = vld [vmem:[#allocation8 + $0xcec] ss:$16 sps:$4 sm:$0xff]  }
 0x266   :  { %5691 = vmatprep.subr.bf16.mxu1 %v7425_v37  ;;  %v7498_v37 = vld [vmem:[#allocation8 + $0xce0] ss:$16 sps:$4 sm:$0xff]  }
 0x268   :  { %5200 = vmatpush1.bf16.msra.mxu0 %v7420_v38  ;;  %v7501_v38 = vld [vmem:[#allocation8 + $0xce8] ss:$16 sps:$4 sm:$0xff]  }
 0x269   :  { %5692 = vmatpush1.bf16.msra.mxu1 %v7423_v40  ;;  %5201 = vmatprep.subr.bf16.mxu0 %v7428_v41  ;;  %v7506_v40 = vld [vmem:[#allocation8 + $0xd04] ss:$16 sps:$4 sm:$0xff]   ;;  %v7509_v41 = vld [vmem:[#allocation8 + $0xd0c] ss:$16 sps:$4 sm:$0xff]  }
 0x26a   :  { %5693 = vmatprep.subr.bf16.mxu1 %v7431_v42  ;;  %v7504_v42 = vld [vmem:[#allocation8 + $0xd00] ss:$16 sps:$4 sm:$0xff]  }
 0x26c   :  { %5202 = vmatpush1.bf16.msra.mxu0 %v7426_v43  ;;  %v7507_v43 = vld [vmem:[#allocation8 + $0xd08] ss:$16 sps:$4 sm:$0xff]  }
 0x26d   :  { %5694 = vmatpush1.bf16.msra.mxu1 %v7429_v44  ;;  %5203 = vmatprep.subr.bf16.mxu0 %v7434_v45  ;;  %v7512_v44 = vld [vmem:[#allocation8 + $0xd24] ss:$16 sps:$4 sm:$0xff]   ;;  %v7515_v45 = vld [vmem:[#allocation8 + $0xd2c] ss:$16 sps:$4 sm:$0xff]  }
 0x26e   :  { %5695 = vmatprep.subr.bf16.mxu1 %v7437_v46  ;;  %v7510_v46 = vld [vmem:[#allocation8 + $0xd20] ss:$16 sps:$4 sm:$0xff]  }
 0x270   :  { %5204 = vmatpush1.bf16.msra.mxu0 %v7432_v47  ;;  %v7513_v47 = vld [vmem:[#allocation8 + $0xd28] ss:$16 sps:$4 sm:$0xff]  }
 0x271   :  { %5696 = vmatpush1.bf16.msra.mxu1 %v7435_v48  ;;  %5205 = vmatprep.subr.bf16.mxu0 %v7440_v49  ;;  %v7518_v48 = vld [vmem:[#allocation8 + $0xd44] ss:$16 sps:$4 sm:$0xff]   ;;  %v7521_v49 = vld [vmem:[#allocation8 + $0xd4c] ss:$16 sps:$4 sm:$0xff]  }
 0x272   :  { %5697 = vmatprep.subr.bf16.mxu1 %v7443_v50  ;;  %v7516_v50 = vld [vmem:[#allocation8 + $0xd40] ss:$16 sps:$4 sm:$0xff]  }
 0x274   :  { %5206 = vmatpush1.bf16.msra.mxu0 %v7438_v52  ;;  %v7519_v52 = vld [vmem:[#allocation8 + $0xd48] ss:$16 sps:$4 sm:$0xff]  }
 0x275   :  { %5698 = vmatpush1.bf16.msra.mxu1 %v7441_v53  ;;  %5207 = vmatprep.subr.bf16.mxu0 %v7446_v54  ;;  %v7524_v53 = vld [vmem:[#allocation8 + $0xd64] ss:$16 sps:$4 sm:$0xff]   ;;  %v7527_v54 = vld [vmem:[#allocation8 + $0xd6c] ss:$16 sps:$4 sm:$0xff]  }
 0x276   :  { %5699 = vmatprep.subr.bf16.mxu1 %v7449_v55  ;;  %v7522_v55 = vld [vmem:[#allocation8 + $0xd60] ss:$16 sps:$4 sm:$0xff]  }
 0x278   :  { %5208 = vmatpush1.bf16.msra.mxu0 %v7444_v56  ;;  %v7525_v56 = vld [vmem:[#allocation8 + $0xd68] ss:$16 sps:$4 sm:$0xff]  }
 0x279   :  { %5700 = vmatpush1.bf16.msra.mxu1 %v7447_v57  ;;  %5209 = vmatprep.subr.bf16.mxu0 %v7452_v58  ;;  %v7530_v57 = vld [vmem:[#allocation8 + $0xd84] ss:$16 sps:$4 sm:$0xff]   ;;  %v7533_v58 = vld [vmem:[#allocation8 + $0xd8c] ss:$16 sps:$4 sm:$0xff]  }
 0x27a   :  { %5701 = vmatprep.subr.bf16.mxu1 %v7455_v51  ;;  %v7528_v51 = vld [vmem:[#allocation8 + $0xd80] ss:$16 sps:$4 sm:$0xff]  }
 0x27c   :  { %5210 = vmatpush1.bf16.msra.mxu0 %v7450_v59  ;;  %v7531_v59 = vld [vmem:[#allocation8 + $0xd88] ss:$16 sps:$4 sm:$0xff]  }
 0x27d   :  { %5702 = vmatpush1.bf16.msra.mxu1 %v7453_v60  ;;  %5220 = vmatprep.subr.bf16.mxu0 %v7458_v63  ;;  %v7536_v60 = vld [vmem:[#allocation8 + $0xda4] ss:$16 sps:$4 sm:$0xff]   ;;  %v7537_v63 = vld [vmem:[#allocation8 + $0xda8] ss:$16 sps:$4 sm:$0xff]  }
 0x27e   :  { %5712 = vmatprep.subr.bf16.mxu1 %v7461_v1  ;;  %v7542_v1 = vld [vmem:[#allocation8 + $0xdc4] ss:$16 sps:$4 sm:$0xff]  }
 0x27f   :  { %5212 = vmatmul.mubr.bf16.vlgmr.msra.gmra.mrb[0].mxu0 %v330_v8 }
 0x280   :  { %5704 = vmatmul.mubr.bf16.vlgmr.msra.gmra.mrb[0].mxu1 %v330_v8  ;;  %5221 = vmatpush1.bf16.msra.mxu0 %v7456_v6  ;;  %v7543_v6 = vld [vmem:[#allocation8 + $0xdc8] ss:$16 sps:$4 sm:$0xff]   ;;  %v7548_v8 = vld [vmem:[#allocation8 + $0xde4] ss:$16 sps:$4 sm:$0xff]  }
 0x281   :  { %5252 = vmatprep.mubr.bf16.mxu0 %v333_v11  ;;  %5713 = vmatpush1.bf16.msra.mxu1 %v7459_v9  ;;  %v7551_v9 = vld [vmem:[#allocation8 + $0xdec] ss:$16 sps:$4 sm:$0xff]  }
 0x282   :  { %5744 = vmatprep.mubr.bf16.mxu1 %v333_v11  ;;  %5222 = vmatprep.subr.bf16.mxu0 %v7464_v10  ;;  %v7546_v10 = vld [vmem:[#allocation8 + $0xde0] ss:$16 sps:$4 sm:$0xff]   ;;  %v7549_v11 = vld [vmem:[#allocation8 + $0xde8] ss:$16 sps:$4 sm:$0xff]  }
 0x283   :  { %5714 = vmatprep.subr.bf16.mxu1 %v7467_v12  ;;  %v8053_v12 = vld [vmem:[#allocation4 + $0x60] sm:$0xff] }
 0x284   :  { %5223 = vmatpush1.bf16.msra.mxu0 %v7462_v13  ;;  %v308_v13 = vmul.f32 %v8053_v12, %v8357_v0  ;;  %v7635_v12 = vld [vmem:[#allocation8 + $0xfac] ss:$16 sps:$4 sm:$0xff]  }
 0x285   :  { %5715 = vmatpush1.bf16.msra.mxu1 %v7465_v14  ;;  %5224 = vmatprep.subr.bf16.mxu0 %v7470_v16  ;;  %v7554_v14 = vld [vmem:[#allocation8 + $0xe04] ss:$16 sps:$4 sm:$0xff]   ;;  %v7557_v16 = vld [vmem:[#allocation8 + $0xe0c] ss:$16 sps:$4 sm:$0xff]  }
 0x286   :  { %5716 = vmatprep.subr.bf16.mxu1 %v7473_v17  ;;  %v8054_v17 = vld [vmem:[#allocation4 + $0x78] sm:$0xff] }
 0x288   :  { %5225 = vmatpush1.bf16.msra.mxu0 %v7468_v18  ;;  %v311_v18 = vmul.f32 %v8054_v17, %v8357_v0  ;;  %v7641_v17 = vld [vmem:[#allocation8 + $0xfcc] ss:$16 sps:$4 sm:$0xff]  }
 0x289   :  { %5717 = vmatpush1.bf16.msra.mxu1 %v7471_v19  ;;  %5226 = vmatprep.subr.bf16.mxu0 %v7476_v21  ;;  %v7552_v19 = vld [vmem:[#allocation8 + $0xe00] ss:$16 sps:$4 sm:$0xff]   ;;  %v332_v21 = vpack.c.bf16 %v308_v13, %v308_v13 }
 0x28a   :  { %5718 = vmatprep.subr.bf16.mxu1 %v7479_v20  ;;  %v7555_v20 = vld [vmem:[#allocation8 + $0xe08] ss:$16 sps:$4 sm:$0xff]   ;;  %v7630_v13 = vld [vmem:[#allocation8 + $0xfa0] ss:$16 sps:$4 sm:$0xff]  }
 0x28c   :  { %5227 = vmatpush1.bf16.msra.mxu0 %v7474_v22  ;;  %v7560_v22 = vld [vmem:[#allocation8 + $0xe24] ss:$16 sps:$4 sm:$0xff]  }
 0x28d   :  { %5719 = vmatpush1.bf16.msra.mxu1 %v7477_v23  ;;  %5228 = vmatprep.subr.bf16.mxu0 %v7482_v27  ;;  %v335_v23 = vpack.c.bf16 %v311_v18, %v311_v18  ;;  %v7563_v27 = vld [vmem:[#allocation8 + $0xe2c] ss:$16 sps:$4 sm:$0xff]   ;;  %v7636_v18 = vld [vmem:[#allocation8 + $0xfc0] ss:$16 sps:$4 sm:$0xff]  }
 0x28e   :  { %5720 = vmatprep.subr.bf16.mxu1 %v7485_v24  ;;  %v7558_v24 = vld [vmem:[#allocation8 + $0xe20] ss:$16 sps:$4 sm:$0xff]  }
 0x290   :  { %5229 = vmatpush1.bf16.msra.mxu0 %v7480_v25  ;;  %v7561_v25 = vld [vmem:[#allocation8 + $0xe28] ss:$16 sps:$4 sm:$0xff]  }
 0x291   :  { %5721 = vmatpush1.bf16.msra.mxu1 %v7483_v26  ;;  %5230 = vmatprep.subr.bf16.mxu0 %v7488_v34  ;;  %v7566_v26 = vld [vmem:[#allocation8 + $0xe44] ss:$16 sps:$4 sm:$0xff]   ;;  %v7569_v34 = vld [vmem:[#allocation8 + $0xe4c] ss:$16 sps:$4 sm:$0xff]  }
 0x292   :  { %5722 = vmatprep.subr.bf16.mxu1 %v7491_v28  ;;  %v7564_v28 = vld [vmem:[#allocation8 + $0xe40] ss:$16 sps:$4 sm:$0xff]  }
 0x294   :  { %5231 = vmatpush1.bf16.msra.mxu0 %v7486_v39  ;;  %v7567_v39 = vld [vmem:[#allocation8 + $0xe48] ss:$16 sps:$4 sm:$0xff]  }
 0x295   :  { %5723 = vmatpush1.bf16.msra.mxu1 %v7489_v29  ;;  %5232 = vmatprep.subr.bf16.mxu0 %v7494_v30  ;;  %v7572_v29 = vld [vmem:[#allocation8 + $0xe64] ss:$16 sps:$4 sm:$0xff]   ;;  %v7575_v30 = vld [vmem:[#allocation8 + $0xe6c] ss:$16 sps:$4 sm:$0xff]  }
 0x296   :  { %5724 = vmatprep.subr.bf16.mxu1 %v7497_v31  ;;  %v7570_v31 = vld [vmem:[#allocation8 + $0xe60] ss:$16 sps:$4 sm:$0xff]  }
 0x298   :  { %5233 = vmatpush1.bf16.msra.mxu0 %v7492_v32  ;;  %v7573_v32 = vld [vmem:[#allocation8 + $0xe68] ss:$16 sps:$4 sm:$0xff]  }
 0x299   :  { %5725 = vmatpush1.bf16.msra.mxu1 %v7495_v33  ;;  %5234 = vmatprep.subr.bf16.mxu0 %v7500_v35  ;;  %v7578_v33 = vld [vmem:[#allocation8 + $0xe84] ss:$16 sps:$4 sm:$0xff]   ;;  %v7581_v35 = vld [vmem:[#allocation8 + $0xe8c] ss:$16 sps:$4 sm:$0xff]  }
 0x29a   :  { %5726 = vmatprep.subr.bf16.mxu1 %v7503_v36  ;;  %v7576_v36 = vld [vmem:[#allocation8 + $0xe80] ss:$16 sps:$4 sm:$0xff]  }
 0x29c   :  { %5235 = vmatpush1.bf16.msra.mxu0 %v7498_v37  ;;  %v7579_v37 = vld [vmem:[#allocation8 + $0xe88] ss:$16 sps:$4 sm:$0xff]  }
 0x29d   :  { %5727 = vmatpush1.bf16.msra.mxu1 %v7501_v38  ;;  %5236 = vmatprep.subr.bf16.mxu0 %v7506_v40  ;;  %v7584_v38 = vld [vmem:[#allocation8 + $0xea4] ss:$16 sps:$4 sm:$0xff]   ;;  %v7587_v40 = vld [vmem:[#allocation8 + $0xeac] ss:$16 sps:$4 sm:$0xff]  }
 0x29e   :  { %5728 = vmatprep.subr.bf16.mxu1 %v7509_v41  ;;  %v7582_v41 = vld [vmem:[#allocation8 + $0xea0] ss:$16 sps:$4 sm:$0xff]  }
 0x2a0   :  { %5237 = vmatpush1.bf16.msra.mxu0 %v7504_v42  ;;  %v7585_v42 = vld [vmem:[#allocation8 + $0xea8] ss:$16 sps:$4 sm:$0xff]  }
 0x2a1   :  { %5729 = vmatpush1.bf16.msra.mxu1 %v7507_v43  ;;  %5238 = vmatprep.subr.bf16.mxu0 %v7512_v44  ;;  %v7590_v43 = vld [vmem:[#allocation8 + $0xec4] ss:$16 sps:$4 sm:$0xff]   ;;  %v7593_v44 = vld [vmem:[#allocation8 + $0xecc] ss:$16 sps:$4 sm:$0xff]  }
 0x2a2   :  { %5730 = vmatprep.subr.bf16.mxu1 %v7515_v45  ;;  %v7588_v45 = vld [vmem:[#allocation8 + $0xec0] ss:$16 sps:$4 sm:$0xff]  }
 0x2a4   :  { %5239 = vmatpush1.bf16.msra.mxu0 %v7510_v46  ;;  %v7591_v46 = vld [vmem:[#allocation8 + $0xec8] ss:$16 sps:$4 sm:$0xff]  }
 0x2a5   :  { %5731 = vmatpush1.bf16.msra.mxu1 %v7513_v47  ;;  %5240 = vmatprep.subr.bf16.mxu0 %v7518_v48  ;;  %v7596_v47 = vld [vmem:[#allocation8 + $0xee4] ss:$16 sps:$4 sm:$0xff]   ;;  %v7599_v48 = vld [vmem:[#allocation8 + $0xeec] ss:$16 sps:$4 sm:$0xff]  }
 0x2a6   :  { %5732 = vmatprep.subr.bf16.mxu1 %v7521_v49  ;;  %v7594_v49 = vld [vmem:[#allocation8 + $0xee0] ss:$16 sps:$4 sm:$0xff]  }
 0x2a8   :  { %5241 = vmatpush1.bf16.msra.mxu0 %v7516_v50  ;;  %v7597_v50 = vld [vmem:[#allocation8 + $0xee8] ss:$16 sps:$4 sm:$0xff]  }
 0x2a9   :  { %5733 = vmatpush1.bf16.msra.mxu1 %v7519_v52  ;;  %5242 = vmatprep.subr.bf16.mxu0 %v7524_v53  ;;  %v7602_v52 = vld [vmem:[#allocation8 + $0xf04] ss:$16 sps:$4 sm:$0xff]   ;;  %v7605_v53 = vld [vmem:[#allocation8 + $0xf0c] ss:$16 sps:$4 sm:$0xff]  }
 0x2aa   :  { %5734 = vmatprep.subr.bf16.mxu1 %v7527_v54  ;;  %v7600_v54 = vld [vmem:[#allocation8 + $0xf00] ss:$16 sps:$4 sm:$0xff]  }
 0x2ac   :  { %5243 = vmatpush1.bf16.msra.mxu0 %v7522_v55  ;;  %v7603_v55 = vld [vmem:[#allocation8 + $0xf08] ss:$16 sps:$4 sm:$0xff]  }
 0x2ad   :  { %5735 = vmatpush1.bf16.msra.mxu1 %v7525_v56  ;;  %5244 = vmatprep.subr.bf16.mxu0 %v7530_v57  ;;  %v7608_v56 = vld [vmem:[#allocation8 + $0xf24] ss:$16 sps:$4 sm:$0xff]   ;;  %v7611_v57 = vld [vmem:[#allocation8 + $0xf2c] ss:$16 sps:$4 sm:$0xff]  }
 0x2ae   :  { %5736 = vmatprep.subr.bf16.mxu1 %v7533_v58  ;;  %v7606_v58 = vld [vmem:[#allocation8 + $0xf20] ss:$16 sps:$4 sm:$0xff]  }
 0x2b0   :  { %5245 = vmatpush1.bf16.msra.mxu0 %v7528_v51  ;;  %v7609_v51 = vld [vmem:[#allocation8 + $0xf28] ss:$16 sps:$4 sm:$0xff]  }
 0x2b1   :  { %5737 = vmatpush1.bf16.msra.mxu1 %v7531_v59  ;;  %5246 = vmatprep.subr.bf16.mxu0 %v7536_v60  ;;  %v7614_v59 = vld [vmem:[#allocation8 + $0xf44] ss:$16 sps:$4 sm:$0xff]   ;;  %v7617_v60 = vld [vmem:[#allocation8 + $0xf4c] ss:$16 sps:$4 sm:$0xff]  }
 0x2b2   :  { %5738 = vmatprep.subr.bf16.mxu1 %v7539_v61  ;;  %v7612_v61 = vld [vmem:[#allocation8 + $0xf40] ss:$16 sps:$4 sm:$0xff]  }
 0x2b4   :  { %5247 = vmatpush1.bf16.msra.mxu0 %v7534_v62  ;;  %v7615_v62 = vld [vmem:[#allocation8 + $0xf48] ss:$16 sps:$4 sm:$0xff]  }
 0x2b5   :  { %5739 = vmatpush1.bf16.msra.mxu1 %v7537_v63  ;;  %5248 = vmatprep.subr.bf16.mxu0 %v7542_v1  ;;  %v7620_v63 = vld [vmem:[#allocation8 + $0xf64] ss:$16 sps:$4 sm:$0xff]   ;;  %v7623_v1 = vld [vmem:[#allocation8 + $0xf6c] ss:$16 sps:$4 sm:$0xff]  }
 0x2b6   :  { %5740 = vmatprep.subr.bf16.mxu1 %v7545_v2  ;;  %v7618_v2 = vld [vmem:[#allocation8 + $0xf60] ss:$16 sps:$4 sm:$0xff]  }
 0x2b8   :  { %5249 = vmatpush1.bf16.msra.mxu0 %v7540_v5  ;;  %v7621_v5 = vld [vmem:[#allocation8 + $0xf68] ss:$16 sps:$4 sm:$0xff]  }
 0x2b9   :  { %5741 = vmatpush1.bf16.msra.mxu1 %v7543_v6  ;;  %5250 = vmatprep.subr.bf16.mxu0 %v7548_v8  ;;  %v7626_v6 = vld [vmem:[#allocation8 + $0xf84] ss:$16 sps:$4 sm:$0xff]   ;;  %v7629_v8 = vld [vmem:[#allocation8 + $0xf8c] ss:$16 sps:$4 sm:$0xff]  }
 0x2ba   :  { %5742 = vmatprep.subr.bf16.mxu1 %v7551_v9  ;;  %v7624_v9 = vld [vmem:[#allocation8 + $0xf80] ss:$16 sps:$4 sm:$0xff]  }
 0x2bc   :  { %5251 = vmatpush1.bf16.msra.mxu0 %v7546_v10  ;;  %v7627_v10 = vld [vmem:[#allocation8 + $0xf88] ss:$16 sps:$4 sm:$0xff]  }
 0x2bd   :  { %5743 = vmatpush1.bf16.msra.mxu1 %v7549_v11  ;;  %5261 = vmatprep.subr.bf16.mxu0 %v7554_v14  ;;  %v7632_v11 = vld [vmem:[#allocation8 + $0xfa4] ss:$16 sps:$4 sm:$0xff]   ;;  %v7633_v14 = vld [vmem:[#allocation8 + $0xfa8] ss:$16 sps:$4 sm:$0xff]  }
 0x2be   :  { %5753 = vmatprep.subr.bf16.mxu1 %v7557_v16  ;;  %v7638_v16 = vld [vmem:[#allocation8 + $0xfc4] ss:$16 sps:$4 sm:$0xff]  }
 0x2bf   :  { %5253 = vmatmul.mubr.bf16.vlgmr.msra.gmra.mrb[0].mxu0 %v332_v21 }
 0x2c0   :  { %5745 = vmatmul.mubr.bf16.vlgmr.msra.gmra.mrb[0].mxu1 %v332_v21  ;;  %5262 = vmatpush1.bf16.msra.mxu0 %v7552_v19  ;;  %v7639_v19 = vld [vmem:[#allocation8 + $0xfc8] ss:$16 sps:$4 sm:$0xff]   ;;  %v7644_v21 = vld [vmem:[#allocation8 + $0xfe4] ss:$16 sps:$4 sm:$0xff]  }
 0x2c1   :  { %5293 = vmatprep.mubr.bf16.mxu0 %v335_v23  ;;  %5754 = vmatpush1.bf16.msra.mxu1 %v7555_v20  ;;  %v7647_v20 = vld [vmem:[#allocation8 + $0xfec] ss:$16 sps:$4 sm:$0xff]  }
 0x2c2   :  { %5785 = vmatprep.mubr.bf16.mxu1 %v335_v23  ;;  %5263 = vmatprep.subr.bf16.mxu0 %v7560_v22  ;;  %v7642_v22 = vld [vmem:[#allocation8 + $0xfe0] ss:$16 sps:$4 sm:$0xff]   ;;  %v7645_v23 = vld [vmem:[#allocation8 + $0xfe8] ss:$16 sps:$4 sm:$0xff]  }
 0x2c3   :  { %5755 = vmatprep.subr.bf16.mxu1 %v7563_v27  ;;  %v8055_v27 = vld [vmem:[#allocation4 + $0x70] sm:$0xff] }
 0x2c4   :  { %5264 = vmatpush1.bf16.msra.mxu0 %v7558_v24  ;;  %v310_v24 = vmul.f32 %v8055_v27, %v8357_v0  ;;  %v7731_v27 = vld [vmem:[#allocation8 + $0x11ac] ss:$16 sps:$4 sm:$0xff]  }
 0x2c5   :  { %5756 = vmatpush1.bf16.msra.mxu1 %v7561_v25  ;;  %5265 = vmatprep.subr.bf16.mxu0 %v7566_v26  ;;  %v7650_v25 = vld [vmem:[#allocation8 + $0x1004] ss:$16 sps:$4 sm:$0xff]   ;;  %v7653_v26 = vld [vmem:[#allocation8 + $0x100c] ss:$16 sps:$4 sm:$0xff]  }
 0x2c6   :  { %5757 = vmatprep.subr.bf16.mxu1 %v7569_v34  ;;  %v8056_v34 = vld [vmem:[#allocation4 + $0x88] sm:$0xff] }
 0x2c8   :  { %5266 = vmatpush1.bf16.msra.mxu0 %v7564_v28  ;;  %v313_v28 = vmul.f32 %v8056_v34, %v8357_v0  ;;  %v7737_v34 = vld [vmem:[#allocation8 + $0x11cc] ss:$16 sps:$4 sm:$0xff]  }
 0x2c9   :  { %5758 = vmatpush1.bf16.msra.mxu1 %v7567_v39  ;;  %5267 = vmatprep.subr.bf16.mxu0 %v7572_v29  ;;  %v7648_v39 = vld [vmem:[#allocation8 + $0x1000] ss:$16 sps:$4 sm:$0xff]   ;;  %v334_v29 = vpack.c.bf16 %v310_v24, %v310_v24 }
 0x2ca   :  { %5759 = vmatprep.subr.bf16.mxu1 %v7575_v30  ;;  %v7651_v30 = vld [vmem:[#allocation8 + $0x1008] ss:$16 sps:$4 sm:$0xff]   ;;  %v7726_v24 = vld [vmem:[#allocation8 + $0x11a0] ss:$16 sps:$4 sm:$0xff]  }
 0x2cc   :  { %5268 = vmatpush1.bf16.msra.mxu0 %v7570_v31  ;;  %v7656_v31 = vld [vmem:[#allocation8 + $0x1024] ss:$16 sps:$4 sm:$0xff]  }
 0x2cd   :  { %5760 = vmatpush1.bf16.msra.mxu1 %v7573_v32  ;;  %5269 = vmatprep.subr.bf16.mxu0 %v7578_v33  ;;  %v337_v32 = vpack.c.bf16 %v313_v28, %v313_v28  ;;  %v7659_v33 = vld [vmem:[#allocation8 + $0x102c] ss:$16 sps:$4 sm:$0xff]   ;;  %v7732_v28 = vld [vmem:[#allocation8 + $0x11c0] ss:$16 sps:$4 sm:$0xff]  }
 0x2ce   :  { %5761 = vmatprep.subr.bf16.mxu1 %v7581_v35  ;;  %v7654_v35 = vld [vmem:[#allocation8 + $0x1020] ss:$16 sps:$4 sm:$0xff]  }
 0x2d0   :  { %5270 = vmatpush1.bf16.msra.mxu0 %v7576_v36  ;;  %v7657_v36 = vld [vmem:[#allocation8 + $0x1028] ss:$16 sps:$4 sm:$0xff]  }
 0x2d1   :  { %5762 = vmatpush1.bf16.msra.mxu1 %v7579_v37  ;;  %5271 = vmatprep.subr.bf16.mxu0 %v7584_v38  ;;  %v7662_v37 = vld [vmem:[#allocation8 + $0x1044] ss:$16 sps:$4 sm:$0xff]   ;;  %v7665_v38 = vld [vmem:[#allocation8 + $0x104c] ss:$16 sps:$4 sm:$0xff]  }
 0x2d2   :  { %5763 = vmatprep.subr.bf16.mxu1 %v7587_v40  ;;  %v7660_v40 = vld [vmem:[#allocation8 + $0x1040] ss:$16 sps:$4 sm:$0xff]  }
 0x2d4   :  { %5272 = vmatpush1.bf16.msra.mxu0 %v7582_v41  ;;  %v7663_v41 = vld [vmem:[#allocation8 + $0x1048] ss:$16 sps:$4 sm:$0xff]  }
 0x2d5   :  { %5764 = vmatpush1.bf16.msra.mxu1 %v7585_v42  ;;  %5273 = vmatprep.subr.bf16.mxu0 %v7590_v43  ;;  %v7668_v42 = vld [vmem:[#allocation8 + $0x1064] ss:$16 sps:$4 sm:$0xff]   ;;  %v7671_v43 = vld [vmem:[#allocation8 + $0x106c] ss:$16 sps:$4 sm:$0xff]  }
 0x2d6   :  { %5765 = vmatprep.subr.bf16.mxu1 %v7593_v44  ;;  %v7666_v44 = vld [vmem:[#allocation8 + $0x1060] ss:$16 sps:$4 sm:$0xff]  }
 0x2d8   :  { %5274 = vmatpush1.bf16.msra.mxu0 %v7588_v45  ;;  %v7669_v45 = vld [vmem:[#allocation8 + $0x1068] ss:$16 sps:$4 sm:$0xff]  }
 0x2d9   :  { %5766 = vmatpush1.bf16.msra.mxu1 %v7591_v46  ;;  %5275 = vmatprep.subr.bf16.mxu0 %v7596_v47  ;;  %v7674_v46 = vld [vmem:[#allocation8 + $0x1084] ss:$16 sps:$4 sm:$0xff]   ;;  %v7677_v47 = vld [vmem:[#allocation8 + $0x108c] ss:$16 sps:$4 sm:$0xff]  }
 0x2da   :  { %5767 = vmatprep.subr.bf16.mxu1 %v7599_v48  ;;  %v7672_v48 = vld [vmem:[#allocation8 + $0x1080] ss:$16 sps:$4 sm:$0xff]  }
 0x2dc   :  { %5276 = vmatpush1.bf16.msra.mxu0 %v7594_v49  ;;  %v7675_v49 = vld [vmem:[#allocation8 + $0x1088] ss:$16 sps:$4 sm:$0xff]  }
 0x2dd   :  { %5768 = vmatpush1.bf16.msra.mxu1 %v7597_v50  ;;  %5277 = vmatprep.subr.bf16.mxu0 %v7602_v52  ;;  %v7680_v50 = vld [vmem:[#allocation8 + $0x10a4] ss:$16 sps:$4 sm:$0xff]   ;;  %v7683_v52 = vld [vmem:[#allocation8 + $0x10ac] ss:$16 sps:$4 sm:$0xff]  }
 0x2de   :  { %5769 = vmatprep.subr.bf16.mxu1 %v7605_v53  ;;  %v7678_v53 = vld [vmem:[#allocation8 + $0x10a0] ss:$16 sps:$4 sm:$0xff]  }
 0x2e0   :  { %5278 = vmatpush1.bf16.msra.mxu0 %v7600_v54  ;;  %v7681_v54 = vld [vmem:[#allocation8 + $0x10a8] ss:$16 sps:$4 sm:$0xff]  }
 0x2e1   :  { %5770 = vmatpush1.bf16.msra.mxu1 %v7603_v55  ;;  %5279 = vmatprep.subr.bf16.mxu0 %v7608_v56  ;;  %v7686_v55 = vld [vmem:[#allocation8 + $0x10c4] ss:$16 sps:$4 sm:$0xff]   ;;  %v7689_v56 = vld [vmem:[#allocation8 + $0x10cc] ss:$16 sps:$4 sm:$0xff]  }
 0x2e2   :  { %5771 = vmatprep.subr.bf16.mxu1 %v7611_v57  ;;  %v7684_v57 = vld [vmem:[#allocation8 + $0x10c0] ss:$16 sps:$4 sm:$0xff]  }
 0x2e4   :  { %5280 = vmatpush1.bf16.msra.mxu0 %v7606_v58  ;;  %v7687_v58 = vld [vmem:[#allocation8 + $0x10c8] ss:$16 sps:$4 sm:$0xff]  }
 0x2e5   :  { %5772 = vmatpush1.bf16.msra.mxu1 %v7609_v51  ;;  %5281 = vmatprep.subr.bf16.mxu0 %v7614_v59  ;;  %v7692_v51 = vld [vmem:[#allocation8 + $0x10e4] ss:$16 sps:$4 sm:$0xff]   ;;  %v7695_v59 = vld [vmem:[#allocation8 + $0x10ec] ss:$16 sps:$4 sm:$0xff]  }
 0x2e6   :  { %5773 = vmatprep.subr.bf16.mxu1 %v7617_v60  ;;  %v7690_v60 = vld [vmem:[#allocation8 + $0x10e0] ss:$16 sps:$4 sm:$0xff]  }
 0x2e8   :  { %5282 = vmatpush1.bf16.msra.mxu0 %v7612_v61  ;;  %v7693_v61 = vld [vmem:[#allocation8 + $0x10e8] ss:$16 sps:$4 sm:$0xff]  }
 0x2e9   :  { %5774 = vmatpush1.bf16.msra.mxu1 %v7615_v62  ;;  %5283 = vmatprep.subr.bf16.mxu0 %v7620_v63  ;;  %v7698_v62 = vld [vmem:[#allocation8 + $0x1104] ss:$16 sps:$4 sm:$0xff]   ;;  %v7701_v63 = vld [vmem:[#allocation8 + $0x110c] ss:$16 sps:$4 sm:$0xff]  }
 0x2ea   :  { %5775 = vmatprep.subr.bf16.mxu1 %v7623_v1  ;;  %v7696_v1 = vld [vmem:[#allocation8 + $0x1100] ss:$16 sps:$4 sm:$0xff]  }
 0x2ec   :  { %5284 = vmatpush1.bf16.msra.mxu0 %v7618_v2  ;;  %v7699_v2 = vld [vmem:[#allocation8 + $0x1108] ss:$16 sps:$4 sm:$0xff]  }
 0x2ed   :  { %5776 = vmatpush1.bf16.msra.mxu1 %v7621_v5  ;;  %5285 = vmatprep.subr.bf16.mxu0 %v7626_v6  ;;  %v7704_v5 = vld [vmem:[#allocation8 + $0x1124] ss:$16 sps:$4 sm:$0xff]   ;;  %v7707_v6 = vld [vmem:[#allocation8 + $0x112c] ss:$16 sps:$4 sm:$0xff]  }
 0x2ee   :  { %5777 = vmatprep.subr.bf16.mxu1 %v7629_v8  ;;  %v7702_v8 = vld [vmem:[#allocation8 + $0x1120] ss:$16 sps:$4 sm:$0xff]  }
 0x2f0   :  { %5286 = vmatpush1.bf16.msra.mxu0 %v7624_v9  ;;  %v7705_v9 = vld [vmem:[#allocation8 + $0x1128] ss:$16 sps:$4 sm:$0xff]  }
 0x2f1   :  { %5778 = vmatpush1.bf16.msra.mxu1 %v7627_v10  ;;  %5287 = vmatprep.subr.bf16.mxu0 %v7632_v11  ;;  %v7710_v10 = vld [vmem:[#allocation8 + $0x1144] ss:$16 sps:$4 sm:$0xff]   ;;  %v7713_v11 = vld [vmem:[#allocation8 + $0x114c] ss:$16 sps:$4 sm:$0xff]  }
 0x2f2   :  { %5779 = vmatprep.subr.bf16.mxu1 %v7635_v12  ;;  %v7708_v12 = vld [vmem:[#allocation8 + $0x1140] ss:$16 sps:$4 sm:$0xff]  }
 0x2f4   :  { %5288 = vmatpush1.bf16.msra.mxu0 %v7630_v13  ;;  %v7711_v13 = vld [vmem:[#allocation8 + $0x1148] ss:$16 sps:$4 sm:$0xff]  }
 0x2f5   :  { %5780 = vmatpush1.bf16.msra.mxu1 %v7633_v14  ;;  %5289 = vmatprep.subr.bf16.mxu0 %v7638_v16  ;;  %v7716_v14 = vld [vmem:[#allocation8 + $0x1164] ss:$16 sps:$4 sm:$0xff]   ;;  %v7719_v16 = vld [vmem:[#allocation8 + $0x116c] ss:$16 sps:$4 sm:$0xff]  }
 0x2f6   :  { %5781 = vmatprep.subr.bf16.mxu1 %v7641_v17  ;;  %v7714_v17 = vld [vmem:[#allocation8 + $0x1160] ss:$16 sps:$4 sm:$0xff]  }
 0x2f8   :  { %5290 = vmatpush1.bf16.msra.mxu0 %v7636_v18  ;;  %v7717_v18 = vld [vmem:[#allocation8 + $0x1168] ss:$16 sps:$4 sm:$0xff]  }
 0x2f9   :  { %5782 = vmatpush1.bf16.msra.mxu1 %v7639_v19  ;;  %5291 = vmatprep.subr.bf16.mxu0 %v7644_v21  ;;  %v7722_v19 = vld [vmem:[#allocation8 + $0x1184] ss:$16 sps:$4 sm:$0xff]   ;;  %v7725_v21 = vld [vmem:[#allocation8 + $0x118c] ss:$16 sps:$4 sm:$0xff]  }
 0x2fa   :  { %5783 = vmatprep.subr.bf16.mxu1 %v7647_v20  ;;  %v7720_v20 = vld [vmem:[#allocation8 + $0x1180] ss:$16 sps:$4 sm:$0xff]  }
 0x2fc   :  { %5292 = vmatpush1.bf16.msra.mxu0 %v7642_v22  ;;  %v7723_v22 = vld [vmem:[#allocation8 + $0x1188] ss:$16 sps:$4 sm:$0xff]  }
 0x2fd   :  { %5784 = vmatpush1.bf16.msra.mxu1 %v7645_v23  ;;  %5302 = vmatprep.subr.bf16.mxu0 %v7650_v25  ;;  %v7728_v23 = vld [vmem:[#allocation8 + $0x11a4] ss:$16 sps:$4 sm:$0xff]   ;;  %v7729_v25 = vld [vmem:[#allocation8 + $0x11a8] ss:$16 sps:$4 sm:$0xff]  }
 0x2fe   :  { %5794 = vmatprep.subr.bf16.mxu1 %v7653_v26  ;;  %v7734_v26 = vld [vmem:[#allocation8 + $0x11c4] ss:$16 sps:$4 sm:$0xff]  }
 0x2ff   :  { %5294 = vmatmul.mubr.bf16.vlgmr.msra.gmra.mrb[0].mxu0 %v334_v29 }
 0x300   :  { %5786 = vmatmul.mubr.bf16.vlgmr.msra.gmra.mrb[0].mxu1 %v334_v29  ;;  %5303 = vmatpush1.bf16.msra.mxu0 %v7648_v39  ;;  %v7735_v39 = vld [vmem:[#allocation8 + $0x11c8] ss:$16 sps:$4 sm:$0xff]   ;;  %v7740_v29 = vld [vmem:[#allocation8 + $0x11e4] ss:$16 sps:$4 sm:$0xff]  }
 0x301   :  { %5334 = vmatprep.mubr.bf16.mxu0 %v337_v32  ;;  %5795 = vmatpush1.bf16.msra.mxu1 %v7651_v30  ;;  %v7743_v30 = vld [vmem:[#allocation8 + $0x11ec] ss:$16 sps:$4 sm:$0xff]  }
 0x302   :  { %5826 = vmatprep.mubr.bf16.mxu1 %v337_v32  ;;  %5304 = vmatprep.subr.bf16.mxu0 %v7656_v31  ;;  %v7738_v31 = vld [vmem:[#allocation8 + $0x11e0] ss:$16 sps:$4 sm:$0xff]   ;;  %v7741_v32 = vld [vmem:[#allocation8 + $0x11e8] ss:$16 sps:$4 sm:$0xff]  }
 0x303   :  { %5796 = vmatprep.subr.bf16.mxu1 %v7659_v33  ;;  %v8057_v33 = vld [vmem:[#allocation4 + $0x80] sm:$0xff] }
 0x304   :  { %5305 = vmatpush1.bf16.msra.mxu0 %v7654_v35  ;;  %v312_v35 = vmul.f32 %v8057_v33, %v8357_v0  ;;  %v7827_v33 = vld [vmem:[#allocation8 + $0x13ac] ss:$16 sps:$4 sm:$0xff]  }
 0x305   :  { %5797 = vmatpush1.bf16.msra.mxu1 %v7657_v36  ;;  %5306 = vmatprep.subr.bf16.mxu0 %v7662_v37  ;;  %v7746_v36 = vld [vmem:[#allocation8 + $0x1204] ss:$16 sps:$4 sm:$0xff]   ;;  %v7749_v37 = vld [vmem:[#allocation8 + $0x120c] ss:$16 sps:$4 sm:$0xff]  }
 0x306   :  { %5798 = vmatprep.subr.bf16.mxu1 %v7665_v38  ;;  %v8058_v38 = vld [vmem:[#allocation4 + $0x98] sm:$0xff] }
 0x308   :  { %5307 = vmatpush1.bf16.msra.mxu0 %v7660_v40  ;;  %v315_v40 = vmul.f32 %v8058_v38, %v8357_v0  ;;  %v7833_v38 = vld [vmem:[#allocation8 + $0x13cc] ss:$16 sps:$4 sm:$0xff]  }
 0x309   :  { %5799 = vmatpush1.bf16.msra.mxu1 %v7663_v41  ;;  %5308 = vmatprep.subr.bf16.mxu0 %v7668_v42  ;;  %v7744_v41 = vld [vmem:[#allocation8 + $0x1200] ss:$16 sps:$4 sm:$0xff]   ;;  %v336_v42 = vpack.c.bf16 %v312_v35, %v312_v35 }
 0x30a   :  { %5800 = vmatprep.subr.bf16.mxu1 %v7671_v43  ;;  %v7747_v43 = vld [vmem:[#allocation8 + $0x1208] ss:$16 sps:$4 sm:$0xff]   ;;  %v7822_v35 = vld [vmem:[#allocation8 + $0x13a0] ss:$16 sps:$4 sm:$0xff]  }
 0x30c   :  { %5309 = vmatpush1.bf16.msra.mxu0 %v7666_v44  ;;  %v7752_v44 = vld [vmem:[#allocation8 + $0x1224] ss:$16 sps:$4 sm:$0xff]  }
 0x30d   :  { %5801 = vmatpush1.bf16.msra.mxu1 %v7669_v45  ;;  %5310 = vmatprep.subr.bf16.mxu0 %v7674_v46  ;;  %v339_v45 = vpack.c.bf16 %v315_v40, %v315_v40  ;;  %v7755_v46 = vld [vmem:[#allocation8 + $0x122c] ss:$16 sps:$4 sm:$0xff]   ;;  %v7828_v40 = vld [vmem:[#allocation8 + $0x13c0] ss:$16 sps:$4 sm:$0xff]  }
 0x30e   :  { %5802 = vmatprep.subr.bf16.mxu1 %v7677_v47  ;;  %v7750_v47 = vld [vmem:[#allocation8 + $0x1220] ss:$16 sps:$4 sm:$0xff]  }
 0x310   :  { %5311 = vmatpush1.bf16.msra.mxu0 %v7672_v48  ;;  %v7753_v48 = vld [vmem:[#allocation8 + $0x1228] ss:$16 sps:$4 sm:$0xff]  }
 0x311   :  { %5803 = vmatpush1.bf16.msra.mxu1 %v7675_v49  ;;  %5312 = vmatprep.subr.bf16.mxu0 %v7680_v50  ;;  %v7758_v49 = vld [vmem:[#allocation8 + $0x1244] ss:$16 sps:$4 sm:$0xff]   ;;  %v7761_v50 = vld [vmem:[#allocation8 + $0x124c] ss:$16 sps:$4 sm:$0xff]  }
 0x312   :  { %5804 = vmatprep.subr.bf16.mxu1 %v7683_v52  ;;  %v7756_v52 = vld [vmem:[#allocation8 + $0x1240] ss:$16 sps:$4 sm:$0xff]  }
 0x314   :  { %5313 = vmatpush1.bf16.msra.mxu0 %v7678_v53  ;;  %v7759_v53 = vld [vmem:[#allocation8 + $0x1248] ss:$16 sps:$4 sm:$0xff]  }
 0x315   :  { %5805 = vmatpush1.bf16.msra.mxu1 %v7681_v54  ;;  %5314 = vmatprep.subr.bf16.mxu0 %v7686_v55  ;;  %v7764_v54 = vld [vmem:[#allocation8 + $0x1264] ss:$16 sps:$4 sm:$0xff]   ;;  %v7767_v55 = vld [vmem:[#allocation8 + $0x126c] ss:$16 sps:$4 sm:$0xff]  }
 0x316   :  { %5806 = vmatprep.subr.bf16.mxu1 %v7689_v56  ;;  %v7762_v56 = vld [vmem:[#allocation8 + $0x1260] ss:$16 sps:$4 sm:$0xff]  }
 0x318   :  { %5315 = vmatpush1.bf16.msra.mxu0 %v7684_v57  ;;  %v7765_v57 = vld [vmem:[#allocation8 + $0x1268] ss:$16 sps:$4 sm:$0xff]  }
 0x319   :  { %5807 = vmatpush1.bf16.msra.mxu1 %v7687_v58  ;;  %5316 = vmatprep.subr.bf16.mxu0 %v7692_v51  ;;  %v7770_v58 = vld [vmem:[#allocation8 + $0x1284] ss:$16 sps:$4 sm:$0xff]   ;;  %v7773_v51 = vld [vmem:[#allocation8 + $0x128c] ss:$16 sps:$4 sm:$0xff]  }
 0x31a   :  { %5808 = vmatprep.subr.bf16.mxu1 %v7695_v59  ;;  %v7768_v59 = vld [vmem:[#allocation8 + $0x1280] ss:$16 sps:$4 sm:$0xff]  }
 0x31c   :  { %5317 = vmatpush1.bf16.msra.mxu0 %v7690_v60  ;;  %v7771_v60 = vld [vmem:[#allocation8 + $0x1288] ss:$16 sps:$4 sm:$0xff]  }
 0x31d   :  { %5809 = vmatpush1.bf16.msra.mxu1 %v7693_v61  ;;  %5318 = vmatprep.subr.bf16.mxu0 %v7698_v62  ;;  %v7776_v61 = vld [vmem:[#allocation8 + $0x12a4] ss:$16 sps:$4 sm:$0xff]   ;;  %v7779_v62 = vld [vmem:[#allocation8 + $0x12ac] ss:$16 sps:$4 sm:$0xff]  }
 0x31e   :  { %5810 = vmatprep.subr.bf16.mxu1 %v7701_v63  ;;  %v7774_v63 = vld [vmem:[#allocation8 + $0x12a0] ss:$16 sps:$4 sm:$0xff]  }
 0x320   :  { %5319 = vmatpush1.bf16.msra.mxu0 %v7696_v1  ;;  %v7777_v1 = vld [vmem:[#allocation8 + $0x12a8] ss:$16 sps:$4 sm:$0xff]  }
 0x321   :  { %5811 = vmatpush1.bf16.msra.mxu1 %v7699_v2  ;;  %5320 = vmatprep.subr.bf16.mxu0 %v7704_v5  ;;  %v7782_v2 = vld [vmem:[#allocation8 + $0x12c4] ss:$16 sps:$4 sm:$0xff]   ;;  %v7785_v5 = vld [vmem:[#allocation8 + $0x12cc] ss:$16 sps:$4 sm:$0xff]  }
 0x322   :  { %5812 = vmatprep.subr.bf16.mxu1 %v7707_v6  ;;  %v7780_v6 = vld [vmem:[#allocation8 + $0x12c0] ss:$16 sps:$4 sm:$0xff]  }
 0x324   :  { %5321 = vmatpush1.bf16.msra.mxu0 %v7702_v8  ;;  %v7783_v8 = vld [vmem:[#allocation8 + $0x12c8] ss:$16 sps:$4 sm:$0xff]  }
 0x325   :  { %5813 = vmatpush1.bf16.msra.mxu1 %v7705_v9  ;;  %5322 = vmatprep.subr.bf16.mxu0 %v7710_v10  ;;  %v7788_v9 = vld [vmem:[#allocation8 + $0x12e4] ss:$16 sps:$4 sm:$0xff]   ;;  %v7791_v10 = vld [vmem:[#allocation8 + $0x12ec] ss:$16 sps:$4 sm:$0xff]  }
 0x326   :  { %5814 = vmatprep.subr.bf16.mxu1 %v7713_v11  ;;  %v7786_v11 = vld [vmem:[#allocation8 + $0x12e0] ss:$16 sps:$4 sm:$0xff]  }
 0x328   :  { %5323 = vmatpush1.bf16.msra.mxu0 %v7708_v12  ;;  %v7789_v12 = vld [vmem:[#allocation8 + $0x12e8] ss:$16 sps:$4 sm:$0xff]  }
 0x329   :  { %5815 = vmatpush1.bf16.msra.mxu1 %v7711_v13  ;;  %5324 = vmatprep.subr.bf16.mxu0 %v7716_v14  ;;  %v7794_v13 = vld [vmem:[#allocation8 + $0x1304] ss:$16 sps:$4 sm:$0xff]   ;;  %v7797_v14 = vld [vmem:[#allocation8 + $0x130c] ss:$16 sps:$4 sm:$0xff]  }
 0x32a   :  { %5816 = vmatprep.subr.bf16.mxu1 %v7719_v16  ;;  %v7792_v16 = vld [vmem:[#allocation8 + $0x1300] ss:$16 sps:$4 sm:$0xff]  }
 0x32c   :  { %5325 = vmatpush1.bf16.msra.mxu0 %v7714_v17  ;;  %v7795_v17 = vld [vmem:[#allocation8 + $0x1308] ss:$16 sps:$4 sm:$0xff]  }
 0x32d   :  { %5817 = vmatpush1.bf16.msra.mxu1 %v7717_v18  ;;  %5326 = vmatprep.subr.bf16.mxu0 %v7722_v19  ;;  %v7800_v18 = vld [vmem:[#allocation8 + $0x1324] ss:$16 sps:$4 sm:$0xff]   ;;  %v7803_v19 = vld [vmem:[#allocation8 + $0x132c] ss:$16 sps:$4 sm:$0xff]  }
 0x32e   :  { %5818 = vmatprep.subr.bf16.mxu1 %v7725_v21  ;;  %v7798_v21 = vld [vmem:[#allocation8 + $0x1320] ss:$16 sps:$4 sm:$0xff]  }
 0x330   :  { %5327 = vmatpush1.bf16.msra.mxu0 %v7720_v20  ;;  %v7801_v20 = vld [vmem:[#allocation8 + $0x1328] ss:$16 sps:$4 sm:$0xff]  }
 0x331   :  { %5819 = vmatpush1.bf16.msra.mxu1 %v7723_v22  ;;  %5328 = vmatprep.subr.bf16.mxu0 %v7728_v23  ;;  %v7806_v22 = vld [vmem:[#allocation8 + $0x1344] ss:$16 sps:$4 sm:$0xff]   ;;  %v7809_v23 = vld [vmem:[#allocation8 + $0x134c] ss:$16 sps:$4 sm:$0xff]  }
 0x332   :  { %5820 = vmatprep.subr.bf16.mxu1 %v7731_v27  ;;  %v7804_v27 = vld [vmem:[#allocation8 + $0x1340] ss:$16 sps:$4 sm:$0xff]  }
 0x334   :  { %5329 = vmatpush1.bf16.msra.mxu0 %v7726_v24  ;;  %v7807_v24 = vld [vmem:[#allocation8 + $0x1348] ss:$16 sps:$4 sm:$0xff]  }
 0x335   :  { %5821 = vmatpush1.bf16.msra.mxu1 %v7729_v25  ;;  %5330 = vmatprep.subr.bf16.mxu0 %v7734_v26  ;;  %v7812_v25 = vld [vmem:[#allocation8 + $0x1364] ss:$16 sps:$4 sm:$0xff]   ;;  %v7815_v26 = vld [vmem:[#allocation8 + $0x136c] ss:$16 sps:$4 sm:$0xff]  }
 0x336   :  { %5822 = vmatprep.subr.bf16.mxu1 %v7737_v34  ;;  %v7810_v34 = vld [vmem:[#allocation8 + $0x1360] ss:$16 sps:$4 sm:$0xff]  }
 0x338   :  { %5331 = vmatpush1.bf16.msra.mxu0 %v7732_v28  ;;  %v7813_v28 = vld [vmem:[#allocation8 + $0x1368] ss:$16 sps:$4 sm:$0xff]  }
 0x339   :  { %5823 = vmatpush1.bf16.msra.mxu1 %v7735_v39  ;;  %5332 = vmatprep.subr.bf16.mxu0 %v7740_v29  ;;  %v7818_v39 = vld [vmem:[#allocation8 + $0x1384] ss:$16 sps:$4 sm:$0xff]   ;;  %v7821_v29 = vld [vmem:[#allocation8 + $0x138c] ss:$16 sps:$4 sm:$0xff]  }
 0x33a   :  { %5824 = vmatprep.subr.bf16.mxu1 %v7743_v30  ;;  %v7816_v30 = vld [vmem:[#allocation8 + $0x1380] ss:$16 sps:$4 sm:$0xff]  }
 0x33c   :  { %5333 = vmatpush1.bf16.msra.mxu0 %v7738_v31  ;;  %v7819_v31 = vld [vmem:[#allocation8 + $0x1388] ss:$16 sps:$4 sm:$0xff]  }
 0x33d   :  { %5825 = vmatpush1.bf16.msra.mxu1 %v7741_v32  ;;  %5343 = vmatprep.subr.bf16.mxu0 %v7746_v36  ;;  %v7824_v32 = vld [vmem:[#allocation8 + $0x13a4] ss:$16 sps:$4 sm:$0xff]   ;;  %v7825_v36 = vld [vmem:[#allocation8 + $0x13a8] ss:$16 sps:$4 sm:$0xff]  }
 0x33e   :  { %5835 = vmatprep.subr.bf16.mxu1 %v7749_v37  ;;  %v7830_v37 = vld [vmem:[#allocation8 + $0x13c4] ss:$16 sps:$4 sm:$0xff]  }
 0x33f   :  { %5335 = vmatmul.mubr.bf16.vlgmr.msra.gmra.mrb[0].mxu0 %v336_v42 }
 0x340   :  { %5827 = vmatmul.mubr.bf16.vlgmr.msra.gmra.mrb[0].mxu1 %v336_v42  ;;  %5344 = vmatpush1.bf16.msra.mxu0 %v7744_v41  ;;  %v7831_v41 = vld [vmem:[#allocation8 + $0x13c8] ss:$16 sps:$4 sm:$0xff]   ;;  %v7836_v42 = vld [vmem:[#allocation8 + $0x13e4] ss:$16 sps:$4 sm:$0xff]  }
 0x341   :  { %5375 = vmatprep.mubr.bf16.mxu0 %v339_v45  ;;  %5836 = vmatpush1.bf16.msra.mxu1 %v7747_v43  ;;  %v7839_v43 = vld [vmem:[#allocation8 + $0x13ec] ss:$16 sps:$4 sm:$0xff]  }
 0x342   :  { %5867 = vmatprep.mubr.bf16.mxu1 %v339_v45  ;;  %5345 = vmatprep.subr.bf16.mxu0 %v7752_v44  ;;  %v7834_v44 = vld [vmem:[#allocation8 + $0x13e0] ss:$16 sps:$4 sm:$0xff]   ;;  %v7837_v45 = vld [vmem:[#allocation8 + $0x13e8] ss:$16 sps:$4 sm:$0xff]  }
 0x343   :  { %5837 = vmatprep.subr.bf16.mxu1 %v7755_v46  ;;  %v8059_v46 = vld [vmem:[#allocation4 + $0x90] sm:$0xff] }
 0x344   :  { %5346 = vmatpush1.bf16.msra.mxu0 %v7750_v47  ;;  %v314_v47 = vmul.f32 %v8059_v46, %v8357_v0  ;;  %v7923_v46 = vld [vmem:[#allocation8 + $0x15ac] ss:$16 sps:$4 sm:$0xff]  }
 0x345   :  { %5838 = vmatpush1.bf16.msra.mxu1 %v7753_v48  ;;  %5347 = vmatprep.subr.bf16.mxu0 %v7758_v49  ;;  %v7842_v48 = vld [vmem:[#allocation8 + $0x1404] ss:$16 sps:$4 sm:$0xff]   ;;  %v7845_v49 = vld [vmem:[#allocation8 + $0x140c] ss:$16 sps:$4 sm:$0xff]  }
 0x346   :  { %5839 = vmatprep.subr.bf16.mxu1 %v7761_v50  ;;  %v8060_v50 = vld [vmem:[#allocation4 + $0xa8] sm:$0xff] }
 0x348   :  { %5348 = vmatpush1.bf16.msra.mxu0 %v7756_v52  ;;  %v317_v52 = vmul.f32 %v8060_v50, %v8357_v0  ;;  %v7929_v50 = vld [vmem:[#allocation8 + $0x15cc] ss:$16 sps:$4 sm:$0xff]  }
 0x349   :  { %5840 = vmatpush1.bf16.msra.mxu1 %v7759_v53  ;;  %5349 = vmatprep.subr.bf16.mxu0 %v7764_v54  ;;  %v7840_v53 = vld [vmem:[#allocation8 + $0x1400] ss:$16 sps:$4 sm:$0xff]   ;;  %v338_v54 = vpack.c.bf16 %v314_v47, %v314_v47 }
 0x34a   :  { %5841 = vmatprep.subr.bf16.mxu1 %v7767_v55  ;;  %v7843_v55 = vld [vmem:[#allocation8 + $0x1408] ss:$16 sps:$4 sm:$0xff]   ;;  %v7918_v47 = vld [vmem:[#allocation8 + $0x15a0] ss:$16 sps:$4 sm:$0xff]  }
 0x34c   :  { %5350 = vmatpush1.bf16.msra.mxu0 %v7762_v56  ;;  %v7848_v56 = vld [vmem:[#allocation8 + $0x1424] ss:$16 sps:$4 sm:$0xff]  }
 0x34d   :  { %5842 = vmatpush1.bf16.msra.mxu1 %v7765_v57  ;;  %5351 = vmatprep.subr.bf16.mxu0 %v7770_v58  ;;  %v341_v57 = vpack.c.bf16 %v317_v52, %v317_v52  ;;  %v7851_v58 = vld [vmem:[#allocation8 + $0x142c] ss:$16 sps:$4 sm:$0xff]   ;;  %v7924_v52 = vld [vmem:[#allocation8 + $0x15c0] ss:$16 sps:$4 sm:$0xff]  }
 0x34e   :  { %5843 = vmatprep.subr.bf16.mxu1 %v7773_v51  ;;  %v7846_v51 = vld [vmem:[#allocation8 + $0x1420] ss:$16 sps:$4 sm:$0xff]  }
 0x350   :  { %5352 = vmatpush1.bf16.msra.mxu0 %v7768_v59  ;;  %v7849_v59 = vld [vmem:[#allocation8 + $0x1428] ss:$16 sps:$4 sm:$0xff]  }
 0x351   :  { %5844 = vmatpush1.bf16.msra.mxu1 %v7771_v60  ;;  %5353 = vmatprep.subr.bf16.mxu0 %v7776_v61  ;;  %v7854_v60 = vld [vmem:[#allocation8 + $0x1444] ss:$16 sps:$4 sm:$0xff]   ;;  %v7857_v61 = vld [vmem:[#allocation8 + $0x144c] ss:$16 sps:$4 sm:$0xff]  }
 0x352   :  { %5845 = vmatprep.subr.bf16.mxu1 %v7779_v62  ;;  %v7852_v62 = vld [vmem:[#allocation8 + $0x1440] ss:$16 sps:$4 sm:$0xff]  }
 0x354   :  { %5354 = vmatpush1.bf16.msra.mxu0 %v7774_v63  ;;  %v7855_v63 = vld [vmem:[#allocation8 + $0x1448] ss:$16 sps:$4 sm:$0xff]  }
 0x355   :  { %5846 = vmatpush1.bf16.msra.mxu1 %v7777_v1  ;;  %5355 = vmatprep.subr.bf16.mxu0 %v7782_v2  ;;  %v7860_v1 = vld [vmem:[#allocation8 + $0x1464] ss:$16 sps:$4 sm:$0xff]   ;;  %v7863_v2 = vld [vmem:[#allocation8 + $0x146c] ss:$16 sps:$4 sm:$0xff]  }
 0x356   :  { %5847 = vmatprep.subr.bf16.mxu1 %v7785_v5  ;;  %v7858_v5 = vld [vmem:[#allocation8 + $0x1460] ss:$16 sps:$4 sm:$0xff]  }
 0x358   :  { %5356 = vmatpush1.bf16.msra.mxu0 %v7780_v6  ;;  %v7861_v6 = vld [vmem:[#allocation8 + $0x1468] ss:$16 sps:$4 sm:$0xff]  }
 0x359   :  { %5848 = vmatpush1.bf16.msra.mxu1 %v7783_v8  ;;  %5357 = vmatprep.subr.bf16.mxu0 %v7788_v9  ;;  %v7866_v8 = vld [vmem:[#allocation8 + $0x1484] ss:$16 sps:$4 sm:$0xff]   ;;  %v7869_v9 = vld [vmem:[#allocation8 + $0x148c] ss:$16 sps:$4 sm:$0xff]  }
 0x35a   :  { %5849 = vmatprep.subr.bf16.mxu1 %v7791_v10  ;;  %v7864_v10 = vld [vmem:[#allocation8 + $0x1480] ss:$16 sps:$4 sm:$0xff]  }
 0x35c   :  { %5358 = vmatpush1.bf16.msra.mxu0 %v7786_v11  ;;  %v7867_v11 = vld [vmem:[#allocation8 + $0x1488] ss:$16 sps:$4 sm:$0xff]  }
 0x35d   :  { %5850 = vmatpush1.bf16.msra.mxu1 %v7789_v12  ;;  %5359 = vmatprep.subr.bf16.mxu0 %v7794_v13  ;;  %v7872_v12 = vld [vmem:[#allocation8 + $0x14a4] ss:$16 sps:$4 sm:$0xff]   ;;  %v7875_v13 = vld [vmem:[#allocation8 + $0x14ac] ss:$16 sps:$4 sm:$0xff]  }
 0x35e   :  { %5851 = vmatprep.subr.bf16.mxu1 %v7797_v14  ;;  %v7870_v14 = vld [vmem:[#allocation8 + $0x14a0] ss:$16 sps:$4 sm:$0xff]  }
 0x360   :  { %5360 = vmatpush1.bf16.msra.mxu0 %v7792_v16  ;;  %v7873_v16 = vld [vmem:[#allocation8 + $0x14a8] ss:$16 sps:$4 sm:$0xff]  }
 0x361   :  { %5852 = vmatpush1.bf16.msra.mxu1 %v7795_v17  ;;  %5361 = vmatprep.subr.bf16.mxu0 %v7800_v18  ;;  %v7878_v17 = vld [vmem:[#allocation8 + $0x14c4] ss:$16 sps:$4 sm:$0xff]   ;;  %v7881_v18 = vld [vmem:[#allocation8 + $0x14cc] ss:$16 sps:$4 sm:$0xff]  }
 0x362   :  { %5853 = vmatprep.subr.bf16.mxu1 %v7803_v19  ;;  %v7876_v19 = vld [vmem:[#allocation8 + $0x14c0] ss:$16 sps:$4 sm:$0xff]  }
 0x364   :  { %5362 = vmatpush1.bf16.msra.mxu0 %v7798_v21  ;;  %v7879_v21 = vld [vmem:[#allocation8 + $0x14c8] ss:$16 sps:$4 sm:$0xff]  }
 0x365   :  { %5854 = vmatpush1.bf16.msra.mxu1 %v7801_v20  ;;  %5363 = vmatprep.subr.bf16.mxu0 %v7806_v22  ;;  %v7884_v20 = vld [vmem:[#allocation8 + $0x14e4] ss:$16 sps:$4 sm:$0xff]   ;;  %v7887_v22 = vld [vmem:[#allocation8 + $0x14ec] ss:$16 sps:$4 sm:$0xff]  }
 0x366   :  { %5855 = vmatprep.subr.bf16.mxu1 %v7809_v23  ;;  %v7882_v23 = vld [vmem:[#allocation8 + $0x14e0] ss:$16 sps:$4 sm:$0xff]  }
 0x368   :  { %5364 = vmatpush1.bf16.msra.mxu0 %v7804_v27  ;;  %v7885_v27 = vld [vmem:[#allocation8 + $0x14e8] ss:$16 sps:$4 sm:$0xff]  }
 0x369   :  { %5856 = vmatpush1.bf16.msra.mxu1 %v7807_v24  ;;  %5365 = vmatprep.subr.bf16.mxu0 %v7812_v25  ;;  %v7890_v24 = vld [vmem:[#allocation8 + $0x1504] ss:$16 sps:$4 sm:$0xff]   ;;  %v7893_v25 = vld [vmem:[#allocation8 + $0x150c] ss:$16 sps:$4 sm:$0xff]  }
 0x36a   :  { %5857 = vmatprep.subr.bf16.mxu1 %v7815_v26  ;;  %v7888_v26 = vld [vmem:[#allocation8 + $0x1500] ss:$16 sps:$4 sm:$0xff]  }
 0x36c   :  { %5366 = vmatpush1.bf16.msra.mxu0 %v7810_v34  ;;  %v7891_v34 = vld [vmem:[#allocation8 + $0x1508] ss:$16 sps:$4 sm:$0xff]  }
 0x36d   :  { %5858 = vmatpush1.bf16.msra.mxu1 %v7813_v28  ;;  %5367 = vmatprep.subr.bf16.mxu0 %v7818_v39  ;;  %v7896_v28 = vld [vmem:[#allocation8 + $0x1524] ss:$16 sps:$4 sm:$0xff]   ;;  %v7899_v39 = vld [vmem:[#allocation8 + $0x152c] ss:$16 sps:$4 sm:$0xff]  }
 0x36e   :  { %5859 = vmatprep.subr.bf16.mxu1 %v7821_v29  ;;  %v7894_v29 = vld [vmem:[#allocation8 + $0x1520] ss:$16 sps:$4 sm:$0xff]  }
 0x370   :  { %5368 = vmatpush1.bf16.msra.mxu0 %v7816_v30  ;;  %v7897_v30 = vld [vmem:[#allocation8 + $0x1528] ss:$16 sps:$4 sm:$0xff]  }
 0x371   :  { %5860 = vmatpush1.bf16.msra.mxu1 %v7819_v31  ;;  %5369 = vmatprep.subr.bf16.mxu0 %v7824_v32  ;;  %v7902_v31 = vld [vmem:[#allocation8 + $0x1544] ss:$16 sps:$4 sm:$0xff]   ;;  %v7905_v32 = vld [vmem:[#allocation8 + $0x154c] ss:$16 sps:$4 sm:$0xff]  }
 0x372   :  { %5861 = vmatprep.subr.bf16.mxu1 %v7827_v33  ;;  %v7900_v33 = vld [vmem:[#allocation8 + $0x1540] ss:$16 sps:$4 sm:$0xff]  }
 0x374   :  { %5370 = vmatpush1.bf16.msra.mxu0 %v7822_v35  ;;  %v7903_v35 = vld [vmem:[#allocation8 + $0x1548] ss:$16 sps:$4 sm:$0xff]  }
 0x375   :  { %5862 = vmatpush1.bf16.msra.mxu1 %v7825_v36  ;;  %5371 = vmatprep.subr.bf16.mxu0 %v7830_v37  ;;  %v7908_v36 = vld [vmem:[#allocation8 + $0x1564] ss:$16 sps:$4 sm:$0xff]   ;;  %v7911_v37 = vld [vmem:[#allocation8 + $0x156c] ss:$16 sps:$4 sm:$0xff]  }
 0x376   :  { %5863 = vmatprep.subr.bf16.mxu1 %v7833_v38  ;;  %v7906_v38 = vld [vmem:[#allocation8 + $0x1560] ss:$16 sps:$4 sm:$0xff]  }
 0x378   :  { %5372 = vmatpush1.bf16.msra.mxu0 %v7828_v40  ;;  %v7909_v40 = vld [vmem:[#allocation8 + $0x1568] ss:$16 sps:$4 sm:$0xff]  }
 0x379   :  { %5864 = vmatpush1.bf16.msra.mxu1 %v7831_v41  ;;  %5373 = vmatprep.subr.bf16.mxu0 %v7836_v42  ;;  %v7914_v41 = vld [vmem:[#allocation8 + $0x1584] ss:$16 sps:$4 sm:$0xff]   ;;  %v7917_v42 = vld [vmem:[#allocation8 + $0x158c] ss:$16 sps:$4 sm:$0xff]  }
 0x37a   :  { %5865 = vmatprep.subr.bf16.mxu1 %v7839_v43  ;;  %v7912_v43 = vld [vmem:[#allocation8 + $0x1580] ss:$16 sps:$4 sm:$0xff]  }
 0x37c   :  { %5374 = vmatpush1.bf16.msra.mxu0 %v7834_v44  ;;  %v7915_v44 = vld [vmem:[#allocation8 + $0x1588] ss:$16 sps:$4 sm:$0xff]  }
 0x37d   :  { %5866 = vmatpush1.bf16.msra.mxu1 %v7837_v45  ;;  %5384 = vmatprep.subr.bf16.mxu0 %v7842_v48  ;;  %v7920_v45 = vld [vmem:[#allocation8 + $0x15a4] ss:$16 sps:$4 sm:$0xff]   ;;  %v7921_v48 = vld [vmem:[#allocation8 + $0x15a8] ss:$16 sps:$4 sm:$0xff]  }
 0x37e   :  { %5876 = vmatprep.subr.bf16.mxu1 %v7845_v49  ;;  %v7926_v49 = vld [vmem:[#allocation8 + $0x15c4] ss:$16 sps:$4 sm:$0xff]  }
 0x37f   :  { %5376 = vmatmul.mubr.bf16.vlgmr.msra.gmra.mrb[0].mxu0 %v338_v54 }
 0x380   :  { %5868 = vmatmul.mubr.bf16.vlgmr.msra.gmra.mrb[0].mxu1 %v338_v54  ;;  %5385 = vmatpush1.bf16.msra.mxu0 %v7840_v53  ;;  %v7927_v53 = vld [vmem:[#allocation8 + $0x15c8] ss:$16 sps:$4 sm:$0xff]   ;;  %v7932_v54 = vld [vmem:[#allocation8 + $0x15e4] ss:$16 sps:$4 sm:$0xff]  }
 0x381   :  { %5416 = vmatprep.mubr.bf16.mxu0 %v341_v57  ;;  %5877 = vmatpush1.bf16.msra.mxu1 %v7843_v55  ;;  %v7935_v55 = vld [vmem:[#allocation8 + $0x15ec] ss:$16 sps:$4 sm:$0xff]  }
 0x382   :  { %5908 = vmatprep.mubr.bf16.mxu1 %v341_v57  ;;  %5386 = vmatprep.subr.bf16.mxu0 %v7848_v56  ;;  %v7930_v56 = vld [vmem:[#allocation8 + $0x15e0] ss:$16 sps:$4 sm:$0xff]   ;;  %v7933_v57 = vld [vmem:[#allocation8 + $0x15e8] ss:$16 sps:$4 sm:$0xff]  }
 0x383   :  { %5878 = vmatprep.subr.bf16.mxu1 %v7851_v58  ;;  %v8061_v58 = vld [vmem:[#allocation4 + $0xa0] sm:$0xff] }
 0x384   :  { %5387 = vmatpush1.bf16.msra.mxu0 %v7846_v51  ;;  %v316_v51 = vmul.f32 %v8061_v58, %v8357_v0  ;;  %v8019_v58 = vld [vmem:[#allocation8 + $0x17ac] ss:$16 sps:$4 sm:$0xff]  }
 0x385   :  { %5879 = vmatpush1.bf16.msra.mxu1 %v7849_v59  ;;  %5388 = vmatprep.subr.bf16.mxu0 %v7854_v60  ;;  %v7938_v59 = vld [vmem:[#allocation8 + $0x1604] ss:$16 sps:$4 sm:$0xff]   ;;  %v7941_v60 = vld [vmem:[#allocation8 + $0x160c] ss:$16 sps:$4 sm:$0xff]  }
 0x386   :  { %5880 = vmatprep.subr.bf16.mxu1 %v7857_v61  ;;  %v8062_v61 = vld [vmem:[#allocation4 + $0xb8] sm:$0xff] }
 0x388   :  { %5389 = vmatpush1.bf16.msra.mxu0 %v7852_v62  ;;  %v319_v62 = vmul.f32 %v8062_v61, %v8357_v0  ;;  %v8025_v61 = vld [vmem:[#allocation8 + $0x17cc] ss:$16 sps:$4 sm:$0xff]  }
 0x389   :  { %5881 = vmatpush1.bf16.msra.mxu1 %v7855_v63  ;;  %5390 = vmatprep.subr.bf16.mxu0 %v7860_v1  ;;  %v7936_v63 = vld [vmem:[#allocation8 + $0x1600] ss:$16 sps:$4 sm:$0xff]   ;;  %v340_v1 = vpack.c.bf16 %v316_v51, %v316_v51 }
 0x38a   :  { %5882 = vmatprep.subr.bf16.mxu1 %v7863_v2  ;;  %v7939_v2 = vld [vmem:[#allocation8 + $0x1608] ss:$16 sps:$4 sm:$0xff]   ;;  %v8014_v51 = vld [vmem:[#allocation8 + $0x17a0] ss:$16 sps:$4 sm:$0xff]  }
 0x38c   :  { %5391 = vmatpush1.bf16.msra.mxu0 %v7858_v5  ;;  %v7944_v5 = vld [vmem:[#allocation8 + $0x1624] ss:$16 sps:$4 sm:$0xff]  }
 0x38d   :  { %5883 = vmatpush1.bf16.msra.mxu1 %v7861_v6  ;;  %5392 = vmatprep.subr.bf16.mxu0 %v7866_v8  ;;  %v343_v6 = vpack.c.bf16 %v319_v62, %v319_v62  ;;  %v7947_v8 = vld [vmem:[#allocation8 + $0x162c] ss:$16 sps:$4 sm:$0xff]   ;;  %v8020_v62 = vld [vmem:[#allocation8 + $0x17c0] ss:$16 sps:$4 sm:$0xff]  }
 0x38e   :  { %5884 = vmatprep.subr.bf16.mxu1 %v7869_v9  ;;  %v7942_v9 = vld [vmem:[#allocation8 + $0x1620] ss:$16 sps:$4 sm:$0xff]  }
 0x390   :  { %5393 = vmatpush1.bf16.msra.mxu0 %v7864_v10  ;;  %v7945_v10 = vld [vmem:[#allocation8 + $0x1628] ss:$16 sps:$4 sm:$0xff]  }
 0x391   :  { %5885 = vmatpush1.bf16.msra.mxu1 %v7867_v11  ;;  %5394 = vmatprep.subr.bf16.mxu0 %v7872_v12  ;;  %v7950_v11 = vld [vmem:[#allocation8 + $0x1644] ss:$16 sps:$4 sm:$0xff]   ;;  %v7953_v12 = vld [vmem:[#allocation8 + $0x164c] ss:$16 sps:$4 sm:$0xff]  }
 0x392   :  { %5886 = vmatprep.subr.bf16.mxu1 %v7875_v13  ;;  %v7948_v13 = vld [vmem:[#allocation8 + $0x1640] ss:$16 sps:$4 sm:$0xff]  }
 0x394   :  { %5395 = vmatpush1.bf16.msra.mxu0 %v7870_v14  ;;  %v7951_v14 = vld [vmem:[#allocation8 + $0x1648] ss:$16 sps:$4 sm:$0xff]  }
 0x395   :  { %5887 = vmatpush1.bf16.msra.mxu1 %v7873_v16  ;;  %5396 = vmatprep.subr.bf16.mxu0 %v7878_v17  ;;  %v7956_v16 = vld [vmem:[#allocation8 + $0x1664] ss:$16 sps:$4 sm:$0xff]   ;;  %v7959_v17 = vld [vmem:[#allocation8 + $0x166c] ss:$16 sps:$4 sm:$0xff]  }
 0x396   :  { %5888 = vmatprep.subr.bf16.mxu1 %v7881_v18  ;;  %v7954_v18 = vld [vmem:[#allocation8 + $0x1660] ss:$16 sps:$4 sm:$0xff]  }
 0x398   :  { %5397 = vmatpush1.bf16.msra.mxu0 %v7876_v19  ;;  %v7957_v19 = vld [vmem:[#allocation8 + $0x1668] ss:$16 sps:$4 sm:$0xff]  }
 0x399   :  { %5889 = vmatpush1.bf16.msra.mxu1 %v7879_v21  ;;  %5398 = vmatprep.subr.bf16.mxu0 %v7884_v20  ;;  %v7962_v21 = vld [vmem:[#allocation8 + $0x1684] ss:$16 sps:$4 sm:$0xff]   ;;  %v7965_v20 = vld [vmem:[#allocation8 + $0x168c] ss:$16 sps:$4 sm:$0xff]  }
 0x39a   :  { %5890 = vmatprep.subr.bf16.mxu1 %v7887_v22  ;;  %v7960_v22 = vld [vmem:[#allocation8 + $0x1680] ss:$16 sps:$4 sm:$0xff]  }
 0x39c   :  { %5399 = vmatpush1.bf16.msra.mxu0 %v7882_v23  ;;  %v7963_v23 = vld [vmem:[#allocation8 + $0x1688] ss:$16 sps:$4 sm:$0xff]  }
 0x39d   :  { %5891 = vmatpush1.bf16.msra.mxu1 %v7885_v27  ;;  %5400 = vmatprep.subr.bf16.mxu0 %v7890_v24  ;;  %v7968_v27 = vld [vmem:[#allocation8 + $0x16a4] ss:$16 sps:$4 sm:$0xff]   ;;  %v7971_v24 = vld [vmem:[#allocation8 + $0x16ac] ss:$16 sps:$4 sm:$0xff]  }
 0x39e   :  { %5892 = vmatprep.subr.bf16.mxu1 %v7893_v25  ;;  %v7966_v25 = vld [vmem:[#allocation8 + $0x16a0] ss:$16 sps:$4 sm:$0xff]  }
 0x3a0   :  { %5401 = vmatpush1.bf16.msra.mxu0 %v7888_v26  ;;  %v7969_v26 = vld [vmem:[#allocation8 + $0x16a8] ss:$16 sps:$4 sm:$0xff]  }
 0x3a1   :  { %5893 = vmatpush1.bf16.msra.mxu1 %v7891_v34  ;;  %5402 = vmatprep.subr.bf16.mxu0 %v7896_v28  ;;  %v7974_v34 = vld [vmem:[#allocation8 + $0x16c4] ss:$16 sps:$4 sm:$0xff]   ;;  %v7977_v28 = vld [vmem:[#allocation8 + $0x16cc] ss:$16 sps:$4 sm:$0xff]  }
 0x3a2   :  { %5894 = vmatprep.subr.bf16.mxu1 %v7899_v39  ;;  %v7972_v39 = vld [vmem:[#allocation8 + $0x16c0] ss:$16 sps:$4 sm:$0xff]  }
 0x3a4   :  { %5403 = vmatpush1.bf16.msra.mxu0 %v7894_v29  ;;  %v7975_v29 = vld [vmem:[#allocation8 + $0x16c8] ss:$16 sps:$4 sm:$0xff]  }
 0x3a5   :  { %5895 = vmatpush1.bf16.msra.mxu1 %v7897_v30  ;;  %5404 = vmatprep.subr.bf16.mxu0 %v7902_v31  ;;  %v7980_v30 = vld [vmem:[#allocation8 + $0x16e4] ss:$16 sps:$4 sm:$0xff]   ;;  %v7983_v31 = vld [vmem:[#allocation8 + $0x16ec] ss:$16 sps:$4 sm:$0xff]  }
 0x3a6   :  { %5896 = vmatprep.subr.bf16.mxu1 %v7905_v32  ;;  %v7978_v32 = vld [vmem:[#allocation8 + $0x16e0] ss:$16 sps:$4 sm:$0xff]  }
 0x3a8   :  { %5405 = vmatpush1.bf16.msra.mxu0 %v7900_v33  ;;  %v7981_v33 = vld [vmem:[#allocation8 + $0x16e8] ss:$16 sps:$4 sm:$0xff]  }
 0x3a9   :  { %5897 = vmatpush1.bf16.msra.mxu1 %v7903_v35  ;;  %5406 = vmatprep.subr.bf16.mxu0 %v7908_v36  ;;  %v7986_v35 = vld [vmem:[#allocation8 + $0x1704] ss:$16 sps:$4 sm:$0xff]   ;;  %v7989_v36 = vld [vmem:[#allocation8 + $0x170c] ss:$16 sps:$4 sm:$0xff]  }
 0x3aa   :  { %5898 = vmatprep.subr.bf16.mxu1 %v7911_v37  ;;  %v7984_v37 = vld [vmem:[#allocation8 + $0x1700] ss:$16 sps:$4 sm:$0xff]  }
 0x3ac   :  { %5407 = vmatpush1.bf16.msra.mxu0 %v7906_v38  ;;  %v7987_v38 = vld [vmem:[#allocation8 + $0x1708] ss:$16 sps:$4 sm:$0xff]  }
 0x3ad   :  { %5899 = vmatpush1.bf16.msra.mxu1 %v7909_v40  ;;  %5408 = vmatprep.subr.bf16.mxu0 %v7914_v41  ;;  %v7992_v40 = vld [vmem:[#allocation8 + $0x1724] ss:$16 sps:$4 sm:$0xff]   ;;  %v7995_v41 = vld [vmem:[#allocation8 + $0x172c] ss:$16 sps:$4 sm:$0xff]  }
 0x3ae   :  { %5900 = vmatprep.subr.bf16.mxu1 %v7917_v42  ;;  %v7990_v42 = vld [vmem:[#allocation8 + $0x1720] ss:$16 sps:$4 sm:$0xff]  }
 0x3b0   :  { %5409 = vmatpush1.bf16.msra.mxu0 %v7912_v43  ;;  %v7993_v43 = vld [vmem:[#allocation8 + $0x1728] ss:$16 sps:$4 sm:$0xff]  }
 0x3b1   :  { %5901 = vmatpush1.bf16.msra.mxu1 %v7915_v44  ;;  %5410 = vmatprep.subr.bf16.mxu0 %v7920_v45  ;;  %v7998_v44 = vld [vmem:[#allocation8 + $0x1744] ss:$16 sps:$4 sm:$0xff]   ;;  %v8001_v45 = vld [vmem:[#allocation8 + $0x174c] ss:$16 sps:$4 sm:$0xff]  }
 0x3b2   :  { %5902 = vmatprep.subr.bf16.mxu1 %v7923_v46  ;;  %v7996_v46 = vld [vmem:[#allocation8 + $0x1740] ss:$16 sps:$4 sm:$0xff]  }
 0x3b4   :  { %5411 = vmatpush1.bf16.msra.mxu0 %v7918_v47  ;;  %v7999_v47 = vld [vmem:[#allocation8 + $0x1748] ss:$16 sps:$4 sm:$0xff]  }
 0x3b5   :  { %5903 = vmatpush1.bf16.msra.mxu1 %v7921_v48  ;;  %5412 = vmatprep.subr.bf16.mxu0 %v7926_v49  ;;  %v8004_v48 = vld [vmem:[#allocation8 + $0x1764] ss:$16 sps:$4 sm:$0xff]   ;;  %v8007_v49 = vld [vmem:[#allocation8 + $0x176c] ss:$16 sps:$4 sm:$0xff]  }
 0x3b6   :  { %5904 = vmatprep.subr.bf16.mxu1 %v7929_v50  ;;  %v8002_v50 = vld [vmem:[#allocation8 + $0x1760] ss:$16 sps:$4 sm:$0xff]  }
 0x3b8   :  { %5413 = vmatpush1.bf16.msra.mxu0 %v7924_v52  ;;  %v8005_v52 = vld [vmem:[#allocation8 + $0x1768] ss:$16 sps:$4 sm:$0xff]  }
 0x3b9   :  { %5905 = vmatpush1.bf16.msra.mxu1 %v7927_v53  ;;  %5414 = vmatprep.subr.bf16.mxu0 %v7932_v54  ;;  %v8010_v53 = vld [vmem:[#allocation8 + $0x1784] ss:$16 sps:$4 sm:$0xff]   ;;  %v8013_v54 = vld [vmem:[#allocation8 + $0x178c] ss:$16 sps:$4 sm:$0xff]  }
 0x3ba   :  { %5906 = vmatprep.subr.bf16.mxu1 %v7935_v55  ;;  %v8008_v55 = vld [vmem:[#allocation8 + $0x1780] ss:$16 sps:$4 sm:$0xff]  }
 0x3bc   :  { %5415 = vmatpush1.bf16.msra.mxu0 %v7930_v56  ;;  %v8011_v56 = vld [vmem:[#allocation8 + $0x1788] ss:$16 sps:$4 sm:$0xff]  }
 0x3bd   :  { %5907 = vmatpush1.bf16.msra.mxu1 %v7933_v57  ;;  %5425 = vmatprep.subr.bf16.mxu0 %v7938_v59  ;;  %v8016_v57 = vld [vmem:[#allocation8 + $0x17a4] ss:$16 sps:$4 sm:$0xff]   ;;  %v8017_v59 = vld [vmem:[#allocation8 + $0x17a8] ss:$16 sps:$4 sm:$0xff]  }
 0x3be   :  { %5917 = vmatprep.subr.bf16.mxu1 %v7941_v60  ;;  %v8022_v60 = vld [vmem:[#allocation8 + $0x17c4] ss:$16 sps:$4 sm:$0xff]  }
 0x3bf   :  { %5417 = vmatmul.mubr.bf16.vlgmr.msra.gmra.mrb[0].mxu0 %v340_v1 }
 0x3c0   :  { %5909 = vmatmul.mubr.bf16.vlgmr.msra.gmra.mrb[0].mxu1 %v340_v1  ;;  %5426 = vmatpush1.bf16.msra.mxu0 %v7936_v63  ;;  %v8023_v63 = vld [vmem:[#allocation8 + $0x17c8] ss:$16 sps:$4 sm:$0xff]   ;;  %v8028_v1 = vld [vmem:[#allocation8 + $0x17e4] ss:$16 sps:$4 sm:$0xff]  }
 0x3c1   :  { %5457 = vmatprep.mubr.bf16.mxu0 %v343_v6  ;;  %5918 = vmatpush1.bf16.msra.mxu1 %v7939_v2  ;;  %v8031_v2 = vld [vmem:[#allocation8 + $0x17ec] ss:$16 sps:$4 sm:$0xff]  }
 0x3c2   :  { %5949 = vmatprep.mubr.bf16.mxu1 %v343_v6  ;;  %5427 = vmatprep.subr.bf16.mxu0 %v7944_v5  ;;  %v8026_v5 = vld [vmem:[#allocation8 + $0x17e0] ss:$16 sps:$4 sm:$0xff]   ;;  %v8029_v6 = vld [vmem:[#allocation8 + $0x17e8] ss:$16 sps:$4 sm:$0xff]  }
 0x3c3   :  { %5919 = vmatprep.subr.bf16.mxu1 %v7947_v8  ;;  %v8063_v8 = vld [vmem:[#allocation4 + $0xb0] sm:$0xff] }
 0x3c4   :  { %5428 = vmatpush1.bf16.msra.mxu0 %v7942_v9  ;;  %v318_v9 = vmul.f32 %v8063_v8, %v8357_v0 }
 0x3c5   :  { %5920 = vmatpush1.bf16.msra.mxu1 %v7945_v10  ;;  %5429 = vmatprep.subr.bf16.mxu0 %v7950_v11  ;;  %v1112_v11 = vld [vmem:[#allocation9] sm:$0xf] }
 0x3c6   :  { %5921 = vmatprep.subr.bf16.mxu1 %v7953_v12  ;;  %v342_v10 = vpack.c.bf16 %v318_v9, %v318_v9  ;;  %v1117_v12 = vrot.slane %v1112_v11, %v8296_v3 }
 0x3c8   :  { %5430 = vmatpush1.bf16.msra.mxu0 %v7948_v13  ;;  %v5962_v13 = vld [vmem:[#allocation11] sm:$0xf] }
 0x3c9   :  { %5922 = vmatpush1.bf16.msra.mxu1 %v7951_v14  ;;  %5431 = vmatprep.subr.bf16.mxu0 %v7956_v16  ;;  %v1125_v14 = vrot.slane %v1112_v11, %v8300_v7  ;;  %v1121_v16 = vrot.slane %v1112_v11, %v8298_v4  ;;  %v5967_v0 = vrot.slane %v5962_v13, %v8296_v3 }
 0x3ca   :  { %5923 = vmatprep.subr.bf16.mxu1 %v7959_v17  ;;  %v1129_v17 = vrot.slane %v1112_v11, %v8306_v15 }
 0x3cc   :  { %5432 = vmatpush1.bf16.msra.mxu0 %v7954_v18 }
 0x3cd   :  { %5924 = vmatpush1.bf16.msra.mxu1 %v7957_v19  ;;  %5433 = vmatprep.subr.bf16.mxu0 %v7962_v21 }
 0x3ce   :  { %5925 = vmatprep.subr.bf16.mxu1 %v7965_v20 }
 0x3d0   :  { %5434 = vmatpush1.bf16.msra.mxu0 %v7960_v22 }
 0x3d1   :  { %5926 = vmatpush1.bf16.msra.mxu1 %v7963_v23  ;;  %5435 = vmatprep.subr.bf16.mxu0 %v7968_v27  ;;  %v5971_v27 = vrot.slane %v5962_v13, %v8298_v4 }
 0x3d2   :  { %5927 = vmatprep.subr.bf16.mxu1 %v7971_v24 }
 0x3d4   :  { %5436 = vmatpush1.bf16.msra.mxu0 %v7966_v25 }
 0x3d5   :  { %5928 = vmatpush1.bf16.msra.mxu1 %v7969_v26  ;;  %5437 = vmatprep.subr.bf16.mxu0 %v7974_v34 }
 0x3d6   :  { %5929 = vmatprep.subr.bf16.mxu1 %v7977_v28 }
 0x3d8   :  { %5438 = vmatpush1.bf16.msra.mxu0 %v7972_v39 }
 0x3d9   :  { %5930 = vmatpush1.bf16.msra.mxu1 %v7975_v29  ;;  %5439 = vmatprep.subr.bf16.mxu0 %v7980_v30  ;;  %v5975_v30 = vrot.slane %v5962_v13, %v8300_v7 }
 0x3da   :  { %5931 = vmatprep.subr.bf16.mxu1 %v7983_v31 }
 0x3dc   :  { %5440 = vmatpush1.bf16.msra.mxu0 %v7978_v32 }
 0x3dd   :  { %5932 = vmatpush1.bf16.msra.mxu1 %v7981_v33  ;;  %5441 = vmatprep.subr.bf16.mxu0 %v7986_v35 }
 0x3de   :  { %5933 = vmatprep.subr.bf16.mxu1 %v7989_v36  ;;  %v5979_v36 = vrot.slane %v5962_v13, %v8306_v15 }
 0x3e0   :  { %5442 = vmatpush1.bf16.msra.mxu0 %v7984_v37 }
 0x3e1   :  { %5934 = vmatpush1.bf16.msra.mxu1 %v7987_v38  ;;  %5443 = vmatprep.subr.bf16.mxu0 %v7992_v40 }
 0x3e2   :  { %5935 = vmatprep.subr.bf16.mxu1 %v7995_v41 }
 0x3e4   :  { %5444 = vmatpush1.bf16.msra.mxu0 %v7990_v42  ;;  %v5994_v42 = vstv %s8403_s6 }
 0x3e5   :  { %5936 = vmatpush1.bf16.msra.mxu1 %v7993_v43  ;;  %5445 = vmatprep.subr.bf16.mxu0 %v7998_v44 }
 0x3e6   :  { %5937 = vmatprep.subr.bf16.mxu1 %v8001_v45 }
 0x3e8   :  { %5446 = vmatpush1.bf16.msra.mxu0 %v7996_v46 }
 0x3e9   :  { %5938 = vmatpush1.bf16.msra.mxu1 %v7999_v47  ;;  %5447 = vmatprep.subr.bf16.mxu0 %v8004_v48 }
 0x3ea   :  { %5939 = vmatprep.subr.bf16.mxu1 %v8007_v49 }
 0x3ec   :  { %5448 = vmatpush1.bf16.msra.mxu0 %v8002_v50 }
 0x3ed   :  { %5940 = vmatpush1.bf16.msra.mxu1 %v8005_v52  ;;  %5449 = vmatprep.subr.bf16.mxu0 %v8010_v53 }
 0x3ee   :  { %5941 = vmatprep.subr.bf16.mxu1 %v8013_v54 }
 0x3f0   :  { %5450 = vmatpush1.bf16.msra.mxu0 %v8008_v55 }
 0x3f1   :  { %5942 = vmatpush1.bf16.msra.mxu1 %v8011_v56  ;;  %5451 = vmatprep.subr.bf16.mxu0 %v8016_v57 }
 0x3f2   :  { %5943 = vmatprep.subr.bf16.mxu1 %v8019_v58 }
 0x3f4   :  { %5452 = vmatpush1.bf16.msra.mxu0 %v8014_v51 }
 0x3f5   :  { %5944 = vmatpush1.bf16.msra.mxu1 %v8017_v59  ;;  %5453 = vmatprep.subr.bf16.mxu0 %v8022_v60 }
 0x3f6   :  { %5945 = vmatprep.subr.bf16.mxu1 %v8025_v61 }
 0x3f8   :  { %5454 = vmatpush1.bf16.msra.mxu0 %v8020_v62 }
 0x3f9   :  { %5946 = vmatpush1.bf16.msra.mxu1 %v8023_v63  ;;  %5455 = vmatprep.subr.bf16.mxu0 %v8028_v1 }
 0x3fa   :  { %5947 = vmatprep.subr.bf16.mxu1 %v8031_v2 }
 0x3fc   :  { %5456 = vmatpush1.bf16.msra.mxu0 %v8026_v5 }
 0x3fd   :  { %5948 = vmatpush1.bf16.msra.mxu1 %v8029_v6 }
 0x3ff   :  { %5458 = vmatmul.mubr.bf16.vlgmr.msra.gmra.mrb[0].mxu0 %v342_v10 }
 0x400   :  { %5950 = vmatmul.mubr.bf16.vlgmr.msra.gmra.mrb[0].mxu1 %v342_v10 }
 0x4d2   :  { %v5459_v18 = vpop.f32.mrb[0].mxu0 }
 0x4d3   :  { %v6781_v19 = vadd.f32 %v5459_v18, %v1117_v12  ;;  %v5951_v21 = vpop.f32.mrb[0].mxu1  ;;  %v5461_v20 = vpop.f32.mrb[1].mxu0 }
 0x4d4   :  { %v6783_v22 = vadd.f32 %v5951_v21, %v1125_v14  ;;  %v6782_v23 = vadd.f32 %v5461_v20, %v1121_v16  ;;  %v5953_v24 = vpop.f32.mrb[1].mxu1  ;;  %v5463_v25 = vpop.f32.mrb[2].mxu0 }
 0x4d5   :  { %v5958_v26 = vmax.f32 %v6781_v19, 0.0  ;;  %v6784_v34 = vadd.f32 %v5953_v24, %v1129_v17  ;;  %v5955_v28 = vpop.f32.mrb[2].mxu1  ;;  %v5464_v39 = vpop.f32.mrb[3].mxu0 }
 0x4d6   :  { %v5960_v29 = vmax.f32 %v6783_v22, 0.0  ;;  %v5959_v31 = vmax.f32 %v6782_v23, 0.0  ;;  %v5956_v32 = vpop.f32.mrb[3].mxu1 }
 0x4d7   :  { %v5984_v33 = vmul.f32 %v5967_v0, %v5958_v26  ;;  %v5961_v3 = vmax.f32 %v6784_v34, 0.0 }
 0x4d8   :  { %v5985_v35 = vmul.f32 %v5971_v27, %v5959_v31  ;;  %v5986_v37 = vmul.f32 %v5975_v30, %v5960_v29 }
 0x4d9   :  { %v5987_v40 = vmul.f32 %v5979_v36, %v5961_v3 }
 0x4da   :  { %v5988_v38 = vadd.f32 %v5985_v35, %v5984_v33 }
 0x4dc   :  { %v5989_v4 = vadd.f32 %v5988_v38, %v5986_v37 }
 0x4de   :  { %v5990_v41 = vadd.f32 %v5989_v4, %v5987_v40 }
 0x4e0   :  { %5991 = vadd.xlane.f32.xlu0 %v5990_v41 }
 0x56d   :  { %v5992_v43 = vpop.xlane.xlu0 %5991 }
 0x56e   :  { %v5995_v44 = vadd.f32 %v5994_v42, %v5992_v43 }
 0x570   :  { %v6780_v7 = vmul.f32 -1.442695, %v5995_v44 }
 0x572   :  { %8036 = vpow2.f32 %v6780_v7 }
 0x57c   :  { %v8037_v45 = vpop.eup %8036 }
 0x57d   :  { %v5999_v46 = vadd.f32 1.0, %v8037_v45 }
 0x57f   :  { %8038 = vrcp.f32 %v5999_v46 }
 0x589   :  { %v8039_v47 = vpop.eup %8038 }
 0x58a   :  { %6003 = vst.msk [vmem:[%s8404_s7] sm:$0xff] %vm6002_vm0, %v8039_v47 }
 0x58b   :  { %6008 = vsyncpa [#allocation5], 1 }
 0x58c   :  { %6009 = vsyncpa [#allocation7], 1 }
 0x58d   :  { %6010 = vsyncpa [#allocation10], 1 }

</bundles_post_ra>
